<compile_context>
chip_gen: v6e
topology: v6e:2x2x1
jax: 0.10.0
libtpu: 0.0.40
codegen_flags: <defaults>
</compile_context>

<pallas_src>
import jax
import jax.numpy as jnp
from jax import lax
from jax.experimental import pallas as pl
from jax.experimental.pallas import tpu as pltpu

KSIZE = 7
PAD = 3  # padding = 3 for kernel_size 7


def _spatial_attention_kernel(w_ref, x_ref, o_ref, spad_ref, mpad_ref):
    # w_ref:   SMEM (2*K*K,) f32; [0:49] = avg-branch weights already / C,
    #          [49:98] = max-branch weights (row-major kh*K + kw).
    # x_ref:   VMEM (bt, C, H, W) unpadded input batch tile.
    # o_ref:   VMEM (bt, H, W) output attention maps.
    # spad_ref/mpad_ref: VMEM (Hp, Wp) zero-bordered padded planes (scratch).
    bt, C, H, W = x_ref.shape
    K = KSIZE
    Hp, Wp = spad_ref.shape

    # Zero the padded planes once per grid step: only the 3-pixel border has to
    # stay zero (== the conv's zero padding); the interior is fully overwritten
    # for every batch element below.
    spad_ref[...] = jnp.zeros_like(spad_ref)
    mpad_ref[...] = jnp.zeros_like(mpad_ref)

    for b in range(bt):  # static unroll over the (small) batch tile
        # ---- streaming channel reduction: one (H, W) plane live at a time ----
        x0 = x_ref[b, 0].astype(jnp.float32)
        if C <= 8:
            # Short trip count: unrolled running reduction with static indices.
            s_plane, m_plane = x0, x0
            for c in range(1, C):
                p = x_ref[b, c].astype(jnp.float32)
                s_plane = s_plane + p
                m_plane = jnp.maximum(m_plane, p)
        else:
            def chan_body(c, carry):
                s, m = carry
                p = x_ref[b, c].astype(jnp.float32)
                return s + p, jnp.maximum(m, p)
            s_plane, m_plane = lax.fori_loop(1, C, chan_body, (x0, x0))

        # Embed the interiors into the zero-bordered padded planes.
        spad_ref[PAD:PAD + H, PAD:PAD + W] = s_plane  # channel sum (1/C in w)
        mpad_ref[PAD:PAD + H, PAD:PAD + W] = m_plane  # channel max

        sum_pad = spad_ref[...]   # (Hp, Wp)
        max_pad = mpad_ref[...]   # (Hp, Wp)

        # Hoist the kh (row) windows: 7 sublane-shifted slices per plane.
        sum_rows = [sum_pad[kh:kh + H, :] for kh in range(K)]
        max_rows = [max_pad[kh:kh + H, :] for kh in range(K)]

        # 2->1 channel 7x7 conv: 98 scalar(SMEM) x vector FMAs on full-width
        # (H, Wp) slabs, then 7 lane-shifted column slices + adds.
        acc = jnp.zeros((H, W), jnp.float32)
        for kw in range(K):
            slab = jnp.zeros((H, Wp), jnp.float32)
            for kh in range(K):
                wa = w_ref[kh * K + kw]            # avg-branch weight (pre / C)
                wm = w_ref[K * K + kh * K + kw]    # max-branch weight
                slab = slab + wa * sum_rows[kh] + wm * max_rows[kh]
            acc = acc + slab[:, kw:kw + W]

        o_ref[b] = jax.nn.sigmoid(acc).astype(o_ref.dtype)


def spatial_attention(x, conv_w):
    """x: (B, C, H, W); conv_w: (1, 2, K, K) -> (B, 1, H, W) attention map."""
    B, C, H, W = x.shape
    K = KSIZE
    assert conv_w.shape == (1, 2, K, K)
    Hp, Wp = H + 2 * PAD, W + 2 * PAD

    # Fold 1/C into the avg-branch weights and flatten to a (2*K*K,) SMEM array.
    w = conv_w.astype(jnp.float32).reshape(2, K, K)
    w_flat = jnp.concatenate(
        [(w[0] * (1.0 / C)).reshape(-1), w[1].reshape(-1)], axis=0)

    # Batch tile: largest divisor of B (capped) whose input block stays under
    # ~4 MiB, so each grid step moves enough data to amortize per-step overhead
    # while the double-buffered block fits comfortably in scoped VMEM on all
    # generations (incl. v7x's 64 MiB physical VMEM).
    bytes_per_b = C * H * W * x.dtype.itemsize
    budget = 4 * 1024 * 1024
    bt = 1
    for cand in range(min(B, 8), 0, -1):
        if B % cand == 0 and cand * bytes_per_b <= budget:
            bt = cand
            break

    out = pl.pallas_call(
        _spatial_attention_kernel,
        out_shape=jax.ShapeDtypeStruct((B, H, W), x.dtype),
        grid_spec=pltpu.PrefetchScalarGridSpec(
            num_scalar_prefetch=0,
            grid=(B // bt,),
            in_specs=[
                # tiny conv weights -> SMEM, read as scalars in the kernel
                pl.BlockSpec(memory_space=pltpu.MemorySpace.SMEM),
                # one unpadded batch tile per grid step (no HBM-side padding)
                pl.BlockSpec((bt, C, H, W), lambda g: (g, 0, 0, 0)),
            ],
            out_specs=pl.BlockSpec((bt, H, W), lambda g: (g, 0, 0)),
            scratch_shapes=[
                pltpu.VMEM((Hp, Wp), jnp.float32),  # padded channel-sum plane
                pltpu.VMEM((Hp, Wp), jnp.float32),  # padded channel-max plane
            ],
        ),
        compiler_params=pltpu.CompilerParams(
            dimension_semantics=("parallel",)),
    )(w_flat, x)
    return out.reshape(B, 1, H, W)


def _reference(x, conv_w):
    avg = jnp.mean(x, axis=1, keepdims=True)
    mx = jnp.max(x, axis=1, keepdims=True)
    xc = jnp.concatenate([avg, mx], axis=1)
    y = lax.conv_general_dilated(
        xc, conv_w, window_strides=(1, 1),
        padding=((PAD, PAD), (PAD, PAD)),
        dimension_numbers=("NCHW", "OIHW", "NCHW"))
    return jax.nn.sigmoid(y)


if __name__ == "__main__":
    key = jax.random.PRNGKey(0)
    kx, kw = jax.random.split(key)

    B, C, H, W = 2, 4, 16, 16
    x = jax.random.normal(kx, (B, C, H, W), dtype=jnp.float32)
    # Deterministic synthetic conv weight: shape (out=1, in=2, 7, 7), no bias.
    conv_w = 0.1 * jax.random.normal(kw, (1, 2, KSIZE, KSIZE), dtype=jnp.float32)

    out = spatial_attention(x, conv_w)
    out = jax.block_until_ready(out)

    ref = _reference(x, conv_w)
    assert out.shape == (B, 1, H, W)
    err = float(jnp.max(jnp.abs(out - ref)))
    assert jnp.allclose(out, ref, atol=1e-5, rtol=1e-5), err

    print("KERNEL_OK")
</pallas_src>

<mosaic_0001>
module attributes {stable_mosaic.version = 11 : i64} {
  func.func @_spatial_attention_kernel(%arg0: i32, %arg1: memref<98xf32, #tpu.memory_space<smem>>, %arg2: memref<2x4x16x16xf32, #tpu.memory_space<vmem>>, %arg3: memref<2x16x16xf32, #tpu.memory_space<vmem>>, %arg4: memref<22x22xf32, #tpu.memory_space<vmem>>, %arg5: memref<22x22xf32, #tpu.memory_space<vmem>>) attributes {dimension_semantics = [#tpu.dimension_semantics<parallel>], iteration_bounds = array<i64: 1>, scalar_prefetch = 0 : i64, scratch_operands = 2 : i64, tpu.core_type = #tpu.core_type<tc>, window_params = [{transform_indices = @transform_0, window_bounds = array<i64: 98>}, {transform_indices = @transform_1, window_bounds = array<i64: 2, 4, 16, 16>}, {transform_indices = @transform_2, window_bounds = array<i64: 2, 16, 16>}]} {
    %cst = arith.constant 0.000000e+00 : f32
    %0 = vector.broadcast %cst : f32 to vector<22x22xf32>
    %c0 = arith.constant 0 : index
    %c0_0 = arith.constant 0 : index
    %1 = vector.load %arg4[%c0, %c0_0] : memref<22x22xf32, #tpu.memory_space<vmem>>, vector<22x22xf32>
    tpu.vector_store %arg4[%c0, %c0_0], %0 {strides = array<i32>} : memref<22x22xf32, #tpu.memory_space<vmem>>, vector<22x22xf32>,
    %cst_1 = arith.constant 0.000000e+00 : f32
    %2 = vector.broadcast %cst_1 : f32 to vector<22x22xf32>
    %c0_2 = arith.constant 0 : index
    %c0_3 = arith.constant 0 : index
    %3 = vector.load %arg5[%c0_2, %c0_3] : memref<22x22xf32, #tpu.memory_space<vmem>>, vector<22x22xf32>
    tpu.vector_store %arg5[%c0_2, %c0_3], %2 {strides = array<i32>} : memref<22x22xf32, #tpu.memory_space<vmem>>, vector<22x22xf32>,
    %c0_4 = arith.constant 0 : index
    %c0_5 = arith.constant 0 : index
    %c0_6 = arith.constant 0 : index
    %c0_7 = arith.constant 0 : index
    %4 = vector.load %arg2[%c0_4, %c0_5, %c0_6, %c0_7] : memref<2x4x16x16xf32, #tpu.memory_space<vmem>>, vector<1x1x16x16xf32>
    %5 = vector.shape_cast %4 : vector<1x1x16x16xf32> to vector<16x16xf32>
    %c0_8 = arith.constant 0 : index
    %c1 = arith.constant 1 : index
    %c0_9 = arith.constant 0 : index
    %c0_10 = arith.constant 0 : index
    %6 = vector.load %arg2[%c0_8, %c1, %c0_9, %c0_10] : memref<2x4x16x16xf32, #tpu.memory_space<vmem>>, vector<1x1x16x16xf32>
    %7 = vector.shape_cast %6 : vector<1x1x16x16xf32> to vector<16x16xf32>
    %8 = arith.addf %5, %7 : vector<16x16xf32>
    %9 = arith.maximumf %5, %7 : vector<16x16xf32>
    %c0_11 = arith.constant 0 : index
    %c2 = arith.constant 2 : index
    %c0_12 = arith.constant 0 : index
    %c0_13 = arith.constant 0 : index
    %10 = vector.load %arg2[%c0_11, %c2, %c0_12, %c0_13] : memref<2x4x16x16xf32, #tpu.memory_space<vmem>>, vector<1x1x16x16xf32>
    %11 = vector.shape_cast %10 : vector<1x1x16x16xf32> to vector<16x16xf32>
    %12 = arith.addf %8, %11 : vector<16x16xf32>
    %13 = arith.maximumf %9, %11 : vector<16x16xf32>
    %c0_14 = arith.constant 0 : index
    %c3 = arith.constant 3 : index
    %c0_15 = arith.constant 0 : index
    %c0_16 = arith.constant 0 : index
    %14 = vector.load %arg2[%c0_14, %c3, %c0_15, %c0_16] : memref<2x4x16x16xf32, #tpu.memory_space<vmem>>, vector<1x1x16x16xf32>
    %15 = vector.shape_cast %14 : vector<1x1x16x16xf32> to vector<16x16xf32>
    %16 = arith.addf %12, %15 : vector<16x16xf32>
    %17 = arith.maximumf %13, %15 : vector<16x16xf32>
    %c3_17 = arith.constant 3 : index
    %c3_18 = arith.constant 3 : index
    %18 = vector.load %arg4[%c3_17, %c3_18] : memref<22x22xf32, #tpu.memory_space<vmem>>, vector<16x16xf32>
    tpu.vector_store %arg4[%c3_17, %c3_18], %16 {strides = array<i32>} : memref<22x22xf32, #tpu.memory_space<vmem>>, vector<16x16xf32>,
    %c3_19 = arith.constant 3 : index
    %c3_20 = arith.constant 3 : index
    %19 = vector.load %arg5[%c3_19, %c3_20] : memref<22x22xf32, #tpu.memory_space<vmem>>, vector<16x16xf32>
    tpu.vector_store %arg5[%c3_19, %c3_20], %17 {strides = array<i32>} : memref<22x22xf32, #tpu.memory_space<vmem>>, vector<16x16xf32>,
    %c0_21 = arith.constant 0 : index
    %c0_22 = arith.constant 0 : index
    %20 = vector.load %arg4[%c0_21, %c0_22] : memref<22x22xf32, #tpu.memory_space<vmem>>, vector<22x22xf32>
    %c0_23 = arith.constant 0 : index
    %c0_24 = arith.constant 0 : index
    %21 = vector.load %arg5[%c0_23, %c0_24] : memref<22x22xf32, #tpu.memory_space<vmem>>, vector<22x22xf32>
    %22 = vector.extract_strided_slice %20 {offsets = [0, 0], sizes = [16, 22], strides = [1, 1]} : vector<22x22xf32> to vector<16x22xf32>
    %23 = vector.extract_strided_slice %20 {offsets = [1, 0], sizes = [16, 22], strides = [1, 1]} : vector<22x22xf32> to vector<16x22xf32>
    %24 = vector.extract_strided_slice %20 {offsets = [2, 0], sizes = [16, 22], strides = [1, 1]} : vector<22x22xf32> to vector<16x22xf32>
    %25 = vector.extract_strided_slice %20 {offsets = [3, 0], sizes = [16, 22], strides = [1, 1]} : vector<22x22xf32> to vector<16x22xf32>
    %26 = vector.extract_strided_slice %20 {offsets = [4, 0], sizes = [16, 22], strides = [1, 1]} : vector<22x22xf32> to vector<16x22xf32>
    %27 = vector.extract_strided_slice %20 {offsets = [5, 0], sizes = [16, 22], strides = [1, 1]} : vector<22x22xf32> to vector<16x22xf32>
    %28 = vector.extract_strided_slice %20 {offsets = [6, 0], sizes = [16, 22], strides = [1, 1]} : vector<22x22xf32> to vector<16x22xf32>
    %29 = vector.extract_strided_slice %21 {offsets = [0, 0], sizes = [16, 22], strides = [1, 1]} : vector<22x22xf32> to vector<16x22xf32>
    %30 = vector.extract_strided_slice %21 {offsets = [1, 0], sizes = [16, 22], strides = [1, 1]} : vector<22x22xf32> to vector<16x22xf32>
    %31 = vector.extract_strided_slice %21 {offsets = [2, 0], sizes = [16, 22], strides = [1, 1]} : vector<22x22xf32> to vector<16x22xf32>
    %32 = vector.extract_strided_slice %21 {offsets = [3, 0], sizes = [16, 22], strides = [1, 1]} : vector<22x22xf32> to vector<16x22xf32>
    %33 = vector.extract_strided_slice %21 {offsets = [4, 0], sizes = [16, 22], strides = [1, 1]} : vector<22x22xf32> to vector<16x22xf32>
    %34 = vector.extract_strided_slice %21 {offsets = [5, 0], sizes = [16, 22], strides = [1, 1]} : vector<22x22xf32> to vector<16x22xf32>
    %35 = vector.extract_strided_slice %21 {offsets = [6, 0], sizes = [16, 22], strides = [1, 1]} : vector<22x22xf32> to vector<16x22xf32>
    %cst_25 = arith.constant 0.000000e+00 : f32
    %36 = vector.broadcast %cst_25 : f32 to vector<16x16xf32>
    %cst_26 = arith.constant 0.000000e+00 : f32
    %37 = vector.broadcast %cst_26 : f32 to vector<16x22xf32>
    %c0_27 = arith.constant 0 : index
    %38 = memref.load %arg1[%c0_27] : memref<98xf32, #tpu.memory_space<smem>>
    %c49 = arith.constant 49 : index
    %39 = memref.load %arg1[%c49] : memref<98xf32, #tpu.memory_space<smem>>
    %40 = vector.broadcast %38 : f32 to vector<16x22xf32>
    %41 = arith.mulf %40, %22 : vector<16x22xf32>
    %42 = arith.addf %37, %41 : vector<16x22xf32>
    %43 = vector.broadcast %39 : f32 to vector<16x22xf32>
    %44 = arith.mulf %43, %29 : vector<16x22xf32>
    %45 = arith.addf %42, %44 : vector<16x22xf32>
    %c7 = arith.constant 7 : index
    %46 = memref.load %arg1[%c7] : memref<98xf32, #tpu.memory_space<smem>>
    %c56 = arith.constant 56 : index
    %47 = memref.load %arg1[%c56] : memref<98xf32, #tpu.memory_space<smem>>
    %48 = vector.broadcast %46 : f32 to vector<16x22xf32>
    %49 = arith.mulf %48, %23 : vector<16x22xf32>
    %50 = arith.addf %45, %49 : vector<16x22xf32>
    %51 = vector.broadcast %47 : f32 to vector<16x22xf32>
    %52 = arith.mulf %51, %30 : vector<16x22xf32>
    %53 = arith.addf %50, %52 : vector<16x22xf32>
    %c14 = arith.constant 14 : index
    %54 = memref.load %arg1[%c14] : memref<98xf32, #tpu.memory_space<smem>>
    %c63 = arith.constant 63 : index
    %55 = memref.load %arg1[%c63] : memref<98xf32, #tpu.memory_space<smem>>
    %56 = vector.broadcast %54 : f32 to vector<16x22xf32>
    %57 = arith.mulf %56, %24 : vector<16x22xf32>
    %58 = arith.addf %53, %57 : vector<16x22xf32>
    %59 = vector.broadcast %55 : f32 to vector<16x22xf32>
    %60 = arith.mulf %59, %31 : vector<16x22xf32>
    %61 = arith.addf %58, %60 : vector<16x22xf32>
    %c21 = arith.constant 21 : index
    %62 = memref.load %arg1[%c21] : memref<98xf32, #tpu.memory_space<smem>>
    %c70 = arith.constant 70 : index
    %63 = memref.load %arg1[%c70] : memref<98xf32, #tpu.memory_space<smem>>
    %64 = vector.broadcast %62 : f32 to vector<16x22xf32>
    %65 = arith.mulf %64, %25 : vector<16x22xf32>
    %66 = arith.addf %61, %65 : vector<16x22xf32>
    %67 = vector.broadcast %63 : f32 to vector<16x22xf32>
    %68 = arith.mulf %67, %32 : vector<16x22xf32>
    %69 = arith.addf %66, %68 : vector<16x22xf32>
    %c28 = arith.constant 28 : index
    %70 = memref.load %arg1[%c28] : memref<98xf32, #tpu.memory_space<smem>>
    %c77 = arith.constant 77 : index
    %71 = memref.load %arg1[%c77] : memref<98xf32, #tpu.memory_space<smem>>
    %72 = vector.broadcast %70 : f32 to vector<16x22xf32>
    %73 = arith.mulf %72, %26 : vector<16x22xf32>
    %74 = arith.addf %69, %73 : vector<16x22xf32>
    %75 = vector.broadcast %71 : f32 to vector<16x22xf32>
    %76 = arith.mulf %75, %33 : vector<16x22xf32>
    %77 = arith.addf %74, %76 : vector<16x22xf32>
    %c35 = arith.constant 35 : index
    %78 = memref.load %arg1[%c35] : memref<98xf32, #tpu.memory_space<smem>>
    %c84 = arith.constant 84 : index
    %79 = memref.load %arg1[%c84] : memref<98xf32, #tpu.memory_space<smem>>
    %80 = vector.broadcast %78 : f32 to vector<16x22xf32>
    %81 = arith.mulf %80, %27 : vector<16x22xf32>
    %82 = arith.addf %77, %81 : vector<16x22xf32>
    %83 = vector.broadcast %79 : f32 to vector<16x22xf32>
    %84 = arith.mulf %83, %34 : vector<16x22xf32>
    %85 = arith.addf %82, %84 : vector<16x22xf32>
    %c42 = arith.constant 42 : index
    %86 = memref.load %arg1[%c42] : memref<98xf32, #tpu.memory_space<smem>>
    %c91 = arith.constant 91 : index
    %87 = memref.load %arg1[%c91] : memref<98xf32, #tpu.memory_space<smem>>
    %88 = vector.broadcast %86 : f32 to vector<16x22xf32>
    %89 = arith.mulf %88, %28 : vector<16x22xf32>
    %90 = arith.addf %85, %89 : vector<16x22xf32>
    %91 = vector.broadcast %87 : f32 to vector<16x22xf32>
    %92 = arith.mulf %91, %35 : vector<16x22xf32>
    %93 = arith.addf %90, %92 : vector<16x22xf32>
    %94 = vector.extract_strided_slice %93 {offsets = [0, 0], sizes = [16, 16], strides = [1, 1]} : vector<16x22xf32> to vector<16x16xf32>
    %95 = arith.addf %36, %94 : vector<16x16xf32>
    %cst_28 = arith.constant 0.000000e+00 : f32
    %96 = vector.broadcast %cst_28 : f32 to vector<16x22xf32>
    %c1_29 = arith.constant 1 : index
    %97 = memref.load %arg1[%c1_29] : memref<98xf32, #tpu.memory_space<smem>>
    %c50 = arith.constant 50 : index
    %98 = memref.load %arg1[%c50] : memref<98xf32, #tpu.memory_space<smem>>
    %99 = vector.broadcast %97 : f32 to vector<16x22xf32>
    %100 = arith.mulf %99, %22 : vector<16x22xf32>
    %101 = arith.addf %96, %100 : vector<16x22xf32>
    %102 = vector.broadcast %98 : f32 to vector<16x22xf32>
    %103 = arith.mulf %102, %29 : vector<16x22xf32>
    %104 = arith.addf %101, %103 : vector<16x22xf32>
    %c8 = arith.constant 8 : index
    %105 = memref.load %arg1[%c8] : memref<98xf32, #tpu.memory_space<smem>>
    %c57 = arith.constant 57 : index
    %106 = memref.load %arg1[%c57] : memref<98xf32, #tpu.memory_space<smem>>
    %107 = vector.broadcast %105 : f32 to vector<16x22xf32>
    %108 = arith.mulf %107, %23 : vector<16x22xf32>
    %109 = arith.addf %104, %108 : vector<16x22xf32>
    %110 = vector.broadcast %106 : f32 to vector<16x22xf32>
    %111 = arith.mulf %110, %30 : vector<16x22xf32>
    %112 = arith.addf %109, %111 : vector<16x22xf32>
    %c15 = arith.constant 15 : index
    %113 = memref.load %arg1[%c15] : memref<98xf32, #tpu.memory_space<smem>>
    %c64 = arith.constant 64 : index
    %114 = memref.load %arg1[%c64] : memref<98xf32, #tpu.memory_space<smem>>
    %115 = vector.broadcast %113 : f32 to vector<16x22xf32>
    %116 = arith.mulf %115, %24 : vector<16x22xf32>
    %117 = arith.addf %112, %116 : vector<16x22xf32>
    %118 = vector.broadcast %114 : f32 to vector<16x22xf32>
    %119 = arith.mulf %118, %31 : vector<16x22xf32>
    %120 = arith.addf %117, %119 : vector<16x22xf32>
    %c22 = arith.constant 22 : index
    %121 = memref.load %arg1[%c22] : memref<98xf32, #tpu.memory_space<smem>>
    %c71 = arith.constant 71 : index
    %122 = memref.load %arg1[%c71] : memref<98xf32, #tpu.memory_space<smem>>
    %123 = vector.broadcast %121 : f32 to vector<16x22xf32>
    %124 = arith.mulf %123, %25 : vector<16x22xf32>
    %125 = arith.addf %120, %124 : vector<16x22xf32>
    %126 = vector.broadcast %122 : f32 to vector<16x22xf32>
    %127 = arith.mulf %126, %32 : vector<16x22xf32>
    %128 = arith.addf %125, %127 : vector<16x22xf32>
    %c29 = arith.constant 29 : index
    %129 = memref.load %arg1[%c29] : memref<98xf32, #tpu.memory_space<smem>>
    %c78 = arith.constant 78 : index
    %130 = memref.load %arg1[%c78] : memref<98xf32, #tpu.memory_space<smem>>
    %131 = vector.broadcast %129 : f32 to vector<16x22xf32>
    %132 = arith.mulf %131, %26 : vector<16x22xf32>
    %133 = arith.addf %128, %132 : vector<16x22xf32>
    %134 = vector.broadcast %130 : f32 to vector<16x22xf32>
    %135 = arith.mulf %134, %33 : vector<16x22xf32>
    %136 = arith.addf %133, %135 : vector<16x22xf32>
    %c36 = arith.constant 36 : index
    %137 = memref.load %arg1[%c36] : memref<98xf32, #tpu.memory_space<smem>>
    %c85 = arith.constant 85 : index
    %138 = memref.load %arg1[%c85] : memref<98xf32, #tpu.memory_space<smem>>
    %139 = vector.broadcast %137 : f32 to vector<16x22xf32>
    %140 = arith.mulf %139, %27 : vector<16x22xf32>
    %141 = arith.addf %136, %140 : vector<16x22xf32>
    %142 = vector.broadcast %138 : f32 to vector<16x22xf32>
    %143 = arith.mulf %142, %34 : vector<16x22xf32>
    %144 = arith.addf %141, %143 : vector<16x22xf32>
    %c43 = arith.constant 43 : index
    %145 = memref.load %arg1[%c43] : memref<98xf32, #tpu.memory_space<smem>>
    %c92 = arith.constant 92 : index
    %146 = memref.load %arg1[%c92] : memref<98xf32, #tpu.memory_space<smem>>
    %147 = vector.broadcast %145 : f32 to vector<16x22xf32>
    %148 = arith.mulf %147, %28 : vector<16x22xf32>
    %149 = arith.addf %144, %148 : vector<16x22xf32>
    %150 = vector.broadcast %146 : f32 to vector<16x22xf32>
    %151 = arith.mulf %150, %35 : vector<16x22xf32>
    %152 = arith.addf %149, %151 : vector<16x22xf32>
    %153 = vector.extract_strided_slice %152 {offsets = [0, 1], sizes = [16, 16], strides = [1, 1]} : vector<16x22xf32> to vector<16x16xf32>
    %154 = arith.addf %95, %153 : vector<16x16xf32>
    %cst_30 = arith.constant 0.000000e+00 : f32
    %155 = vector.broadcast %cst_30 : f32 to vector<16x22xf32>
    %c2_31 = arith.constant 2 : index
    %156 = memref.load %arg1[%c2_31] : memref<98xf32, #tpu.memory_space<smem>>
    %c51 = arith.constant 51 : index
    %157 = memref.load %arg1[%c51] : memref<98xf32, #tpu.memory_space<smem>>
    %158 = vector.broadcast %156 : f32 to vector<16x22xf32>
    %159 = arith.mulf %158, %22 : vector<16x22xf32>
    %160 = arith.addf %155, %159 : vector<16x22xf32>
    %161 = vector.broadcast %157 : f32 to vector<16x22xf32>
    %162 = arith.mulf %161, %29 : vector<16x22xf32>
    %163 = arith.addf %160, %162 : vector<16x22xf32>
    %c9 = arith.constant 9 : index
    %164 = memref.load %arg1[%c9] : memref<98xf32, #tpu.memory_space<smem>>
    %c58 = arith.constant 58 : index
    %165 = memref.load %arg1[%c58] : memref<98xf32, #tpu.memory_space<smem>>
    %166 = vector.broadcast %164 : f32 to vector<16x22xf32>
    %167 = arith.mulf %166, %23 : vector<16x22xf32>
    %168 = arith.addf %163, %167 : vector<16x22xf32>
    %169 = vector.broadcast %165 : f32 to vector<16x22xf32>
    %170 = arith.mulf %169, %30 : vector<16x22xf32>
    %171 = arith.addf %168, %170 : vector<16x22xf32>
    %c16 = arith.constant 16 : index
    %172 = memref.load %arg1[%c16] : memref<98xf32, #tpu.memory_space<smem>>
    %c65 = arith.constant 65 : index
    %173 = memref.load %arg1[%c65] : memref<98xf32, #tpu.memory_space<smem>>
    %174 = vector.broadcast %172 : f32 to vector<16x22xf32>
    %175 = arith.mulf %174, %24 : vector<16x22xf32>
    %176 = arith.addf %171, %175 : vector<16x22xf32>
    %177 = vector.broadcast %173 : f32 to vector<16x22xf32>
    %178 = arith.mulf %177, %31 : vector<16x22xf32>
    %179 = arith.addf %176, %178 : vector<16x22xf32>
    %c23 = arith.constant 23 : index
    %180 = memref.load %arg1[%c23] : memref<98xf32, #tpu.memory_space<smem>>
    %c72 = arith.constant 72 : index
    %181 = memref.load %arg1[%c72] : memref<98xf32, #tpu.memory_space<smem>>
    %182 = vector.broadcast %180 : f32 to vector<16x22xf32>
    %183 = arith.mulf %182, %25 : vector<16x22xf32>
    %184 = arith.addf %179, %183 : vector<16x22xf32>
    %185 = vector.broadcast %181 : f32 to vector<16x22xf32>
    %186 = arith.mulf %185, %32 : vector<16x22xf32>
    %187 = arith.addf %184, %186 : vector<16x22xf32>
    %c30 = arith.constant 30 : index
    %188 = memref.load %arg1[%c30] : memref<98xf32, #tpu.memory_space<smem>>
    %c79 = arith.constant 79 : index
    %189 = memref.load %arg1[%c79] : memref<98xf32, #tpu.memory_space<smem>>
    %190 = vector.broadcast %188 : f32 to vector<16x22xf32>
    %191 = arith.mulf %190, %26 : vector<16x22xf32>
    %192 = arith.addf %187, %191 : vector<16x22xf32>
    %193 = vector.broadcast %189 : f32 to vector<16x22xf32>
    %194 = arith.mulf %193, %33 : vector<16x22xf32>
    %195 = arith.addf %192, %194 : vector<16x22xf32>
    %c37 = arith.constant 37 : index
    %196 = memref.load %arg1[%c37] : memref<98xf32, #tpu.memory_space<smem>>
    %c86 = arith.constant 86 : index
    %197 = memref.load %arg1[%c86] : memref<98xf32, #tpu.memory_space<smem>>
    %198 = vector.broadcast %196 : f32 to vector<16x22xf32>
    %199 = arith.mulf %198, %27 : vector<16x22xf32>
    %200 = arith.addf %195, %199 : vector<16x22xf32>
    %201 = vector.broadcast %197 : f32 to vector<16x22xf32>
    %202 = arith.mulf %201, %34 : vector<16x22xf32>
    %203 = arith.addf %200, %202 : vector<16x22xf32>
    %c44 = arith.constant 44 : index
    %204 = memref.load %arg1[%c44] : memref<98xf32, #tpu.memory_space<smem>>
    %c93 = arith.constant 93 : index
    %205 = memref.load %arg1[%c93] : memref<98xf32, #tpu.memory_space<smem>>
    %206 = vector.broadcast %204 : f32 to vector<16x22xf32>
    %207 = arith.mulf %206, %28 : vector<16x22xf32>
    %208 = arith.addf %203, %207 : vector<16x22xf32>
    %209 = vector.broadcast %205 : f32 to vector<16x22xf32>
    %210 = arith.mulf %209, %35 : vector<16x22xf32>
    %211 = arith.addf %208, %210 : vector<16x22xf32>
    %212 = vector.extract_strided_slice %211 {offsets = [0, 2], sizes = [16, 16], strides = [1, 1]} : vector<16x22xf32> to vector<16x16xf32>
    %213 = arith.addf %154, %212 : vector<16x16xf32>
    %cst_32 = arith.constant 0.000000e+00 : f32
    %214 = vector.broadcast %cst_32 : f32 to vector<16x22xf32>
    %c3_33 = arith.constant 3 : index
    %215 = memref.load %arg1[%c3_33] : memref<98xf32, #tpu.memory_space<smem>>
    %c52 = arith.constant 52 : index
    %216 = memref.load %arg1[%c52] : memref<98xf32, #tpu.memory_space<smem>>
    %217 = vector.broadcast %215 : f32 to vector<16x22xf32>
    %218 = arith.mulf %217, %22 : vector<16x22xf32>
    %219 = arith.addf %214, %218 : vector<16x22xf32>
    %220 = vector.broadcast %216 : f32 to vector<16x22xf32>
    %221 = arith.mulf %220, %29 : vector<16x22xf32>
    %222 = arith.addf %219, %221 : vector<16x22xf32>
    %c10 = arith.constant 10 : index
    %223 = memref.load %arg1[%c10] : memref<98xf32, #tpu.memory_space<smem>>
    %c59 = arith.constant 59 : index
    %224 = memref.load %arg1[%c59] : memref<98xf32, #tpu.memory_space<smem>>
    %225 = vector.broadcast %223 : f32 to vector<16x22xf32>
    %226 = arith.mulf %225, %23 : vector<16x22xf32>
    %227 = arith.addf %222, %226 : vector<16x22xf32>
    %228 = vector.broadcast %224 : f32 to vector<16x22xf32>
    %229 = arith.mulf %228, %30 : vector<16x22xf32>
    %230 = arith.addf %227, %229 : vector<16x22xf32>
    %c17 = arith.constant 17 : index
    %231 = memref.load %arg1[%c17] : memref<98xf32, #tpu.memory_space<smem>>
    %c66 = arith.constant 66 : index
    %232 = memref.load %arg1[%c66] : memref<98xf32, #tpu.memory_space<smem>>
    %233 = vector.broadcast %231 : f32 to vector<16x22xf32>
    %234 = arith.mulf %233, %24 : vector<16x22xf32>
    %235 = arith.addf %230, %234 : vector<16x22xf32>
    %236 = vector.broadcast %232 : f32 to vector<16x22xf32>
    %237 = arith.mulf %236, %31 : vector<16x22xf32>
    %238 = arith.addf %235, %237 : vector<16x22xf32>
    %c24 = arith.constant 24 : index
    %239 = memref.load %arg1[%c24] : memref<98xf32, #tpu.memory_space<smem>>
    %c73 = arith.constant 73 : index
    %240 = memref.load %arg1[%c73] : memref<98xf32, #tpu.memory_space<smem>>
    %241 = vector.broadcast %239 : f32 to vector<16x22xf32>
    %242 = arith.mulf %241, %25 : vector<16x22xf32>
    %243 = arith.addf %238, %242 : vector<16x22xf32>
    %244 = vector.broadcast %240 : f32 to vector<16x22xf32>
    %245 = arith.mulf %244, %32 : vector<16x22xf32>
    %246 = arith.addf %243, %245 : vector<16x22xf32>
    %c31 = arith.constant 31 : index
    %247 = memref.load %arg1[%c31] : memref<98xf32, #tpu.memory_space<smem>>
    %c80 = arith.constant 80 : index
    %248 = memref.load %arg1[%c80] : memref<98xf32, #tpu.memory_space<smem>>
    %249 = vector.broadcast %247 : f32 to vector<16x22xf32>
    %250 = arith.mulf %249, %26 : vector<16x22xf32>
    %251 = arith.addf %246, %250 : vector<16x22xf32>
    %252 = vector.broadcast %248 : f32 to vector<16x22xf32>
    %253 = arith.mulf %252, %33 : vector<16x22xf32>
    %254 = arith.addf %251, %253 : vector<16x22xf32>
    %c38 = arith.constant 38 : index
    %255 = memref.load %arg1[%c38] : memref<98xf32, #tpu.memory_space<smem>>
    %c87 = arith.constant 87 : index
    %256 = memref.load %arg1[%c87] : memref<98xf32, #tpu.memory_space<smem>>
    %257 = vector.broadcast %255 : f32 to vector<16x22xf32>
    %258 = arith.mulf %257, %27 : vector<16x22xf32>
    %259 = arith.addf %254, %258 : vector<16x22xf32>
    %260 = vector.broadcast %256 : f32 to vector<16x22xf32>
    %261 = arith.mulf %260, %34 : vector<16x22xf32>
    %262 = arith.addf %259, %261 : vector<16x22xf32>
    %c45 = arith.constant 45 : index
    %263 = memref.load %arg1[%c45] : memref<98xf32, #tpu.memory_space<smem>>
    %c94 = arith.constant 94 : index
    %264 = memref.load %arg1[%c94] : memref<98xf32, #tpu.memory_space<smem>>
    %265 = vector.broadcast %263 : f32 to vector<16x22xf32>
    %266 = arith.mulf %265, %28 : vector<16x22xf32>
    %267 = arith.addf %262, %266 : vector<16x22xf32>
    %268 = vector.broadcast %264 : f32 to vector<16x22xf32>
    %269 = arith.mulf %268, %35 : vector<16x22xf32>
    %270 = arith.addf %267, %269 : vector<16x22xf32>
    %271 = vector.extract_strided_slice %270 {offsets = [0, 3], sizes = [16, 16], strides = [1, 1]} : vector<16x22xf32> to vector<16x16xf32>
    %272 = arith.addf %213, %271 : vector<16x16xf32>
    %cst_34 = arith.constant 0.000000e+00 : f32
    %273 = vector.broadcast %cst_34 : f32 to vector<16x22xf32>
    %c4 = arith.constant 4 : index
    %274 = memref.load %arg1[%c4] : memref<98xf32, #tpu.memory_space<smem>>
    %c53 = arith.constant 53 : index
    %275 = memref.load %arg1[%c53] : memref<98xf32, #tpu.memory_space<smem>>
    %276 = vector.broadcast %274 : f32 to vector<16x22xf32>
    %277 = arith.mulf %276, %22 : vector<16x22xf32>
    %278 = arith.addf %273, %277 : vector<16x22xf32>
    %279 = vector.broadcast %275 : f32 to vector<16x22xf32>
    %280 = arith.mulf %279, %29 : vector<16x22xf32>
    %281 = arith.addf %278, %280 : vector<16x22xf32>
    %c11 = arith.constant 11 : index
    %282 = memref.load %arg1[%c11] : memref<98xf32, #tpu.memory_space<smem>>
    %c60 = arith.constant 60 : index
    %283 = memref.load %arg1[%c60] : memref<98xf32, #tpu.memory_space<smem>>
    %284 = vector.broadcast %282 : f32 to vector<16x22xf32>
    %285 = arith.mulf %284, %23 : vector<16x22xf32>
    %286 = arith.addf %281, %285 : vector<16x22xf32>
    %287 = vector.broadcast %283 : f32 to vector<16x22xf32>
    %288 = arith.mulf %287, %30 : vector<16x22xf32>
    %289 = arith.addf %286, %288 : vector<16x22xf32>
    %c18 = arith.constant 18 : index
    %290 = memref.load %arg1[%c18] : memref<98xf32, #tpu.memory_space<smem>>
    %c67 = arith.constant 67 : index
    %291 = memref.load %arg1[%c67] : memref<98xf32, #tpu.memory_space<smem>>
    %292 = vector.broadcast %290 : f32 to vector<16x22xf32>
    %293 = arith.mulf %292, %24 : vector<16x22xf32>
    %294 = arith.addf %289, %293 : vector<16x22xf32>
    %295 = vector.broadcast %291 : f32 to vector<16x22xf32>
    %296 = arith.mulf %295, %31 : vector<16x22xf32>
    %297 = arith.addf %294, %296 : vector<16x22xf32>
    %c25 = arith.constant 25 : index
    %298 = memref.load %arg1[%c25] : memref<98xf32, #tpu.memory_space<smem>>
    %c74 = arith.constant 74 : index
    %299 = memref.load %arg1[%c74] : memref<98xf32, #tpu.memory_space<smem>>
    %300 = vector.broadcast %298 : f32 to vector<16x22xf32>
    %301 = arith.mulf %300, %25 : vector<16x22xf32>
    %302 = arith.addf %297, %301 : vector<16x22xf32>
    %303 = vector.broadcast %299 : f32 to vector<16x22xf32>
    %304 = arith.mulf %303, %32 : vector<16x22xf32>
    %305 = arith.addf %302, %304 : vector<16x22xf32>
    %c32 = arith.constant 32 : index
    %306 = memref.load %arg1[%c32] : memref<98xf32, #tpu.memory_space<smem>>
    %c81 = arith.constant 81 : index
    %307 = memref.load %arg1[%c81] : memref<98xf32, #tpu.memory_space<smem>>
    %308 = vector.broadcast %306 : f32 to vector<16x22xf32>
    %309 = arith.mulf %308, %26 : vector<16x22xf32>
    %310 = arith.addf %305, %309 : vector<16x22xf32>
    %311 = vector.broadcast %307 : f32 to vector<16x22xf32>
    %312 = arith.mulf %311, %33 : vector<16x22xf32>
    %313 = arith.addf %310, %312 : vector<16x22xf32>
    %c39 = arith.constant 39 : index
    %314 = memref.load %arg1[%c39] : memref<98xf32, #tpu.memory_space<smem>>
    %c88 = arith.constant 88 : index
    %315 = memref.load %arg1[%c88] : memref<98xf32, #tpu.memory_space<smem>>
    %316 = vector.broadcast %314 : f32 to vector<16x22xf32>
    %317 = arith.mulf %316, %27 : vector<16x22xf32>
    %318 = arith.addf %313, %317 : vector<16x22xf32>
    %319 = vector.broadcast %315 : f32 to vector<16x22xf32>
    %320 = arith.mulf %319, %34 : vector<16x22xf32>
    %321 = arith.addf %318, %320 : vector<16x22xf32>
    %c46 = arith.constant 46 : index
    %322 = memref.load %arg1[%c46] : memref<98xf32, #tpu.memory_space<smem>>
    %c95 = arith.constant 95 : index
    %323 = memref.load %arg1[%c95] : memref<98xf32, #tpu.memory_space<smem>>
    %324 = vector.broadcast %322 : f32 to vector<16x22xf32>
    %325 = arith.mulf %324, %28 : vector<16x22xf32>
    %326 = arith.addf %321, %325 : vector<16x22xf32>
    %327 = vector.broadcast %323 : f32 to vector<16x22xf32>
    %328 = arith.mulf %327, %35 : vector<16x22xf32>
    %329 = arith.addf %326, %328 : vector<16x22xf32>
    %330 = vector.extract_strided_slice %329 {offsets = [0, 4], sizes = [16, 16], strides = [1, 1]} : vector<16x22xf32> to vector<16x16xf32>
    %331 = arith.addf %272, %330 : vector<16x16xf32>
    %cst_35 = arith.constant 0.000000e+00 : f32
    %332 = vector.broadcast %cst_35 : f32 to vector<16x22xf32>
    %c5 = arith.constant 5 : index
    %333 = memref.load %arg1[%c5] : memref<98xf32, #tpu.memory_space<smem>>
    %c54 = arith.constant 54 : index
    %334 = memref.load %arg1[%c54] : memref<98xf32, #tpu.memory_space<smem>>
    %335 = vector.broadcast %333 : f32 to vector<16x22xf32>
    %336 = arith.mulf %335, %22 : vector<16x22xf32>
    %337 = arith.addf %332, %336 : vector<16x22xf32>
    %338 = vector.broadcast %334 : f32 to vector<16x22xf32>
    %339 = arith.mulf %338, %29 : vector<16x22xf32>
    %340 = arith.addf %337, %339 : vector<16x22xf32>
    %c12 = arith.constant 12 : index
    %341 = memref.load %arg1[%c12] : memref<98xf32, #tpu.memory_space<smem>>
    %c61 = arith.constant 61 : index
    %342 = memref.load %arg1[%c61] : memref<98xf32, #tpu.memory_space<smem>>
    %343 = vector.broadcast %341 : f32 to vector<16x22xf32>
    %344 = arith.mulf %343, %23 : vector<16x22xf32>
    %345 = arith.addf %340, %344 : vector<16x22xf32>
    %346 = vector.broadcast %342 : f32 to vector<16x22xf32>
    %347 = arith.mulf %346, %30 : vector<16x22xf32>
    %348 = arith.addf %345, %347 : vector<16x22xf32>
    %c19 = arith.constant 19 : index
    %349 = memref.load %arg1[%c19] : memref<98xf32, #tpu.memory_space<smem>>
    %c68 = arith.constant 68 : index
    %350 = memref.load %arg1[%c68] : memref<98xf32, #tpu.memory_space<smem>>
    %351 = vector.broadcast %349 : f32 to vector<16x22xf32>
    %352 = arith.mulf %351, %24 : vector<16x22xf32>
    %353 = arith.addf %348, %352 : vector<16x22xf32>
    %354 = vector.broadcast %350 : f32 to vector<16x22xf32>
    %355 = arith.mulf %354, %31 : vector<16x22xf32>
    %356 = arith.addf %353, %355 : vector<16x22xf32>
    %c26 = arith.constant 26 : index
    %357 = memref.load %arg1[%c26] : memref<98xf32, #tpu.memory_space<smem>>
    %c75 = arith.constant 75 : index
    %358 = memref.load %arg1[%c75] : memref<98xf32, #tpu.memory_space<smem>>
    %359 = vector.broadcast %357 : f32 to vector<16x22xf32>
    %360 = arith.mulf %359, %25 : vector<16x22xf32>
    %361 = arith.addf %356, %360 : vector<16x22xf32>
    %362 = vector.broadcast %358 : f32 to vector<16x22xf32>
    %363 = arith.mulf %362, %32 : vector<16x22xf32>
    %364 = arith.addf %361, %363 : vector<16x22xf32>
    %c33 = arith.constant 33 : index
    %365 = memref.load %arg1[%c33] : memref<98xf32, #tpu.memory_space<smem>>
    %c82 = arith.constant 82 : index
    %366 = memref.load %arg1[%c82] : memref<98xf32, #tpu.memory_space<smem>>
    %367 = vector.broadcast %365 : f32 to vector<16x22xf32>
    %368 = arith.mulf %367, %26 : vector<16x22xf32>
    %369 = arith.addf %364, %368 : vector<16x22xf32>
    %370 = vector.broadcast %366 : f32 to vector<16x22xf32>
    %371 = arith.mulf %370, %33 : vector<16x22xf32>
    %372 = arith.addf %369, %371 : vector<16x22xf32>
    %c40 = arith.constant 40 : index
    %373 = memref.load %arg1[%c40] : memref<98xf32, #tpu.memory_space<smem>>
    %c89 = arith.constant 89 : index
    %374 = memref.load %arg1[%c89] : memref<98xf32, #tpu.memory_space<smem>>
    %375 = vector.broadcast %373 : f32 to vector<16x22xf32>
    %376 = arith.mulf %375, %27 : vector<16x22xf32>
    %377 = arith.addf %372, %376 : vector<16x22xf32>
    %378 = vector.broadcast %374 : f32 to vector<16x22xf32>
    %379 = arith.mulf %378, %34 : vector<16x22xf32>
    %380 = arith.addf %377, %379 : vector<16x22xf32>
    %c47 = arith.constant 47 : index
    %381 = memref.load %arg1[%c47] : memref<98xf32, #tpu.memory_space<smem>>
    %c96 = arith.constant 96 : index
    %382 = memref.load %arg1[%c96] : memref<98xf32, #tpu.memory_space<smem>>
    %383 = vector.broadcast %381 : f32 to vector<16x22xf32>
    %384 = arith.mulf %383, %28 : vector<16x22xf32>
    %385 = arith.addf %380, %384 : vector<16x22xf32>
    %386 = vector.broadcast %382 : f32 to vector<16x22xf32>
    %387 = arith.mulf %386, %35 : vector<16x22xf32>
    %388 = arith.addf %385, %387 : vector<16x22xf32>
    %389 = vector.extract_strided_slice %388 {offsets = [0, 5], sizes = [16, 16], strides = [1, 1]} : vector<16x22xf32> to vector<16x16xf32>
    %390 = arith.addf %331, %389 : vector<16x16xf32>
    %cst_36 = arith.constant 0.000000e+00 : f32
    %391 = vector.broadcast %cst_36 : f32 to vector<16x22xf32>
    %c6 = arith.constant 6 : index
    %392 = memref.load %arg1[%c6] : memref<98xf32, #tpu.memory_space<smem>>
    %c55 = arith.constant 55 : index
    %393 = memref.load %arg1[%c55] : memref<98xf32, #tpu.memory_space<smem>>
    %394 = vector.broadcast %392 : f32 to vector<16x22xf32>
    %395 = arith.mulf %394, %22 : vector<16x22xf32>
    %396 = arith.addf %391, %395 : vector<16x22xf32>
    %397 = vector.broadcast %393 : f32 to vector<16x22xf32>
    %398 = arith.mulf %397, %29 : vector<16x22xf32>
    %399 = arith.addf %396, %398 : vector<16x22xf32>
    %c13 = arith.constant 13 : index
    %400 = memref.load %arg1[%c13] : memref<98xf32, #tpu.memory_space<smem>>
    %c62 = arith.constant 62 : index
    %401 = memref.load %arg1[%c62] : memref<98xf32, #tpu.memory_space<smem>>
    %402 = vector.broadcast %400 : f32 to vector<16x22xf32>
    %403 = arith.mulf %402, %23 : vector<16x22xf32>
    %404 = arith.addf %399, %403 : vector<16x22xf32>
    %405 = vector.broadcast %401 : f32 to vector<16x22xf32>
    %406 = arith.mulf %405, %30 : vector<16x22xf32>
    %407 = arith.addf %404, %406 : vector<16x22xf32>
    %c20 = arith.constant 20 : index
    %408 = memref.load %arg1[%c20] : memref<98xf32, #tpu.memory_space<smem>>
    %c69 = arith.constant 69 : index
    %409 = memref.load %arg1[%c69] : memref<98xf32, #tpu.memory_space<smem>>
    %410 = vector.broadcast %408 : f32 to vector<16x22xf32>
    %411 = arith.mulf %410, %24 : vector<16x22xf32>
    %412 = arith.addf %407, %411 : vector<16x22xf32>
    %413 = vector.broadcast %409 : f32 to vector<16x22xf32>
    %414 = arith.mulf %413, %31 : vector<16x22xf32>
    %415 = arith.addf %412, %414 : vector<16x22xf32>
    %c27 = arith.constant 27 : index
    %416 = memref.load %arg1[%c27] : memref<98xf32, #tpu.memory_space<smem>>
    %c76 = arith.constant 76 : index
    %417 = memref.load %arg1[%c76] : memref<98xf32, #tpu.memory_space<smem>>
    %418 = vector.broadcast %416 : f32 to vector<16x22xf32>
    %419 = arith.mulf %418, %25 : vector<16x22xf32>
    %420 = arith.addf %415, %419 : vector<16x22xf32>
    %421 = vector.broadcast %417 : f32 to vector<16x22xf32>
    %422 = arith.mulf %421, %32 : vector<16x22xf32>
    %423 = arith.addf %420, %422 : vector<16x22xf32>
    %c34 = arith.constant 34 : index
    %424 = memref.load %arg1[%c34] : memref<98xf32, #tpu.memory_space<smem>>
    %c83 = arith.constant 83 : index
    %425 = memref.load %arg1[%c83] : memref<98xf32, #tpu.memory_space<smem>>
    %426 = vector.broadcast %424 : f32 to vector<16x22xf32>
    %427 = arith.mulf %426, %26 : vector<16x22xf32>
    %428 = arith.addf %423, %427 : vector<16x22xf32>
    %429 = vector.broadcast %425 : f32 to vector<16x22xf32>
    %430 = arith.mulf %429, %33 : vector<16x22xf32>
    %431 = arith.addf %428, %430 : vector<16x22xf32>
    %c41 = arith.constant 41 : index
    %432 = memref.load %arg1[%c41] : memref<98xf32, #tpu.memory_space<smem>>
    %c90 = arith.constant 90 : index
    %433 = memref.load %arg1[%c90] : memref<98xf32, #tpu.memory_space<smem>>
    %434 = vector.broadcast %432 : f32 to vector<16x22xf32>
    %435 = arith.mulf %434, %27 : vector<16x22xf32>
    %436 = arith.addf %431, %435 : vector<16x22xf32>
    %437 = vector.broadcast %433 : f32 to vector<16x22xf32>
    %438 = arith.mulf %437, %34 : vector<16x22xf32>
    %439 = arith.addf %436, %438 : vector<16x22xf32>
    %c48 = arith.constant 48 : index
    %440 = memref.load %arg1[%c48] : memref<98xf32, #tpu.memory_space<smem>>
    %c97 = arith.constant 97 : index
    %441 = memref.load %arg1[%c97] : memref<98xf32, #tpu.memory_space<smem>>
    %442 = vector.broadcast %440 : f32 to vector<16x22xf32>
    %443 = arith.mulf %442, %28 : vector<16x22xf32>
    %444 = arith.addf %439, %443 : vector<16x22xf32>
    %445 = vector.broadcast %441 : f32 to vector<16x22xf32>
    %446 = arith.mulf %445, %35 : vector<16x22xf32>
    %447 = arith.addf %444, %446 : vector<16x22xf32>
    %448 = vector.extract_strided_slice %447 {offsets = [0, 6], sizes = [16, 16], strides = [1, 1]} : vector<16x22xf32> to vector<16x16xf32>
    %449 = arith.addf %390, %448 : vector<16x16xf32>
    %450 = arith.negf %449 : vector<16x16xf32>
    %451 = math.exp %450 : vector<16x16xf32>
    %cst_37 = arith.constant 1.000000e+00 : f32
    %452 = vector.broadcast %cst_37 : f32 to vector<16x16xf32>
    %453 = arith.addf %452, %451 : vector<16x16xf32>
    %454 = arith.divf %452, %453 : vector<16x16xf32>
    %c0_38 = arith.constant 0 : index
    %c0_39 = arith.constant 0 : index
    %c0_40 = arith.constant 0 : index
    %455 = vector.load %arg3[%c0_38, %c0_39, %c0_40] : memref<2x16x16xf32, #tpu.memory_space<vmem>>, vector<1x16x16xf32>
    %456 = vector.shape_cast %455 : vector<1x16x16xf32> to vector<16x16xf32>
    %457 = vector.shape_cast %454 : vector<16x16xf32> to vector<1x16x16xf32>
    tpu.vector_store %arg3[%c0_38, %c0_39, %c0_40], %457 {strides = array<i32>} : memref<2x16x16xf32, #tpu.memory_space<vmem>>, vector<1x16x16xf32>,
    %c1_41 = arith.constant 1 : index
    %c0_42 = arith.constant 0 : index
    %c0_43 = arith.constant 0 : index
    %c0_44 = arith.constant 0 : index
    %458 = vector.load %arg2[%c1_41, %c0_42, %c0_43, %c0_44] : memref<2x4x16x16xf32, #tpu.memory_space<vmem>>, vector<1x1x16x16xf32>
    %459 = vector.shape_cast %458 : vector<1x1x16x16xf32> to vector<16x16xf32>
    %c1_45 = arith.constant 1 : index
    %c1_46 = arith.constant 1 : index
    %c0_47 = arith.constant 0 : index
    %c0_48 = arith.constant 0 : index
    %460 = vector.load %arg2[%c1_45, %c1_46, %c0_47, %c0_48] : memref<2x4x16x16xf32, #tpu.memory_space<vmem>>, vector<1x1x16x16xf32>
    %461 = vector.shape_cast %460 : vector<1x1x16x16xf32> to vector<16x16xf32>
    %462 = arith.addf %459, %461 : vector<16x16xf32>
    %463 = arith.maximumf %459, %461 : vector<16x16xf32>
    %c1_49 = arith.constant 1 : index
    %c2_50 = arith.constant 2 : index
    %c0_51 = arith.constant 0 : index
    %c0_52 = arith.constant 0 : index
    %464 = vector.load %arg2[%c1_49, %c2_50, %c0_51, %c0_52] : memref<2x4x16x16xf32, #tpu.memory_space<vmem>>, vector<1x1x16x16xf32>
    %465 = vector.shape_cast %464 : vector<1x1x16x16xf32> to vector<16x16xf32>
    %466 = arith.addf %462, %465 : vector<16x16xf32>
    %467 = arith.maximumf %463, %465 : vector<16x16xf32>
    %c1_53 = arith.constant 1 : index
    %c3_54 = arith.constant 3 : index
    %c0_55 = arith.constant 0 : index
    %c0_56 = arith.constant 0 : index
    %468 = vector.load %arg2[%c1_53, %c3_54, %c0_55, %c0_56] : memref<2x4x16x16xf32, #tpu.memory_space<vmem>>, vector<1x1x16x16xf32>
    %469 = vector.shape_cast %468 : vector<1x1x16x16xf32> to vector<16x16xf32>
    %470 = arith.addf %466, %469 : vector<16x16xf32>
    %471 = arith.maximumf %467, %469 : vector<16x16xf32>
    %c3_57 = arith.constant 3 : index
    %c3_58 = arith.constant 3 : index
    %472 = vector.load %arg4[%c3_57, %c3_58] : memref<22x22xf32, #tpu.memory_space<vmem>>, vector<16x16xf32>
    tpu.vector_store %arg4[%c3_57, %c3_58], %470 {strides = array<i32>} : memref<22x22xf32, #tpu.memory_space<vmem>>, vector<16x16xf32>,
    %c3_59 = arith.constant 3 : index
    %c3_60 = arith.constant 3 : index
    %473 = vector.load %arg5[%c3_59, %c3_60] : memref<22x22xf32, #tpu.memory_space<vmem>>, vector<16x16xf32>
    tpu.vector_store %arg5[%c3_59, %c3_60], %471 {strides = array<i32>} : memref<22x22xf32, #tpu.memory_space<vmem>>, vector<16x16xf32>,
    %c0_61 = arith.constant 0 : index
    %c0_62 = arith.constant 0 : index
    %474 = vector.load %arg4[%c0_61, %c0_62] : memref<22x22xf32, #tpu.memory_space<vmem>>, vector<22x22xf32>
    %c0_63 = arith.constant 0 : index
    %c0_64 = arith.constant 0 : index
    %475 = vector.load %arg5[%c0_63, %c0_64] : memref<22x22xf32, #tpu.memory_space<vmem>>, vector<22x22xf32>
    %476 = vector.extract_strided_slice %474 {offsets = [0, 0], sizes = [16, 22], strides = [1, 1]} : vector<22x22xf32> to vector<16x22xf32>
    %477 = vector.extract_strided_slice %474 {offsets = [1, 0], sizes = [16, 22], strides = [1, 1]} : vector<22x22xf32> to vector<16x22xf32>
    %478 = vector.extract_strided_slice %474 {offsets = [2, 0], sizes = [16, 22], strides = [1, 1]} : vector<22x22xf32> to vector<16x22xf32>
    %479 = vector.extract_strided_slice %474 {offsets = [3, 0], sizes = [16, 22], strides = [1, 1]} : vector<22x22xf32> to vector<16x22xf32>
    %480 = vector.extract_strided_slice %474 {offsets = [4, 0], sizes = [16, 22], strides = [1, 1]} : vector<22x22xf32> to vector<16x22xf32>
    %481 = vector.extract_strided_slice %474 {offsets = [5, 0], sizes = [16, 22], strides = [1, 1]} : vector<22x22xf32> to vector<16x22xf32>
    %482 = vector.extract_strided_slice %474 {offsets = [6, 0], sizes = [16, 22], strides = [1, 1]} : vector<22x22xf32> to vector<16x22xf32>
    %483 = vector.extract_strided_slice %475 {offsets = [0, 0], sizes = [16, 22], strides = [1, 1]} : vector<22x22xf32> to vector<16x22xf32>
    %484 = vector.extract_strided_slice %475 {offsets = [1, 0], sizes = [16, 22], strides = [1, 1]} : vector<22x22xf32> to vector<16x22xf32>
    %485 = vector.extract_strided_slice %475 {offsets = [2, 0], sizes = [16, 22], strides = [1, 1]} : vector<22x22xf32> to vector<16x22xf32>
    %486 = vector.extract_strided_slice %475 {offsets = [3, 0], sizes = [16, 22], strides = [1, 1]} : vector<22x22xf32> to vector<16x22xf32>
    %487 = vector.extract_strided_slice %475 {offsets = [4, 0], sizes = [16, 22], strides = [1, 1]} : vector<22x22xf32> to vector<16x22xf32>
    %488 = vector.extract_strided_slice %475 {offsets = [5, 0], sizes = [16, 22], strides = [1, 1]} : vector<22x22xf32> to vector<16x22xf32>
    %489 = vector.extract_strided_slice %475 {offsets = [6, 0], sizes = [16, 22], strides = [1, 1]} : vector<22x22xf32> to vector<16x22xf32>
    %cst_65 = arith.constant 0.000000e+00 : f32
    %490 = vector.broadcast %cst_65 : f32 to vector<16x16xf32>
    %cst_66 = arith.constant 0.000000e+00 : f32
    %491 = vector.broadcast %cst_66 : f32 to vector<16x22xf32>
    %c0_67 = arith.constant 0 : index
    %492 = memref.load %arg1[%c0_67] : memref<98xf32, #tpu.memory_space<smem>>
    %c49_68 = arith.constant 49 : index
    %493 = memref.load %arg1[%c49_68] : memref<98xf32, #tpu.memory_space<smem>>
    %494 = vector.broadcast %492 : f32 to vector<16x22xf32>
    %495 = arith.mulf %494, %476 : vector<16x22xf32>
    %496 = arith.addf %491, %495 : vector<16x22xf32>
    %497 = vector.broadcast %493 : f32 to vector<16x22xf32>
    %498 = arith.mulf %497, %483 : vector<16x22xf32>
    %499 = arith.addf %496, %498 : vector<16x22xf32>
    %c7_69 = arith.constant 7 : index
    %500 = memref.load %arg1[%c7_69] : memref<98xf32, #tpu.memory_space<smem>>
    %c56_70 = arith.constant 56 : index
    %501 = memref.load %arg1[%c56_70] : memref<98xf32, #tpu.memory_space<smem>>
    %502 = vector.broadcast %500 : f32 to vector<16x22xf32>
    %503 = arith.mulf %502, %477 : vector<16x22xf32>
    %504 = arith.addf %499, %503 : vector<16x22xf32>
    %505 = vector.broadcast %501 : f32 to vector<16x22xf32>
    %506 = arith.mulf %505, %484 : vector<16x22xf32>
    %507 = arith.addf %504, %506 : vector<16x22xf32>
    %c14_71 = arith.constant 14 : index
    %508 = memref.load %arg1[%c14_71] : memref<98xf32, #tpu.memory_space<smem>>
    %c63_72 = arith.constant 63 : index
    %509 = memref.load %arg1[%c63_72] : memref<98xf32, #tpu.memory_space<smem>>
    %510 = vector.broadcast %508 : f32 to vector<16x22xf32>
    %511 = arith.mulf %510, %478 : vector<16x22xf32>
    %512 = arith.addf %507, %511 : vector<16x22xf32>
    %513 = vector.broadcast %509 : f32 to vector<16x22xf32>
    %514 = arith.mulf %513, %485 : vector<16x22xf32>
    %515 = arith.addf %512, %514 : vector<16x22xf32>
    %c21_73 = arith.constant 21 : index
    %516 = memref.load %arg1[%c21_73] : memref<98xf32, #tpu.memory_space<smem>>
    %c70_74 = arith.constant 70 : index
    %517 = memref.load %arg1[%c70_74] : memref<98xf32, #tpu.memory_space<smem>>
    %518 = vector.broadcast %516 : f32 to vector<16x22xf32>
    %519 = arith.mulf %518, %479 : vector<16x22xf32>
    %520 = arith.addf %515, %519 : vector<16x22xf32>
    %521 = vector.broadcast %517 : f32 to vector<16x22xf32>
    %522 = arith.mulf %521, %486 : vector<16x22xf32>
    %523 = arith.addf %520, %522 : vector<16x22xf32>
    %c28_75 = arith.constant 28 : index
    %524 = memref.load %arg1[%c28_75] : memref<98xf32, #tpu.memory_space<smem>>
    %c77_76 = arith.constant 77 : index
    %525 = memref.load %arg1[%c77_76] : memref<98xf32, #tpu.memory_space<smem>>
    %526 = vector.broadcast %524 : f32 to vector<16x22xf32>
    %527 = arith.mulf %526, %480 : vector<16x22xf32>
    %528 = arith.addf %523, %527 : vector<16x22xf32>
    %529 = vector.broadcast %525 : f32 to vector<16x22xf32>
    %530 = arith.mulf %529, %487 : vector<16x22xf32>
    %531 = arith.addf %528, %530 : vector<16x22xf32>
    %c35_77 = arith.constant 35 : index
    %532 = memref.load %arg1[%c35_77] : memref<98xf32, #tpu.memory_space<smem>>
    %c84_78 = arith.constant 84 : index
    %533 = memref.load %arg1[%c84_78] : memref<98xf32, #tpu.memory_space<smem>>
    %534 = vector.broadcast %532 : f32 to vector<16x22xf32>
    %535 = arith.mulf %534, %481 : vector<16x22xf32>
    %536 = arith.addf %531, %535 : vector<16x22xf32>
    %537 = vector.broadcast %533 : f32 to vector<16x22xf32>
    %538 = arith.mulf %537, %488 : vector<16x22xf32>
    %539 = arith.addf %536, %538 : vector<16x22xf32>
    %c42_79 = arith.constant 42 : index
    %540 = memref.load %arg1[%c42_79] : memref<98xf32, #tpu.memory_space<smem>>
    %c91_80 = arith.constant 91 : index
    %541 = memref.load %arg1[%c91_80] : memref<98xf32, #tpu.memory_space<smem>>
    %542 = vector.broadcast %540 : f32 to vector<16x22xf32>
    %543 = arith.mulf %542, %482 : vector<16x22xf32>
    %544 = arith.addf %539, %543 : vector<16x22xf32>
    %545 = vector.broadcast %541 : f32 to vector<16x22xf32>
    %546 = arith.mulf %545, %489 : vector<16x22xf32>
    %547 = arith.addf %544, %546 : vector<16x22xf32>
    %548 = vector.extract_strided_slice %547 {offsets = [0, 0], sizes = [16, 16], strides = [1, 1]} : vector<16x22xf32> to vector<16x16xf32>
    %549 = arith.addf %490, %548 : vector<16x16xf32>
    %cst_81 = arith.constant 0.000000e+00 : f32
    %550 = vector.broadcast %cst_81 : f32 to vector<16x22xf32>
    %c1_82 = arith.constant 1 : index
    %551 = memref.load %arg1[%c1_82] : memref<98xf32, #tpu.memory_space<smem>>
    %c50_83 = arith.constant 50 : index
    %552 = memref.load %arg1[%c50_83] : memref<98xf32, #tpu.memory_space<smem>>
    %553 = vector.broadcast %551 : f32 to vector<16x22xf32>
    %554 = arith.mulf %553, %476 : vector<16x22xf32>
    %555 = arith.addf %550, %554 : vector<16x22xf32>
    %556 = vector.broadcast %552 : f32 to vector<16x22xf32>
    %557 = arith.mulf %556, %483 : vector<16x22xf32>
    %558 = arith.addf %555, %557 : vector<16x22xf32>
    %c8_84 = arith.constant 8 : index
    %559 = memref.load %arg1[%c8_84] : memref<98xf32, #tpu.memory_space<smem>>
    %c57_85 = arith.constant 57 : index
    %560 = memref.load %arg1[%c57_85] : memref<98xf32, #tpu.memory_space<smem>>
    %561 = vector.broadcast %559 : f32 to vector<16x22xf32>
    %562 = arith.mulf %561, %477 : vector<16x22xf32>
    %563 = arith.addf %558, %562 : vector<16x22xf32>
    %564 = vector.broadcast %560 : f32 to vector<16x22xf32>
    %565 = arith.mulf %564, %484 : vector<16x22xf32>
    %566 = arith.addf %563, %565 : vector<16x22xf32>
    %c15_86 = arith.constant 15 : index
    %567 = memref.load %arg1[%c15_86] : memref<98xf32, #tpu.memory_space<smem>>
    %c64_87 = arith.constant 64 : index
    %568 = memref.load %arg1[%c64_87] : memref<98xf32, #tpu.memory_space<smem>>
    %569 = vector.broadcast %567 : f32 to vector<16x22xf32>
    %570 = arith.mulf %569, %478 : vector<16x22xf32>
    %571 = arith.addf %566, %570 : vector<16x22xf32>
    %572 = vector.broadcast %568 : f32 to vector<16x22xf32>
    %573 = arith.mulf %572, %485 : vector<16x22xf32>
    %574 = arith.addf %571, %573 : vector<16x22xf32>
    %c22_88 = arith.constant 22 : index
    %575 = memref.load %arg1[%c22_88] : memref<98xf32, #tpu.memory_space<smem>>
    %c71_89 = arith.constant 71 : index
    %576 = memref.load %arg1[%c71_89] : memref<98xf32, #tpu.memory_space<smem>>
    %577 = vector.broadcast %575 : f32 to vector<16x22xf32>
    %578 = arith.mulf %577, %479 : vector<16x22xf32>
    %579 = arith.addf %574, %578 : vector<16x22xf32>
    %580 = vector.broadcast %576 : f32 to vector<16x22xf32>
    %581 = arith.mulf %580, %486 : vector<16x22xf32>
    %582 = arith.addf %579, %581 : vector<16x22xf32>
    %c29_90 = arith.constant 29 : index
    %583 = memref.load %arg1[%c29_90] : memref<98xf32, #tpu.memory_space<smem>>
    %c78_91 = arith.constant 78 : index
    %584 = memref.load %arg1[%c78_91] : memref<98xf32, #tpu.memory_space<smem>>
    %585 = vector.broadcast %583 : f32 to vector<16x22xf32>
    %586 = arith.mulf %585, %480 : vector<16x22xf32>
    %587 = arith.addf %582, %586 : vector<16x22xf32>
    %588 = vector.broadcast %584 : f32 to vector<16x22xf32>
    %589 = arith.mulf %588, %487 : vector<16x22xf32>
    %590 = arith.addf %587, %589 : vector<16x22xf32>
    %c36_92 = arith.constant 36 : index
    %591 = memref.load %arg1[%c36_92] : memref<98xf32, #tpu.memory_space<smem>>
    %c85_93 = arith.constant 85 : index
    %592 = memref.load %arg1[%c85_93] : memref<98xf32, #tpu.memory_space<smem>>
    %593 = vector.broadcast %591 : f32 to vector<16x22xf32>
    %594 = arith.mulf %593, %481 : vector<16x22xf32>
    %595 = arith.addf %590, %594 : vector<16x22xf32>
    %596 = vector.broadcast %592 : f32 to vector<16x22xf32>
    %597 = arith.mulf %596, %488 : vector<16x22xf32>
    %598 = arith.addf %595, %597 : vector<16x22xf32>
    %c43_94 = arith.constant 43 : index
    %599 = memref.load %arg1[%c43_94] : memref<98xf32, #tpu.memory_space<smem>>
    %c92_95 = arith.constant 92 : index
    %600 = memref.load %arg1[%c92_95] : memref<98xf32, #tpu.memory_space<smem>>
    %601 = vector.broadcast %599 : f32 to vector<16x22xf32>
    %602 = arith.mulf %601, %482 : vector<16x22xf32>
    %603 = arith.addf %598, %602 : vector<16x22xf32>
    %604 = vector.broadcast %600 : f32 to vector<16x22xf32>
    %605 = arith.mulf %604, %489 : vector<16x22xf32>
    %606 = arith.addf %603, %605 : vector<16x22xf32>
    %607 = vector.extract_strided_slice %606 {offsets = [0, 1], sizes = [16, 16], strides = [1, 1]} : vector<16x22xf32> to vector<16x16xf32>
    %608 = arith.addf %549, %607 : vector<16x16xf32>
    %cst_96 = arith.constant 0.000000e+00 : f32
    %609 = vector.broadcast %cst_96 : f32 to vector<16x22xf32>
    %c2_97 = arith.constant 2 : index
    %610 = memref.load %arg1[%c2_97] : memref<98xf32, #tpu.memory_space<smem>>
    %c51_98 = arith.constant 51 : index
    %611 = memref.load %arg1[%c51_98] : memref<98xf32, #tpu.memory_space<smem>>
    %612 = vector.broadcast %610 : f32 to vector<16x22xf32>
    %613 = arith.mulf %612, %476 : vector<16x22xf32>
    %614 = arith.addf %609, %613 : vector<16x22xf32>
    %615 = vector.broadcast %611 : f32 to vector<16x22xf32>
    %616 = arith.mulf %615, %483 : vector<16x22xf32>
    %617 = arith.addf %614, %616 : vector<16x22xf32>
    %c9_99 = arith.constant 9 : index
    %618 = memref.load %arg1[%c9_99] : memref<98xf32, #tpu.memory_space<smem>>
    %c58_100 = arith.constant 58 : index
    %619 = memref.load %arg1[%c58_100] : memref<98xf32, #tpu.memory_space<smem>>
    %620 = vector.broadcast %618 : f32 to vector<16x22xf32>
    %621 = arith.mulf %620, %477 : vector<16x22xf32>
    %622 = arith.addf %617, %621 : vector<16x22xf32>
    %623 = vector.broadcast %619 : f32 to vector<16x22xf32>
    %624 = arith.mulf %623, %484 : vector<16x22xf32>
    %625 = arith.addf %622, %624 : vector<16x22xf32>
    %c16_101 = arith.constant 16 : index
    %626 = memref.load %arg1[%c16_101] : memref<98xf32, #tpu.memory_space<smem>>
    %c65_102 = arith.constant 65 : index
    %627 = memref.load %arg1[%c65_102] : memref<98xf32, #tpu.memory_space<smem>>
    %628 = vector.broadcast %626 : f32 to vector<16x22xf32>
    %629 = arith.mulf %628, %478 : vector<16x22xf32>
    %630 = arith.addf %625, %629 : vector<16x22xf32>
    %631 = vector.broadcast %627 : f32 to vector<16x22xf32>
    %632 = arith.mulf %631, %485 : vector<16x22xf32>
    %633 = arith.addf %630, %632 : vector<16x22xf32>
    %c23_103 = arith.constant 23 : index
    %634 = memref.load %arg1[%c23_103] : memref<98xf32, #tpu.memory_space<smem>>
    %c72_104 = arith.constant 72 : index
    %635 = memref.load %arg1[%c72_104] : memref<98xf32, #tpu.memory_space<smem>>
    %636 = vector.broadcast %634 : f32 to vector<16x22xf32>
    %637 = arith.mulf %636, %479 : vector<16x22xf32>
    %638 = arith.addf %633, %637 : vector<16x22xf32>
    %639 = vector.broadcast %635 : f32 to vector<16x22xf32>
    %640 = arith.mulf %639, %486 : vector<16x22xf32>
    %641 = arith.addf %638, %640 : vector<16x22xf32>
    %c30_105 = arith.constant 30 : index
    %642 = memref.load %arg1[%c30_105] : memref<98xf32, #tpu.memory_space<smem>>
    %c79_106 = arith.constant 79 : index
    %643 = memref.load %arg1[%c79_106] : memref<98xf32, #tpu.memory_space<smem>>
    %644 = vector.broadcast %642 : f32 to vector<16x22xf32>
    %645 = arith.mulf %644, %480 : vector<16x22xf32>
    %646 = arith.addf %641, %645 : vector<16x22xf32>
    %647 = vector.broadcast %643 : f32 to vector<16x22xf32>
    %648 = arith.mulf %647, %487 : vector<16x22xf32>
    %649 = arith.addf %646, %648 : vector<16x22xf32>
    %c37_107 = arith.constant 37 : index
    %650 = memref.load %arg1[%c37_107] : memref<98xf32, #tpu.memory_space<smem>>
    %c86_108 = arith.constant 86 : index
    %651 = memref.load %arg1[%c86_108] : memref<98xf32, #tpu.memory_space<smem>>
    %652 = vector.broadcast %650 : f32 to vector<16x22xf32>
    %653 = arith.mulf %652, %481 : vector<16x22xf32>
    %654 = arith.addf %649, %653 : vector<16x22xf32>
    %655 = vector.broadcast %651 : f32 to vector<16x22xf32>
    %656 = arith.mulf %655, %488 : vector<16x22xf32>
    %657 = arith.addf %654, %656 : vector<16x22xf32>
    %c44_109 = arith.constant 44 : index
    %658 = memref.load %arg1[%c44_109] : memref<98xf32, #tpu.memory_space<smem>>
    %c93_110 = arith.constant 93 : index
    %659 = memref.load %arg1[%c93_110] : memref<98xf32, #tpu.memory_space<smem>>
    %660 = vector.broadcast %658 : f32 to vector<16x22xf32>
    %661 = arith.mulf %660, %482 : vector<16x22xf32>
    %662 = arith.addf %657, %661 : vector<16x22xf32>
    %663 = vector.broadcast %659 : f32 to vector<16x22xf32>
    %664 = arith.mulf %663, %489 : vector<16x22xf32>
    %665 = arith.addf %662, %664 : vector<16x22xf32>
    %666 = vector.extract_strided_slice %665 {offsets = [0, 2], sizes = [16, 16], strides = [1, 1]} : vector<16x22xf32> to vector<16x16xf32>
    %667 = arith.addf %608, %666 : vector<16x16xf32>
    %cst_111 = arith.constant 0.000000e+00 : f32
    %668 = vector.broadcast %cst_111 : f32 to vector<16x22xf32>
    %c3_112 = arith.constant 3 : index
    %669 = memref.load %arg1[%c3_112] : memref<98xf32, #tpu.memory_space<smem>>
    %c52_113 = arith.constant 52 : index
    %670 = memref.load %arg1[%c52_113] : memref<98xf32, #tpu.memory_space<smem>>
    %671 = vector.broadcast %669 : f32 to vector<16x22xf32>
    %672 = arith.mulf %671, %476 : vector<16x22xf32>
    %673 = arith.addf %668, %672 : vector<16x22xf32>
    %674 = vector.broadcast %670 : f32 to vector<16x22xf32>
    %675 = arith.mulf %674, %483 : vector<16x22xf32>
    %676 = arith.addf %673, %675 : vector<16x22xf32>
    %c10_114 = arith.constant 10 : index
    %677 = memref.load %arg1[%c10_114] : memref<98xf32, #tpu.memory_space<smem>>
    %c59_115 = arith.constant 59 : index
    %678 = memref.load %arg1[%c59_115] : memref<98xf32, #tpu.memory_space<smem>>
    %679 = vector.broadcast %677 : f32 to vector<16x22xf32>
    %680 = arith.mulf %679, %477 : vector<16x22xf32>
    %681 = arith.addf %676, %680 : vector<16x22xf32>
    %682 = vector.broadcast %678 : f32 to vector<16x22xf32>
    %683 = arith.mulf %682, %484 : vector<16x22xf32>
    %684 = arith.addf %681, %683 : vector<16x22xf32>
    %c17_116 = arith.constant 17 : index
    %685 = memref.load %arg1[%c17_116] : memref<98xf32, #tpu.memory_space<smem>>
    %c66_117 = arith.constant 66 : index
    %686 = memref.load %arg1[%c66_117] : memref<98xf32, #tpu.memory_space<smem>>
    %687 = vector.broadcast %685 : f32 to vector<16x22xf32>
    %688 = arith.mulf %687, %478 : vector<16x22xf32>
    %689 = arith.addf %684, %688 : vector<16x22xf32>
    %690 = vector.broadcast %686 : f32 to vector<16x22xf32>
    %691 = arith.mulf %690, %485 : vector<16x22xf32>
    %692 = arith.addf %689, %691 : vector<16x22xf32>
    %c24_118 = arith.constant 24 : index
    %693 = memref.load %arg1[%c24_118] : memref<98xf32, #tpu.memory_space<smem>>
    %c73_119 = arith.constant 73 : index
    %694 = memref.load %arg1[%c73_119] : memref<98xf32, #tpu.memory_space<smem>>
    %695 = vector.broadcast %693 : f32 to vector<16x22xf32>
    %696 = arith.mulf %695, %479 : vector<16x22xf32>
    %697 = arith.addf %692, %696 : vector<16x22xf32>
    %698 = vector.broadcast %694 : f32 to vector<16x22xf32>
    %699 = arith.mulf %698, %486 : vector<16x22xf32>
    %700 = arith.addf %697, %699 : vector<16x22xf32>
    %c31_120 = arith.constant 31 : index
    %701 = memref.load %arg1[%c31_120] : memref<98xf32, #tpu.memory_space<smem>>
    %c80_121 = arith.constant 80 : index
    %702 = memref.load %arg1[%c80_121] : memref<98xf32, #tpu.memory_space<smem>>
    %703 = vector.broadcast %701 : f32 to vector<16x22xf32>
    %704 = arith.mulf %703, %480 : vector<16x22xf32>
    %705 = arith.addf %700, %704 : vector<16x22xf32>
    %706 = vector.broadcast %702 : f32 to vector<16x22xf32>
    %707 = arith.mulf %706, %487 : vector<16x22xf32>
    %708 = arith.addf %705, %707 : vector<16x22xf32>
    %c38_122 = arith.constant 38 : index
    %709 = memref.load %arg1[%c38_122] : memref<98xf32, #tpu.memory_space<smem>>
    %c87_123 = arith.constant 87 : index
    %710 = memref.load %arg1[%c87_123] : memref<98xf32, #tpu.memory_space<smem>>
    %711 = vector.broadcast %709 : f32 to vector<16x22xf32>
    %712 = arith.mulf %711, %481 : vector<16x22xf32>
    %713 = arith.addf %708, %712 : vector<16x22xf32>
    %714 = vector.broadcast %710 : f32 to vector<16x22xf32>
    %715 = arith.mulf %714, %488 : vector<16x22xf32>
    %716 = arith.addf %713, %715 : vector<16x22xf32>
    %c45_124 = arith.constant 45 : index
    %717 = memref.load %arg1[%c45_124] : memref<98xf32, #tpu.memory_space<smem>>
    %c94_125 = arith.constant 94 : index
    %718 = memref.load %arg1[%c94_125] : memref<98xf32, #tpu.memory_space<smem>>
    %719 = vector.broadcast %717 : f32 to vector<16x22xf32>
    %720 = arith.mulf %719, %482 : vector<16x22xf32>
    %721 = arith.addf %716, %720 : vector<16x22xf32>
    %722 = vector.broadcast %718 : f32 to vector<16x22xf32>
    %723 = arith.mulf %722, %489 : vector<16x22xf32>
    %724 = arith.addf %721, %723 : vector<16x22xf32>
    %725 = vector.extract_strided_slice %724 {offsets = [0, 3], sizes = [16, 16], strides = [1, 1]} : vector<16x22xf32> to vector<16x16xf32>
    %726 = arith.addf %667, %725 : vector<16x16xf32>
    %cst_126 = arith.constant 0.000000e+00 : f32
    %727 = vector.broadcast %cst_126 : f32 to vector<16x22xf32>
    %c4_127 = arith.constant 4 : index
    %728 = memref.load %arg1[%c4_127] : memref<98xf32, #tpu.memory_space<smem>>
    %c53_128 = arith.constant 53 : index
    %729 = memref.load %arg1[%c53_128] : memref<98xf32, #tpu.memory_space<smem>>
    %730 = vector.broadcast %728 : f32 to vector<16x22xf32>
    %731 = arith.mulf %730, %476 : vector<16x22xf32>
    %732 = arith.addf %727, %731 : vector<16x22xf32>
    %733 = vector.broadcast %729 : f32 to vector<16x22xf32>
    %734 = arith.mulf %733, %483 : vector<16x22xf32>
    %735 = arith.addf %732, %734 : vector<16x22xf32>
    %c11_129 = arith.constant 11 : index
    %736 = memref.load %arg1[%c11_129] : memref<98xf32, #tpu.memory_space<smem>>
    %c60_130 = arith.constant 60 : index
    %737 = memref.load %arg1[%c60_130] : memref<98xf32, #tpu.memory_space<smem>>
    %738 = vector.broadcast %736 : f32 to vector<16x22xf32>
    %739 = arith.mulf %738, %477 : vector<16x22xf32>
    %740 = arith.addf %735, %739 : vector<16x22xf32>
    %741 = vector.broadcast %737 : f32 to vector<16x22xf32>
    %742 = arith.mulf %741, %484 : vector<16x22xf32>
    %743 = arith.addf %740, %742 : vector<16x22xf32>
    %c18_131 = arith.constant 18 : index
    %744 = memref.load %arg1[%c18_131] : memref<98xf32, #tpu.memory_space<smem>>
    %c67_132 = arith.constant 67 : index
    %745 = memref.load %arg1[%c67_132] : memref<98xf32, #tpu.memory_space<smem>>
    %746 = vector.broadcast %744 : f32 to vector<16x22xf32>
    %747 = arith.mulf %746, %478 : vector<16x22xf32>
    %748 = arith.addf %743, %747 : vector<16x22xf32>
    %749 = vector.broadcast %745 : f32 to vector<16x22xf32>
    %750 = arith.mulf %749, %485 : vector<16x22xf32>
    %751 = arith.addf %748, %750 : vector<16x22xf32>
    %c25_133 = arith.constant 25 : index
    %752 = memref.load %arg1[%c25_133] : memref<98xf32, #tpu.memory_space<smem>>
    %c74_134 = arith.constant 74 : index
    %753 = memref.load %arg1[%c74_134] : memref<98xf32, #tpu.memory_space<smem>>
    %754 = vector.broadcast %752 : f32 to vector<16x22xf32>
    %755 = arith.mulf %754, %479 : vector<16x22xf32>
    %756 = arith.addf %751, %755 : vector<16x22xf32>
    %757 = vector.broadcast %753 : f32 to vector<16x22xf32>
    %758 = arith.mulf %757, %486 : vector<16x22xf32>
    %759 = arith.addf %756, %758 : vector<16x22xf32>
    %c32_135 = arith.constant 32 : index
    %760 = memref.load %arg1[%c32_135] : memref<98xf32, #tpu.memory_space<smem>>
    %c81_136 = arith.constant 81 : index
    %761 = memref.load %arg1[%c81_136] : memref<98xf32, #tpu.memory_space<smem>>
    %762 = vector.broadcast %760 : f32 to vector<16x22xf32>
    %763 = arith.mulf %762, %480 : vector<16x22xf32>
    %764 = arith.addf %759, %763 : vector<16x22xf32>
    %765 = vector.broadcast %761 : f32 to vector<16x22xf32>
    %766 = arith.mulf %765, %487 : vector<16x22xf32>
    %767 = arith.addf %764, %766 : vector<16x22xf32>
    %c39_137 = arith.constant 39 : index
    %768 = memref.load %arg1[%c39_137] : memref<98xf32, #tpu.memory_space<smem>>
    %c88_138 = arith.constant 88 : index
    %769 = memref.load %arg1[%c88_138] : memref<98xf32, #tpu.memory_space<smem>>
    %770 = vector.broadcast %768 : f32 to vector<16x22xf32>
    %771 = arith.mulf %770, %481 : vector<16x22xf32>
    %772 = arith.addf %767, %771 : vector<16x22xf32>
    %773 = vector.broadcast %769 : f32 to vector<16x22xf32>
    %774 = arith.mulf %773, %488 : vector<16x22xf32>
    %775 = arith.addf %772, %774 : vector<16x22xf32>
    %c46_139 = arith.constant 46 : index
    %776 = memref.load %arg1[%c46_139] : memref<98xf32, #tpu.memory_space<smem>>
    %c95_140 = arith.constant 95 : index
    %777 = memref.load %arg1[%c95_140] : memref<98xf32, #tpu.memory_space<smem>>
    %778 = vector.broadcast %776 : f32 to vector<16x22xf32>
    %779 = arith.mulf %778, %482 : vector<16x22xf32>
    %780 = arith.addf %775, %779 : vector<16x22xf32>
    %781 = vector.broadcast %777 : f32 to vector<16x22xf32>
    %782 = arith.mulf %781, %489 : vector<16x22xf32>
    %783 = arith.addf %780, %782 : vector<16x22xf32>
    %784 = vector.extract_strided_slice %783 {offsets = [0, 4], sizes = [16, 16], strides = [1, 1]} : vector<16x22xf32> to vector<16x16xf32>
    %785 = arith.addf %726, %784 : vector<16x16xf32>
    %cst_141 = arith.constant 0.000000e+00 : f32
    %786 = vector.broadcast %cst_141 : f32 to vector<16x22xf32>
    %c5_142 = arith.constant 5 : index
    %787 = memref.load %arg1[%c5_142] : memref<98xf32, #tpu.memory_space<smem>>
    %c54_143 = arith.constant 54 : index
    %788 = memref.load %arg1[%c54_143] : memref<98xf32, #tpu.memory_space<smem>>
    %789 = vector.broadcast %787 : f32 to vector<16x22xf32>
    %790 = arith.mulf %789, %476 : vector<16x22xf32>
    %791 = arith.addf %786, %790 : vector<16x22xf32>
    %792 = vector.broadcast %788 : f32 to vector<16x22xf32>
    %793 = arith.mulf %792, %483 : vector<16x22xf32>
    %794 = arith.addf %791, %793 : vector<16x22xf32>
    %c12_144 = arith.constant 12 : index
    %795 = memref.load %arg1[%c12_144] : memref<98xf32, #tpu.memory_space<smem>>
    %c61_145 = arith.constant 61 : index
    %796 = memref.load %arg1[%c61_145] : memref<98xf32, #tpu.memory_space<smem>>
    %797 = vector.broadcast %795 : f32 to vector<16x22xf32>
    %798 = arith.mulf %797, %477 : vector<16x22xf32>
    %799 = arith.addf %794, %798 : vector<16x22xf32>
    %800 = vector.broadcast %796 : f32 to vector<16x22xf32>
    %801 = arith.mulf %800, %484 : vector<16x22xf32>
    %802 = arith.addf %799, %801 : vector<16x22xf32>
    %c19_146 = arith.constant 19 : index
    %803 = memref.load %arg1[%c19_146] : memref<98xf32, #tpu.memory_space<smem>>
    %c68_147 = arith.constant 68 : index
    %804 = memref.load %arg1[%c68_147] : memref<98xf32, #tpu.memory_space<smem>>
    %805 = vector.broadcast %803 : f32 to vector<16x22xf32>
    %806 = arith.mulf %805, %478 : vector<16x22xf32>
    %807 = arith.addf %802, %806 : vector<16x22xf32>
    %808 = vector.broadcast %804 : f32 to vector<16x22xf32>
    %809 = arith.mulf %808, %485 : vector<16x22xf32>
    %810 = arith.addf %807, %809 : vector<16x22xf32>
    %c26_148 = arith.constant 26 : index
    %811 = memref.load %arg1[%c26_148] : memref<98xf32, #tpu.memory_space<smem>>
    %c75_149 = arith.constant 75 : index
    %812 = memref.load %arg1[%c75_149] : memref<98xf32, #tpu.memory_space<smem>>
    %813 = vector.broadcast %811 : f32 to vector<16x22xf32>
    %814 = arith.mulf %813, %479 : vector<16x22xf32>
    %815 = arith.addf %810, %814 : vector<16x22xf32>
    %816 = vector.broadcast %812 : f32 to vector<16x22xf32>
    %817 = arith.mulf %816, %486 : vector<16x22xf32>
    %818 = arith.addf %815, %817 : vector<16x22xf32>
    %c33_150 = arith.constant 33 : index
    %819 = memref.load %arg1[%c33_150] : memref<98xf32, #tpu.memory_space<smem>>
    %c82_151 = arith.constant 82 : index
    %820 = memref.load %arg1[%c82_151] : memref<98xf32, #tpu.memory_space<smem>>
    %821 = vector.broadcast %819 : f32 to vector<16x22xf32>
    %822 = arith.mulf %821, %480 : vector<16x22xf32>
    %823 = arith.addf %818, %822 : vector<16x22xf32>
    %824 = vector.broadcast %820 : f32 to vector<16x22xf32>
    %825 = arith.mulf %824, %487 : vector<16x22xf32>
    %826 = arith.addf %823, %825 : vector<16x22xf32>
    %c40_152 = arith.constant 40 : index
    %827 = memref.load %arg1[%c40_152] : memref<98xf32, #tpu.memory_space<smem>>
    %c89_153 = arith.constant 89 : index
    %828 = memref.load %arg1[%c89_153] : memref<98xf32, #tpu.memory_space<smem>>
    %829 = vector.broadcast %827 : f32 to vector<16x22xf32>
    %830 = arith.mulf %829, %481 : vector<16x22xf32>
    %831 = arith.addf %826, %830 : vector<16x22xf32>
    %832 = vector.broadcast %828 : f32 to vector<16x22xf32>
    %833 = arith.mulf %832, %488 : vector<16x22xf32>
    %834 = arith.addf %831, %833 : vector<16x22xf32>
    %c47_154 = arith.constant 47 : index
    %835 = memref.load %arg1[%c47_154] : memref<98xf32, #tpu.memory_space<smem>>
    %c96_155 = arith.constant 96 : index
    %836 = memref.load %arg1[%c96_155] : memref<98xf32, #tpu.memory_space<smem>>
    %837 = vector.broadcast %835 : f32 to vector<16x22xf32>
    %838 = arith.mulf %837, %482 : vector<16x22xf32>
    %839 = arith.addf %834, %838 : vector<16x22xf32>
    %840 = vector.broadcast %836 : f32 to vector<16x22xf32>
    %841 = arith.mulf %840, %489 : vector<16x22xf32>
    %842 = arith.addf %839, %841 : vector<16x22xf32>
    %843 = vector.extract_strided_slice %842 {offsets = [0, 5], sizes = [16, 16], strides = [1, 1]} : vector<16x22xf32> to vector<16x16xf32>
    %844 = arith.addf %785, %843 : vector<16x16xf32>
    %cst_156 = arith.constant 0.000000e+00 : f32
    %845 = vector.broadcast %cst_156 : f32 to vector<16x22xf32>
    %c6_157 = arith.constant 6 : index
    %846 = memref.load %arg1[%c6_157] : memref<98xf32, #tpu.memory_space<smem>>
    %c55_158 = arith.constant 55 : index
    %847 = memref.load %arg1[%c55_158] : memref<98xf32, #tpu.memory_space<smem>>
    %848 = vector.broadcast %846 : f32 to vector<16x22xf32>
    %849 = arith.mulf %848, %476 : vector<16x22xf32>
    %850 = arith.addf %845, %849 : vector<16x22xf32>
    %851 = vector.broadcast %847 : f32 to vector<16x22xf32>
    %852 = arith.mulf %851, %483 : vector<16x22xf32>
    %853 = arith.addf %850, %852 : vector<16x22xf32>
    %c13_159 = arith.constant 13 : index
    %854 = memref.load %arg1[%c13_159] : memref<98xf32, #tpu.memory_space<smem>>
    %c62_160 = arith.constant 62 : index
    %855 = memref.load %arg1[%c62_160] : memref<98xf32, #tpu.memory_space<smem>>
    %856 = vector.broadcast %854 : f32 to vector<16x22xf32>
    %857 = arith.mulf %856, %477 : vector<16x22xf32>
    %858 = arith.addf %853, %857 : vector<16x22xf32>
    %859 = vector.broadcast %855 : f32 to vector<16x22xf32>
    %860 = arith.mulf %859, %484 : vector<16x22xf32>
    %861 = arith.addf %858, %860 : vector<16x22xf32>
    %c20_161 = arith.constant 20 : index
    %862 = memref.load %arg1[%c20_161] : memref<98xf32, #tpu.memory_space<smem>>
    %c69_162 = arith.constant 69 : index
    %863 = memref.load %arg1[%c69_162] : memref<98xf32, #tpu.memory_space<smem>>
    %864 = vector.broadcast %862 : f32 to vector<16x22xf32>
    %865 = arith.mulf %864, %478 : vector<16x22xf32>
    %866 = arith.addf %861, %865 : vector<16x22xf32>
    %867 = vector.broadcast %863 : f32 to vector<16x22xf32>
    %868 = arith.mulf %867, %485 : vector<16x22xf32>
    %869 = arith.addf %866, %868 : vector<16x22xf32>
    %c27_163 = arith.constant 27 : index
    %870 = memref.load %arg1[%c27_163] : memref<98xf32, #tpu.memory_space<smem>>
    %c76_164 = arith.constant 76 : index
    %871 = memref.load %arg1[%c76_164] : memref<98xf32, #tpu.memory_space<smem>>
    %872 = vector.broadcast %870 : f32 to vector<16x22xf32>
    %873 = arith.mulf %872, %479 : vector<16x22xf32>
    %874 = arith.addf %869, %873 : vector<16x22xf32>
    %875 = vector.broadcast %871 : f32 to vector<16x22xf32>
    %876 = arith.mulf %875, %486 : vector<16x22xf32>
    %877 = arith.addf %874, %876 : vector<16x22xf32>
    %c34_165 = arith.constant 34 : index
    %878 = memref.load %arg1[%c34_165] : memref<98xf32, #tpu.memory_space<smem>>
    %c83_166 = arith.constant 83 : index
    %879 = memref.load %arg1[%c83_166] : memref<98xf32, #tpu.memory_space<smem>>
    %880 = vector.broadcast %878 : f32 to vector<16x22xf32>
    %881 = arith.mulf %880, %480 : vector<16x22xf32>
    %882 = arith.addf %877, %881 : vector<16x22xf32>
    %883 = vector.broadcast %879 : f32 to vector<16x22xf32>
    %884 = arith.mulf %883, %487 : vector<16x22xf32>
    %885 = arith.addf %882, %884 : vector<16x22xf32>
    %c41_167 = arith.constant 41 : index
    %886 = memref.load %arg1[%c41_167] : memref<98xf32, #tpu.memory_space<smem>>
    %c90_168 = arith.constant 90 : index
    %887 = memref.load %arg1[%c90_168] : memref<98xf32, #tpu.memory_space<smem>>
    %888 = vector.broadcast %886 : f32 to vector<16x22xf32>
    %889 = arith.mulf %888, %481 : vector<16x22xf32>
    %890 = arith.addf %885, %889 : vector<16x22xf32>
    %891 = vector.broadcast %887 : f32 to vector<16x22xf32>
    %892 = arith.mulf %891, %488 : vector<16x22xf32>
    %893 = arith.addf %890, %892 : vector<16x22xf32>
    %c48_169 = arith.constant 48 : index
    %894 = memref.load %arg1[%c48_169] : memref<98xf32, #tpu.memory_space<smem>>
    %c97_170 = arith.constant 97 : index
    %895 = memref.load %arg1[%c97_170] : memref<98xf32, #tpu.memory_space<smem>>
    %896 = vector.broadcast %894 : f32 to vector<16x22xf32>
    %897 = arith.mulf %896, %482 : vector<16x22xf32>
    %898 = arith.addf %893, %897 : vector<16x22xf32>
    %899 = vector.broadcast %895 : f32 to vector<16x22xf32>
    %900 = arith.mulf %899, %489 : vector<16x22xf32>
    %901 = arith.addf %898, %900 : vector<16x22xf32>
    %902 = vector.extract_strided_slice %901 {offsets = [0, 6], sizes = [16, 16], strides = [1, 1]} : vector<16x22xf32> to vector<16x16xf32>
    %903 = arith.addf %844, %902 : vector<16x16xf32>
    %904 = arith.negf %903 : vector<16x16xf32>
    %905 = math.exp %904 : vector<16x16xf32>
    %cst_171 = arith.constant 1.000000e+00 : f32
    %906 = vector.broadcast %cst_171 : f32 to vector<16x16xf32>
    %907 = arith.addf %906, %905 : vector<16x16xf32>
    %908 = arith.divf %906, %907 : vector<16x16xf32>
    %c1_172 = arith.constant 1 : index
    %c0_173 = arith.constant 0 : index
    %c0_174 = arith.constant 0 : index
    %909 = vector.load %arg3[%c1_172, %c0_173, %c0_174] : memref<2x16x16xf32, #tpu.memory_space<vmem>>, vector<1x16x16xf32>
    %910 = vector.shape_cast %909 : vector<1x16x16xf32> to vector<16x16xf32>
    %911 = vector.shape_cast %908 : vector<16x16xf32> to vector<1x16x16xf32>
    tpu.vector_store %arg3[%c1_172, %c0_173, %c0_174], %911 {strides = array<i32>} : memref<2x16x16xf32, #tpu.memory_space<vmem>>, vector<1x16x16xf32>,
    return
  }
  func.func @transform_0(%arg0: i32) -> i32 {
    %c0_i32 = arith.constant 0 : i32
    %c0_i32_0 = arith.constant 0 : i32
    return %c0_i32 : i32
  }
  func.func @transform_1(%arg0: i32) -> (i32, i32, i32, i32) {
    %c0_i32 = arith.constant 0 : i32
    %c0_i32_0 = arith.constant 0 : i32
    %c0_i32_1 = arith.constant 0 : i32
    %c0_i32_2 = arith.constant 0 : i32
    return %arg0, %c0_i32, %c0_i32_0, %c0_i32_1 : i32, i32, i32, i32
  }
  func.func @transform_2(%arg0: i32) -> (i32, i32, i32) {
    %c0_i32 = arith.constant 0 : i32
    %c0_i32_0 = arith.constant 0 : i32
    %c0_i32_1 = arith.constant 0 : i32
    return %arg0, %c0_i32, %c0_i32_0 : i32, i32, i32
  }
}

</mosaic_0001>

<bundles_post_ra>
// kernel: tpu_custom_call.1
= control target key start
LH: loop header
LB: loop body
LE: loop exit
PB: predicated region body
PF: predicated region fallthrough
CT: control target
= control target key end

     0   :  { %s7119_s0 = inlined_call_operand.hbm [shape: f32[98], index: 0, kind: input, shape index: {}]   ;;  %s7120_s1 = inlined_call_operand.hbm [shape: f32[2,4,16,16], index: 1, kind: input, shape index: {}]   ;;  %s7121_s2 = inlined_call_operand.hbm [shape: f32[2,16,16], index: 2, kind: output, shape index: {}]  }
   0x1   :  { %7167 = sst [smem:[#allocation71_spill]] %s7121_s2 }
   0x2   :  { %7 = vsyncpa [#allocation7], 0 }
   0x3   :  { %8 = vsyncpa [#allocation5], 0 }
   0x4   :  { %9 = vsyncpa [#allocation6], 0  ;;  %s3640_s9 = smov [#allocation4]   ;;  %s3641_s12 = smov [#allocation8]  }
   0x5   :  { %17 = dma.hbm_to_smem %s7119_s0, 16, %s3640_s9, [#allocation7]  }
   0x6   :  { %s23_s13 = sshll.u32 %s3641_s12, 4  ;;  %s24_s13 = int_to_ptr.vmem [resolvable:$true] %s23_s13 }
   0x7   :  { %s3602_s14 = scalar_lea.vmem %s24_s13, 2048  ;;  %p3607_p1 = scmp.lt.s32.totalorder %s24_s13, %s24_s13 }
   0x8   :  { %p3603_p0 = scmp.ne.s32.totalorder %s24_s13, %s3602_s14  ;;  %p3608_p2 = scmp.lt.s32.totalorder %s3602_s14, %s3602_s14 }
   0xa   :  { %p3609_p3 = por %p3608_p2, %p3607_p1 }
   0xc   :  { %p3610_p4 = pnand %p3609_p3, %p3603_p0 }
   0xe   :  { %3613 = shalt.err (!%p3610_p4)
}
   0xf   :  { %s7122_s15 = smov 128   ;;  %s7123_s16 = smov 8  }
  0x10   :  { %29 = dma.hbm_to_vmem [thread:$0]  %s7120_s1, 2048, %s24_s13, [#allocation5], %s7122_s15, %s7122_s15, %s7123_s16  }
  0x11   :  { %3634 = dma.done.wait [#allocation7], 16  }
  0x12   :  { %3635 = vsyncadd [#allocation7], 4294967280 }
  0x13   :  { %3636 = dma.done.wait [#allocation5], 2048  }
  0x14   :  { %3637 = vsyncadd [#allocation5], 4294965248 }
  0x15   :  { %36 = sfence }
  0x16   :  { %v45_v0 = vld [vmem:[#allocation8] sm:$0xff]  ;;  %v48_v1 = vld [vmem:[#allocation8 + $0x10] sm:$0xff]  ;;  %vm37_vm0 = vcmask 179200   ;;  %v46_v5 = vld [vmem:[#allocation8 + $0x8] sm:$0xff]  ;;  %vm40_vm1 = vcmask 177152   ;;  %v3644_v12 = vmov 0.0  }
  0x17   :  { %v55_v2 = vld [vmem:[#allocation8 + $0x20] sm:$0xff]  ;;  %v52_v3 = vmax.f32 %v45_v0, %v48_v1  ;;  %v50_v4 = vadd.f32 %v48_v1, %v45_v0  ;;  %v49_v6 = vld [vmem:[#allocation8 + $0x18] sm:$0xff]  ;;  %v62_v7 = vld [vmem:[#allocation8 + $0x30] sm:$0xff]  ;;  %42 = vst.msk [vmem:[#allocation3] sm:$0xff] %vm37_vm0, %v3644_v12  ;;  %s3645_s0 = smov 3   ;;  %s3677_s1 = sld [smem:[#allocation4 + $0x1]] }
  0x18   :  { %v53_v8 = vmax.f32 %v46_v5, %v49_v6  ;;  %v56_v9 = vld [vmem:[#allocation8 + $0x28] sm:$0xff]  ;;  %v51_v10 = vadd.f32 %v49_v6, %v46_v5  ;;  %43 = vst.msk [vmem:[#allocation3 + $0x8] sm:$0xff] %vm37_vm0, %v3644_v12  ;;  %38 = vst.msk [vmem:[#allocation2] sm:$0xff] %vm37_vm0, %v3644_v12  ;;  %v63_v15 = vld [vmem:[#allocation8 + $0x38] sm:$0xff]  ;;  %s3679_s19 = sld [smem:[#allocation4 + $0x32]]  ;;  %vm76_vm2 = vcmask 154648  }
  0x19   :  { %v1692_v11 = vld [vmem:[#allocation8 + $0x48] sm:$0xff]  ;;  %39 = vst.msk [vmem:[#allocation2 + $0x8] sm:$0xff] %vm37_vm0, %v3644_v12  ;;  %v59_v13 = vmax.f32 %v52_v3, %v55_v2  ;;  %v57_v14 = vadd.f32 %v55_v2, %v50_v4  ;;  %v1695_v16 = vld [vmem:[#allocation8 + $0x58] sm:$0xff]  ;;  %v1691_v21 = vld [vmem:[#allocation8 + $0x40] sm:$0xff]  ;;  %s3681_s20 = sld [smem:[#allocation4 + $0x8]]  ;;  %vm116_vm3 = vcmask 1046528  }
  0x1a   :  { %44 = vst.msk [vmem:[#allocation3 + $0x10] sm:$0x3f] %vm40_vm1, %v3644_v12  ;;  %41 = vst.msk [vmem:[#allocation2 + $0x10] sm:$0x3f] %vm40_vm1, %v3644_v12  ;;  %v1702_v17 = vld [vmem:[#allocation8 + $0x68] sm:$0xff]  ;;  %v60_v18 = vmax.f32 %v53_v8, %v56_v9  ;;  %v58_v19 = vadd.f32 %v56_v9, %v51_v10  ;;  %v1697_v20 = vadd.f32 %v1695_v16, %v1692_v11  ;;  %v1694_v22 = vld [vmem:[#allocation8 + $0x50] sm:$0xff] }
  0x1b   :  { %v1701_v23 = vld [vmem:[#allocation8 + $0x60] sm:$0xff]  ;;  %v66_v24 = vmax.f32 %v59_v13, %v62_v7  ;;  %v64_v25 = vadd.f32 %v62_v7, %v57_v14  ;;  %v1696_v26 = vadd.f32 %v1694_v22, %v1691_v21  ;;  %v1699_v28 = vmax.f32 %v1692_v11, %v1695_v16  ;;  %v1709_v33 = vld [vmem:[#allocation8 + $0x78] sm:$0xff]  ;;  %v1708_v34 = vld [vmem:[#allocation8 + $0x70] sm:$0xff]  ;;  %s3683_s21 = sld [smem:[#allocation4 + $0x39]] }
  0x1c   :  { %v67_v27 = vmax.f32 %v60_v18, %v63_v15  ;;  %v1698_v29 = vmax.f32 %v1691_v21, %v1694_v22  ;;  %v65_v30 = vadd.f32 %v63_v15, %v58_v19  ;;  %v1704_v31 = vadd.f32 %v1702_v17, %v1697_v20  ;;  %s3685_s22 = sld [smem:[#allocation4 + $0xf]] }
  0x1d   :  { %81 = vrot.lane.b32.xlu1 %v66_v24, %s3645_s0  ;;  %70 = vrot.lane.b32.xlu0 %v64_v25, %s3645_s0  ;;  %v1703_v32 = vadd.f32 %v1701_v23, %v1696_v26  ;;  %v1706_v35 = vmax.f32 %v1699_v28, %v1702_v17  ;;  %7168 = sst [smem:[#allocation13_spill]] %s3677_s1  ;;  %v7138_v41 = vstv %s3677_s1  ;;  %vm151_vm4 = vcmask 1045504  }
  0x1e   :  { %v1711_v36 = vadd.f32 %v1709_v33, %v1704_v31  ;;  %v1705_v38 = vmax.f32 %v1698_v29, %v1701_v23  ;;  %7169 = sst [smem:[#allocation14_spill]] %s3679_s19  ;;  %v7137_v42 = vstv %s3679_s19  ;;  %vm186_vm5 = vcmask 1044480  }
  0x1f   :  { %v1710_v37 = vadd.f32 %v1708_v34, %v1703_v32  ;;  %v1713_v39 = vmax.f32 %v1706_v35, %v1709_v33  ;;  %s3687_s23 = sld [smem:[#allocation4 + $0x40]]  ;;  %v3788_v43 = vstv %s3681_s20  ;;  %vm221_vm6 = vcmask 1043456  }
  0x20   :  { %v1712_v40 = vmax.f32 %v1705_v38, %v1708_v34  ;;  %s3689_s24 = sld [smem:[#allocation4 + $0x16]]  ;;  %vm256_vm7 = vcmask 1042432   ;;  %vm291_vm8 = vcmask 1041408   ;;  %vm1687_vm9 = vcmask 130048  }
  0x21   :  { %83 = vrot.lane.b32.xlu1 %v67_v27, %s3645_s0  ;;  %72 = vrot.lane.b32.xlu0 %v65_v30, %s3645_s0  ;;  %s3691_s25 = sld [smem:[#allocation4 + $0x47]]  ;;  %v3791_v44 = vstv %s3683_s21 }
  0x22   :  { %s3693_s26 = sld [smem:[#allocation4 + $0x1d]]  ;;  %v3796_v45 = vstv %s3685_s22 }
  0x23   :  { %s3695_s27 = sld [smem:[#allocation4 + $0x4e]] }
  0x24   :  { %s3697_s28 = sld [smem:[#allocation4 + $0x24]] }
  0x25   :  { %1718 = vrot.lane.b32.xlu1 %v1711_v36, %s3645_s0  ;;  %1716 = vrot.lane.b32.xlu0 %v1710_v37, %s3645_s0  ;;  %s3699_s29 = sld [smem:[#allocation4 + $0x55]]  ;;  %v3799_v46 = vstv %s3687_s23 }
  0x26   :  { %s3701_s30 = sld [smem:[#allocation4 + $0x2b]]  ;;  %v3802_v47 = vstv %s3689_s24 }
  0x27   :  { %s3703_s3 = sld [smem:[#allocation4 + $0x5c]]  ;;  %v3805_v48 = vstv %s3691_s25 }
  0x28   :  { %s3705_s4 = sld [smem:[#allocation4 + $0x2]]  ;;  %v3810_v49 = vstv %s3693_s26 }
  0x29   :  { %1728 = vrot.lane.b32.xlu1 %v1713_v39, %s3645_s0  ;;  %1726 = vrot.lane.b32.xlu0 %v1712_v40, %s3645_s0  ;;  %s3707_s5 = sld [smem:[#allocation4 + $0x33]]  ;;  %v3813_v50 = vstv %s3695_s27 }
  0x2a   :  { %s3709_s6 = sld [smem:[#allocation4 + $0x9]]  ;;  %v3816_v51 = vstv %s3697_s28 }
  0x2b   :  { %s3711_s7 = sld [smem:[#allocation4 + $0x3a]]  ;;  %v3819_v52 = vstv %s3699_s29 }
  0x2c   :  { %s3713_s8 = sld [smem:[#allocation4 + $0x10]]  ;;  %v3824_v53 = vstv %s3701_s30 }
  0x2d   :  { %s3715_s9 = sld [smem:[#allocation4 + $0x41]]  ;;  %v3827_v54 = vstv %s3703_s3 }
  0x2e   :  { %7170 = sst [smem:[#allocation15_spill]] %s3705_s4 }
  0x2f   :  { %7171 = sst [smem:[#allocation16_spill]] %s3707_s5 }
  0x30   :  { %s3717_s10 = sld [smem:[#allocation4 + $0x17]]  ;;  %v3834_v57 = vstv %s3709_s6 }
  0x31   :  { %s3719_s11 = sld [smem:[#allocation4 + $0x48]]  ;;  %v3837_v58 = vstv %s3711_s7 }
  0x32   :  { %s3721_s12 = sld [smem:[#allocation4 + $0x1e]]  ;;  %v3840_v59 = vstv %s3713_s8 }
  0x33   :  { %s3723_s13 = sld [smem:[#allocation4 + $0x4f]]  ;;  %v3843_v60 = vstv %s3715_s9 }
  0x34   :  { %s3725_s14 = sld [smem:[#allocation4 + $0x25]] }
  0x35   :  { %s3727_s17 = sld [smem:[#allocation4 + $0x56]] }
  0x36   :  { %7172 = sst [smem:[#allocation17_spill]] %s3717_s10 }
  0x37   :  { %7173 = sst [smem:[#allocation18_spill]] %s3719_s11 }
  0x38   :  { %7174 = sst [smem:[#allocation19_spill]] %s3721_s12 }
  0x39   :  { %7175 = sst [smem:[#allocation20_spill]] %s3723_s13 }
  0x3a   :  { %7176 = sst [smem:[#allocation21_spill]] %s3725_s14 }
  0x3b   :  { %7177 = sst [smem:[#allocation22_spill]] %s3727_s17 }
  0x3c   :  { %s3729_s18 = sld [smem:[#allocation4 + $0x2c]] }
  0x3d   :  { %s3731_s0 = sld [smem:[#allocation4 + $0x5d]] }
  0x3e   :  { %s3733_s15 = sld [smem:[#allocation4 + $0x3]] }
  0x3f   :  { %s3735_s16 = sld [smem:[#allocation4 + $0x34]] }
  0x40   :  { %s3737_s2 = sld [smem:[#allocation4 + $0xa]] }
  0x41   :  { %s3739_s10 = sld [smem:[#allocation4 + $0x3b]] }
  0x42   :  { %7178 = sst [smem:[#allocation23_spill]] %s3729_s18 }
  0x43   :  { %7179 = sst [smem:[#allocation24_spill]] %s3731_s0 }
  0x44   :  { %7180 = sst [smem:[#allocation25_spill]] %s3733_s15 }
  0x45   :  { %s3741_s11 = sld [smem:[#allocation4 + $0x11]] }
  0x46   :  { %7181 = sst [smem:[#allocation26_spill]] %s3737_s2 }
  0x47   :  { %7182 = sst [smem:[#allocation27_spill]] %s3739_s10 }
  0x48   :  { %s3743_s12 = sld [smem:[#allocation4 + $0x42]] }
  0x49   :  { %s3745_s13 = sld [smem:[#allocation4 + $0x18]] }
  0x4a   :  { %s3747_s14 = sld [smem:[#allocation4 + $0x49]] }
  0x4b   :  { %s3749_s17 = sld [smem:[#allocation4 + $0x1f]]  ;;  %v3888_v11 = vstv %s3741_s11 }
  0x4c   :  { %s3751_s18 = sld [smem:[#allocation4 + $0x50]]  ;;  %7219 = vst [vmem:[#allocation43_spill] sm:$0xff] %v3888_v11 }
  0x4d   :  { %s3753_s0 = sld [smem:[#allocation4 + $0x26]] }
  0x4e   :  { %7183 = sst [smem:[#allocation28_spill]] %s3743_s12 }
  0x4f   :  { %7184 = sst [smem:[#allocation29_spill]] %s3745_s13 }
  0x50   :  { %7185 = sst [smem:[#allocation30_spill]] %s3747_s14 }
  0x51   :  { %s3755_s15 = sld [smem:[#allocation4 + $0x57]]  ;;  %v3902_v15 = vstv %s3749_s17 }
  0x52   :  { %7186 = sst [smem:[#allocation31_spill]] %s3751_s18  ;;  %7225 = vst [vmem:[#allocation47_spill] sm:$0xff] %v3902_v15 }
  0x53   :  { %7187 = sst [smem:[#allocation32_spill]] %s3753_s0 }
  0x54   :  { %s3757_s2 = sld [smem:[#allocation4 + $0x2d]] }
  0x55   :  { %s3759_s10 = sld [smem:[#allocation4 + $0x5e]] }
  0x56   :  { %s3761_s12 = sld [smem:[#allocation4 + $0x4]] }
  0x57   :  { %7188 = sst [smem:[#allocation33_spill]] %s3755_s15 }
  0x58   :  { %s3763_s13 = sld [smem:[#allocation4 + $0x35]] }
  0x59   :  { %s3765_s14 = sld [smem:[#allocation4 + $0xb]] }
  0x5a   :  { %7189 = sst [smem:[#allocation34_spill]] %s3757_s2 }
  0x5b   :  { %7190 = sst [smem:[#allocation35_spill]] %s3759_s10 }
  0x5c   :  { %7191 = sst [smem:[#allocation36_spill]] %s3761_s12 }
  0x5d   :  { %s3767_s18 = sld [smem:[#allocation4 + $0x3c]] }
  0x5e   :  { %7192 = sst [smem:[#allocation37_spill]] %s3763_s13 }
  0x5f   :  { %7193 = sst [smem:[#allocation38_spill]] %s3765_s14 }
  0x60   :  { %s3769_s0 = sld [smem:[#allocation4 + $0x12]] }
  0x61   :  { %s3771_s15 = sld [smem:[#allocation4 + $0x43]] }
  0x62   :  { %s3773_s2 = sld [smem:[#allocation4 + $0x19]] }
  0x63   :  { %s3775_s10 = sld [smem:[#allocation4 + $0x4a]]  ;;  %v3927_v26 = vstv %s3767_s18 }
  0x64   :  { %s3777_s12 = sld [smem:[#allocation4 + $0x20]]  ;;  %7234 = vst [vmem:[#allocation54_spill] sm:$0xff] %v3927_v26 }
  0x65   :  { %s3779_s13 = sld [smem:[#allocation4 + $0x51]] }
  0x66   :  { %7194 = sst [smem:[#allocation39_spill]] %s3769_s0 }
  0x67   :  { %s3781_s14 = sld [smem:[#allocation4 + $0x27]]  ;;  %v3933_v28 = vstv %s3771_s15 }
  0x68   :  { %s3783_s0 = sld [smem:[#allocation4 + $0x58]]  ;;  %7236 = vst [vmem:[#allocation56_spill] sm:$0xff] %v3933_v28  ;;  %v3938_v29 = vstv %s3773_s2 }
  0x69   :  { %s3807_s19 = sld [smem:[#allocation4 + $0x5f]]  ;;  %7237 = vst [vmem:[#allocation57_spill] sm:$0xff] %v3938_v29  ;;  %v3941_v30 = vstv %s3775_s10  ;;  %s3646_s10 = smov 127  }
  0x6a   :  { %7195 = sst [smem:[#allocation40_spill]] %s3777_s12  ;;  %7238 = vst [vmem:[#allocation58_spill] sm:$0xff] %v3941_v30 }
  0x6b   :  { %s3793_s12 = sld [smem:[#allocation4 + $0x2e]]  ;;  %v3947_v32 = vstv %s3779_s13  ;;  %s3649_s13 = smov 124  }
  0x6c   :  { %s7197_s20 = sld [smem:[#allocation17_spill]]  ;;  %7240 = vst [vmem:[#allocation60_spill] sm:$0xff] %v3947_v32 }
  0x6d   :  { %s7198_s21 = sld [smem:[#allocation18_spill]]  ;;  %v3950_v33 = vstv %s3781_s14 }
  0x6e   :  { %s7199_s1 = sld [smem:[#allocation19_spill]]  ;;  %7241 = vst [vmem:[#allocation61_spill] sm:$0xff] %v3950_v33  ;;  %v3953_v34 = vstv %s3783_s0 }
  0x6f   :  { %7196 = sst [smem:[#allocation41_spill]] %s3807_s19  ;;  %7242 = vst [vmem:[#allocation62_spill] sm:$0xff] %v3953_v34 }
  0x70   :  { %s7200_s22 = sld [smem:[#allocation20_spill]] }
  0x71   :  { %s3821_s23 = sld [smem:[#allocation4 + $0x5]]  ;;  %v3956_v35 = vstv %s3793_s12  ;;  %s3647_s12 = smov 126  }
  0x72   :  { %s7201_s24 = sld [smem:[#allocation21_spill]]  ;;  %v3848_v61 = vstv %s7197_s20  ;;  %7243 = vst [vmem:[#allocation63_spill] sm:$0xff] %v3956_v35 }
  0x73   :  { %s7202_s25 = sld [smem:[#allocation22_spill]]  ;;  %v3851_v62 = vstv %s7198_s21 }
  0x74   :  { %s7203_s19 = sld [smem:[#allocation23_spill]]  ;;  %v3854_v63 = vstv %s7199_s1 }
  0x75   :  { %s7204_s26 = sld [smem:[#allocation24_spill]] }
  0x76   :  { %s3831_s27 = sld [smem:[#allocation4 + $0x36]]  ;;  %v3857_v0 = vstv %s7200_s22 }
  0x77   :  { %s7205_s28 = sld [smem:[#allocation25_spill]] }
  0x78   :  { %s7206_s29 = sld [smem:[#allocation26_spill]]  ;;  %v3862_v1 = vstv %s7201_s24 }
  0x79   :  { %s3845_s30 = sld [smem:[#allocation4 + $0xc]]  ;;  %v3865_v2 = vstv %s7202_s25 }
  0x7a   :  { %s7207_s3 = sld [smem:[#allocation27_spill]]  ;;  %v3868_v3 = vstv %s7203_s19 }
  0x7b   :  { %s3859_s6 = sld [smem:[#allocation4 + $0x3d]]  ;;  %v3871_v4 = vstv %s7204_s26 }
  0x7c   :  { %s7208_s7 = sld [smem:[#allocation28_spill]] }
  0x7d   :  { %s7209_s8 = sld [smem:[#allocation29_spill]] }
  0x7e   :  { %s7210_s9 = sld [smem:[#allocation30_spill]]  ;;  %v3878_v9 = vstv %s7206_s29 }
  0x7f   :  { %s3873_s20 = sld [smem:[#allocation4 + $0x13]]  ;;  %v3964_v39 = vstv %s3845_s30 }
  0x80   :  { %s7211_s1 = sld [smem:[#allocation31_spill]]  ;;  %v3881_v10 = vstv %s7207_s3  ;;  %7247 = vst [vmem:[#allocation65_spill] sm:$0xff] %v3964_v39 }
  0x81   :  { %s7212_s21 = sld [smem:[#allocation32_spill]]  ;;  %7216 = vst [vmem:[#allocation42_spill] sm:$0xff] %v3881_v10  ;;  %v3967_v40 = vstv %s3859_s6 }
  0x82   :  { %s7213_s22 = sld [smem:[#allocation33_spill]]  ;;  %v3891_v12 = vstv %s7208_s7  ;;  %7248 = vst [vmem:[#allocation66_spill] sm:$0xff] %v3967_v40 }
  0x83   :  { %s7214_s24 = sld [smem:[#allocation34_spill]]  ;;  %7221 = vst [vmem:[#allocation44_spill] sm:$0xff] %v3891_v12  ;;  %v3894_v13 = vstv %s7209_s8 }
  0x84   :  { %s7215_s25 = sld [smem:[#allocation35_spill]]  ;;  %7222 = vst [vmem:[#allocation45_spill] sm:$0xff] %v3894_v13  ;;  %v3897_v14 = vstv %s7210_s9 }
  0x85   :  { %s7217_s19 = sld [smem:[#allocation36_spill]]  ;;  %7224 = vst [vmem:[#allocation46_spill] sm:$0xff] %v3897_v14  ;;  %v3974_v22 = vstv %s3873_s20 }
  0x86   :  { %s3883_s5 = sld [smem:[#allocation4 + $0x44]]  ;;  %v3905_v16 = vstv %s7211_s1  ;;  %7249 = vst [vmem:[#allocation67_spill] sm:$0xff] %v3974_v22  ;;  %s3650_s1 = smov 123  }
  0x87   :  { %s7218_s26 = sld [smem:[#allocation37_spill]]  ;;  %7226 = vst [vmem:[#allocation48_spill] sm:$0xff] %v3905_v16  ;;  %v3908_v17 = vstv %s7212_s21 }
  0x88   :  { %s7220_s4 = sld [smem:[#allocation38_spill]]  ;;  %7227 = vst [vmem:[#allocation49_spill] sm:$0xff] %v3908_v17  ;;  %v3911_v18 = vstv %s7213_s22 }
  0x89   :  { %s7223_s29 = sld [smem:[#allocation39_spill]]  ;;  %7228 = vst [vmem:[#allocation50_spill] sm:$0xff] %v3911_v18  ;;  %v3916_v19 = vstv %s7214_s24 }
  0x8a   :  { %s3899_s3 = sld [smem:[#allocation4 + $0x1a]]  ;;  %7230 = vst [vmem:[#allocation51_spill] sm:$0xff] %v3916_v19  ;;  %v3919_v20 = vstv %s7215_s25 }
  0x8b   :  { %s7229_s11 = sld [smem:[#allocation40_spill]]  ;;  %7231 = vst [vmem:[#allocation52_spill] sm:$0xff] %v3919_v20 }
  0x8c   :  { %s3913_s7 = sld [smem:[#allocation4 + $0x4b]]  ;;  %v3977_v21 = vstv %s3883_s5 }
  0x8d   :  { %s7232_s17 = sld [smem:[#allocation41_spill]]  ;;  %7250 = vst [vmem:[#allocation68_spill] sm:$0xff] %v3977_v21 }
  0x8e   :  { %v3924_v25 = vstv %s7220_s4  ;;  %s7244_s15 = sld [smem:[#allocation13_spill]] }
  0x8f   :  { %v82_v5 = vpop.permute.xlu1 %81  ;;  %v71_v6 = vpop.permute.xlu0 %70  ;;  %7233 = vst [vmem:[#allocation53_spill] sm:$0xff] %v3924_v25  ;;  %v3930_v27 = vstv %s7223_s29  ;;  %s7246_s2 = sld [smem:[#allocation14_spill]] }
  0x90   :  { %87 = vst.msk [vmem:[#allocation3 + $0x3] sm:$0xff] %vm76_vm2, %v82_v5  ;;  %77 = vst.msk [vmem:[#allocation2 + $0x3] sm:$0xff] %vm76_vm2, %v71_v6  ;;  %v3980_v8 = vstv %s3899_s3  ;;  %s7260_s4 = sld [smem:[#allocation15_spill]] }
  0x91   :  { %7235 = vst [vmem:[#allocation55_spill] sm:$0xff] %v3930_v27  ;;  %v3944_v31 = vstv %s7229_s11  ;;  %7251 = vst [vmem:[#allocation69_spill] sm:$0xff] %v3980_v8  ;;  %s7261_s5 = sld [smem:[#allocation16_spill]] }
  0x92   :  { %7239 = vst [vmem:[#allocation59_spill] sm:$0xff] %v3944_v31  ;;  %v3983_v7 = vstv %s3913_s7  ;;  %s4736_s14 = sld [smem:[#allocation4 + $0x21]] }
  0x93   :  { %v84_v23 = vpop.permute.xlu1 %83  ;;  %v73_v24 = vpop.permute.xlu0 %72  ;;  %v3959_v36 = vstv %s7232_s17  ;;  %7252 = vst [vmem:[#allocation70_spill] sm:$0xff] %v3983_v7  ;;  %s4744_s18 = sld [smem:[#allocation4 + $0x52]] }
  0x94   :  { %88 = vst.msk [vmem:[#allocation3 + $0xb] sm:$0xff] %vm76_vm2, %v84_v23  ;;  %78 = vst.msk [vmem:[#allocation2 + $0xb] sm:$0xff] %vm76_vm2, %v73_v24  ;;  %s4767_s0 = sld [smem:[#allocation4 + $0x28]] }
  0x95   :  { %7245 = vst [vmem:[#allocation64_spill] sm:$0xff] %v3959_v36  ;;  %v7254_v30 = vstv %s7246_s2  ;;  %s4791_s30 = sld [smem:[#allocation4 + $0x2f]] }
  0x96   :  { %s4807_s6 = sld [smem:[#allocation4 + $0x60]] }
  0x97   :  { %v3969_v5 = vld [vmem:[#allocation3] sm:$0xff]  ;;  %v3971_v6 = vld [vmem:[#allocation2] sm:$0xff]  ;;  %v1719_v23 = vpop.permute.xlu1 %1718  ;;  %v1717_v24 = vpop.permute.xlu0 %1716  ;;  %s4896_s8 = sld [smem:[#allocation4 + $0xd]] }
  0x98   :  { %v322_v38 = vmul.f32 %v7138_v41, %v3971_v6  ;;  %v327_v37 = vmul.f32 %v7137_v42, %v3969_v5  ;;  %v3993_v56 = vmul.f32 %v3788_v43, %v3971_v6  ;;  %v3997_v55 = vmul.f32 %v3791_v44, %v3969_v5  ;;  %s4901_s9 = sld [smem:[#allocation4 + $0x3e]] }
  0x99   :  { %v4001_v8 = vmul.f32 %v3796_v45, %v3971_v6  ;;  %v4005_v7 = vmul.f32 %v3799_v46, %v3969_v5  ;;  %v4009_v42 = vmul.f32 %v3802_v47, %v3971_v6  ;;  %v4013_v41 = vmul.f32 %v3805_v48, %v3969_v5  ;;  %s4908_s20 = sld [smem:[#allocation4 + $0x14]] }
  0x9a   :  { %v4015_v21 = vadd.f32 %v327_v37, %v322_v38  ;;  %v4021_v39 = vmul.f32 %v3810_v49, %v3971_v6  ;;  %v4033_v40 = vmul.f32 %v3813_v50, %v3969_v5  ;;  %v4037_v22 = vmul.f32 %v3816_v51, %v3971_v6  ;;  %s4927_s21 = sld [smem:[#allocation4 + $0x45]] }
  0x9b   :  { %v4023_v36 = vld [vmem:[#allocation3 + $0x8] sm:$0xff]  ;;  %v4025_v35 = vld [vmem:[#allocation3 + $0x10] sm:$0x3f]  ;;  %v1729_v33 = vpop.permute.xlu1 %1728  ;;  %v1727_v32 = vpop.permute.xlu0 %1726  ;;  %v4039_v31 = vld [vmem:[#allocation2 + $0x10] sm:$0x3f]  ;;  %v7253_v37 = vstv %s7244_s15  ;;  %v7258_v10 = vrot.slane %v4001_v8, 2 }
  0x9c   :  { %v4027_v34 = vld [vmem:[#allocation2 + $0x8] sm:$0xff]  ;;  %1733 = vst.msk [vmem:[#allocation3 + $0xb] sm:$0xff] %vm76_vm2, %v1729_v33  ;;  %1732 = vst.msk [vmem:[#allocation3 + $0x3] sm:$0xff] %vm76_vm2, %v1727_v32  ;;  %v328_v29 = vmul.f32 %v7254_v30, %v4023_v36  ;;  %v4056_v27 = vmul.f32 %v3791_v44, %v4023_v36  ;;  %v336_v32 = vmul.f32 %v3788_v43, %v4039_v31  ;;  %s4944_s22 = sld [smem:[#allocation4 + $0x1b]] }
  0x9d   :  { %1722 = vst.msk [vmem:[#allocation2 + $0x3] sm:$0xff] %vm76_vm2, %v1717_v24  ;;  %v323_v38 = vmul.f32 %v7253_v37, %v4027_v34  ;;  %v4052_v28 = vmul.f32 %v3788_v43, %v4027_v34  ;;  %1723 = vst.msk [vmem:[#allocation2 + $0xb] sm:$0xff] %vm76_vm2, %v1719_v23  ;;  %v352_v33 = vmul.f32 %v3791_v44, %v4025_v35  ;;  %s4955_s24 = sld [smem:[#allocation4 + $0x4c]] }
  0x9e   :  { %v4065_v24 = vmul.f32 %v3796_v45, %v4027_v34  ;;  %v370_v30 = vmul.f32 %v3796_v45, %v4039_v31  ;;  %v7159_v25 = vrot.slane %v4056_v27, 1  ;;  %v4073_v23 = vmul.f32 %v3799_v46, %v4023_v36  ;;  %s4967_s25 = sld [smem:[#allocation4 + $0x22]] }
  0x9f   :  { %v330_v37 = vadd.f32 %v328_v29, %v323_v38  ;;  %v341_v26 = vrot.slane %v4052_v28, 1  ;;  %v343_v43 = vrot.slane %v336_v32, 1  ;;  %v359_v20 = vrot.slane %v352_v33, 1  ;;  %s5015_s29 = sld [smem:[#allocation4 + $0x5a]] }
  0xa0   :  { %v375_v44 = vrot.slane %v4065_v24, 2  ;;  %v377_v19 = vrot.slane %v370_v30, 2  ;;  %v386_v18 = vmul.f32 %v3799_v46, %v4025_v35  ;;  %v391_v45 = vrot.slane %v4073_v23, 2  ;;  %s5030_s3 = sld [smem:[#allocation4 + $0x30]] }
  0xa1   :  { %v4081_v28 = vmul.f32 %v3802_v47, %v4027_v34  ;;  %v404_v29 = vmul.f32 %v3802_v47, %v4039_v31  ;;  %v344_v38 = vsel %vm116_vm3, %v341_v26, %v343_v43  ;;  %v360_v32 = vsel %vm116_vm3, %v7159_v25, %v359_v20  ;;  %s5040_s11 = sld [smem:[#allocation4 + $0x61]] }
  0xa2   :  { %v378_v33 = vsel %vm151_vm4, %v375_v44, %v377_v19  ;;  %v4092_v46 = vmul.f32 %v3805_v48, %v4023_v36  ;;  %v348_v24 = vadd.f32 %v344_v38, %v330_v37  ;;  %v393_v30 = vrot.slane %v386_v18, 2  ;;  %s5137_s7 = sld [smem:[#allocation4 + $0x1]] }
  0xa3   :  { %v409_v23 = vrot.slane %v4081_v28, 3  ;;  %v411_v17 = vrot.slane %v404_v29, 3  ;;  %v420_v47 = vmul.f32 %v3805_v48, %v4025_v35  ;;  %v437_v20 = vmul.f32 %v3810_v49, %v4027_v34  ;;  %s5139_s17 = sld [smem:[#allocation4 + $0x32]] }
  0xa4   :  { %v425_v43 = vrot.slane %v4092_v46, 3  ;;  %v438_v19 = vmul.f32 %v3810_v49, %v4039_v31  ;;  %v364_v25 = vadd.f32 %v360_v32, %v348_v24  ;;  %v394_v16 = vsel %vm151_vm4, %v391_v45, %v393_v30  ;;  %s5145_s15 = sld [smem:[#allocation4 + $0x8]] }
  0xa5   :  { %v412_v37 = vsel %vm186_vm5, %v409_v23, %v411_v17  ;;  %v453_v18 = vmul.f32 %v3813_v50, %v4023_v36  ;;  %v427_v28 = vrot.slane %v420_v47, 3  ;;  %v443_v29 = vrot.slane %v437_v20, 4  ;;  %s5155_s2 = sld [smem:[#allocation4 + $0x39]] }
  0xa6   :  { %v445_v38 = vrot.slane %v438_v19, 4  ;;  %v454_v48 = vmul.f32 %v3813_v50, %v4025_v35  ;;  %v382_v46 = vadd.f32 %v378_v33, %v364_v25  ;;  %v471_v14 = vmul.f32 %v3816_v51, %v4027_v34 }
  0xa7   :  { %v459_v15 = vrot.slane %v453_v18, 4  ;;  %v472_v49 = vmul.f32 %v3816_v51, %v4039_v31  ;;  %v428_v32 = vsel %vm186_vm5, %v425_v43, %v427_v28  ;;  %v487_v30 = vmul.f32 %v3819_v52, %v4023_v36 }
  0xa8   :  { %v446_v17 = vsel %vm221_vm6, %v443_v29, %v445_v38  ;;  %v461_v24 = vrot.slane %v454_v48, 4  ;;  %v398_v47 = vadd.f32 %v394_v16, %v382_v46  ;;  %v477_v20 = vrot.slane %v471_v14, 5 }
  0xa9   :  { %v479_v19 = vrot.slane %v472_v49, 5  ;;  %v488_v50 = vmul.f32 %v3819_v52, %v4025_v35  ;;  %v493_v33 = vrot.slane %v487_v30, 5  ;;  %v505_v51 = vmul.f32 %v3824_v53, %v4027_v34 }
  0xaa   :  { %v462_v25 = vsel %vm221_vm6, %v459_v15, %v461_v24  ;;  %v506_v18 = vmul.f32 %v3824_v53, %v4039_v31  ;;  %v416_v28 = vadd.f32 %v412_v37, %v398_v47  ;;  %v521_v14 = vmul.f32 %v3827_v54, %v4023_v36 }
  0xab   :  { %v480_v38 = vsel %vm256_vm7, %v477_v20, %v479_v19  ;;  %v495_v48 = vrot.slane %v488_v50, 5  ;;  %v511_v16 = vrot.slane %v505_v51, 6  ;;  %v522_v49 = vmul.f32 %v3827_v54, %v4025_v35 }
  0xac   :  { %v513_v46 = vrot.slane %v506_v18, 6  ;;  %v7255_v24 = vrot.slane %v3993_v56, 1  ;;  %v432_v13 = vadd.f32 %v428_v32, %v416_v28  ;;  %v527_v11 = vrot.slane %v521_v14, 6 }
  0xad   :  { %v496_v12 = vsel %vm256_vm7, %v493_v33, %v495_v48  ;;  %v529_v19 = vrot.slane %v522_v49, 6  ;;  %v7256_v50 = vrot.slane %v4056_v27, 1  ;;  %v7257_v51 = vrot.slane %v3997_v55, 1 }
  0xae   :  { %v342_v30 = vsel %vm116_vm3, %v7255_v24, %v341_v26  ;;  %v514_v47 = vsel %vm291_vm8, %v511_v16, %v513_v46  ;;  %v376_v56 = vsel %vm151_vm4, %v7258_v10, %v375_v44  ;;  %v450_v26 = vadd.f32 %v446_v17, %v432_v13 }
  0xaf   :  { %v347_v37 = vadd.f32 %v342_v30, %v4015_v21  ;;  %v358_v18 = vsel %vm116_vm3, %v7257_v51, %v7256_v50  ;;  %v7259_v28 = vrot.slane %v4005_v7, 2  ;;  %v408_v21 = vrot.slane %v4009_v42, 3 }
  0xb0   :  { %v530_v14 = vsel %vm291_vm8, %v527_v11, %v529_v19  ;;  %v424_v27 = vrot.slane %v4013_v41, 3  ;;  %v442_v55 = vrot.slane %v4021_v39, 4  ;;  %v458_v46 = vrot.slane %v4033_v40, 4 }
  0xb1   :  { %v363_v32 = vadd.f32 %v358_v18, %v347_v37  ;;  %v392_v48 = vsel %vm151_vm4, %v7259_v28, %v391_v45  ;;  %v466_v8 = vadd.f32 %v462_v25, %v450_v26  ;;  %v410_v13 = vsel %vm186_vm5, %v408_v21, %v409_v23 }
  0xb2   :  { %v476_v7 = vrot.slane %v4037_v22, 5  ;;  %v426_v44 = vsel %vm186_vm5, %v424_v27, %v425_v43  ;;  %v444_v42 = vsel %vm221_vm6, %v442_v55, %v443_v29  ;;  %v460_v45 = vsel %vm221_vm6, %v458_v46, %v459_v15 }
  0xb3   :  { %v381_v10 = vadd.f32 %v376_v56, %v363_v32  ;;  %v486_v41 = vmul.f32 %v3819_v52, %v3969_v5  ;;  %v484_v39 = vadd.f32 %v480_v38, %v466_v8  ;;  %v504_v25 = vmul.f32 %v3824_v53, %v3971_v6 }
  0xb4   :  { %v478_v40 = vsel %vm256_vm7, %v476_v7, %v477_v20  ;;  %v520_v22 = vmul.f32 %v3827_v54, %v3969_v5  ;;  %v7262_v23 = vstv %s7260_s4  ;;  %v7263_v29 = vstv %s7261_s5 }
  0xb5   :  { %v397_v17 = vadd.f32 %v392_v48, %v381_v10  ;;  %v492_v49 = vrot.slane %v486_v41, 5  ;;  %v549_v43 = vmul.f32 %v7262_v23, %v4027_v34  ;;  %v554_v15 = vmul.f32 %v7263_v29, %v4023_v36 }
  0xb6   :  { %v500_v24 = vadd.f32 %v496_v12, %v484_v39  ;;  %v510_v52 = vrot.slane %v504_v25, 6  ;;  %v4170_v38 = vmul.f32 %v3834_v57, %v4027_v34  ;;  %v526_v53 = vrot.slane %v520_v22, 6 }
  0xb7   :  { %v415_v30 = vadd.f32 %v410_v13, %v397_v17  ;;  %v494_v20 = vsel %vm256_vm7, %v492_v49, %v493_v33  ;;  %v556_v37 = vadd.f32 %v554_v15, %v549_v43  ;;  %v562_v54 = vmul.f32 %v3834_v57, %v4039_v31 }
  0xb8   :  { %v518_v19 = vadd.f32 %v514_v47, %v500_v24  ;;  %v512_v51 = vsel %vm291_vm8, %v510_v52, %v511_v16  ;;  %v567_v18 = vrot.slane %v4170_v38, 1  ;;  %v528_v12 = vsel %vm291_vm8, %v526_v53, %v527_v11 }
  0xb9   :  { %v431_v50 = vadd.f32 %v426_v44, %v415_v30  ;;  %v569_v56 = vrot.slane %v562_v54, 1  ;;  %v4180_v26 = vmul.f32 %v3837_v58, %v4023_v36  ;;  %v578_v33 = vmul.f32 %v3837_v58, %v4025_v35 }
  0xba   :  { %v534_v32 = vadd.f32 %v530_v14, %v518_v19  ;;  %v4186_v47 = vmul.f32 %v3840_v59, %v4027_v34  ;;  %v596_v16 = vmul.f32 %v3840_v59, %v4039_v31  ;;  %v4196_v27 = vmul.f32 %v3843_v60, %v4023_v36 }
  0xbb   :  { %v449_v28 = vadd.f32 %v444_v42, %v431_v50  ;;  %v570_v11 = vsel %vm116_vm3, %v567_v18, %v569_v56  ;;  %v583_v48 = vrot.slane %v4180_v26, 1  ;;  %v585_v21 = vrot.slane %v578_v33, 1 }
  0xbc   :  { %539 = vrot.lane.b32.xlu1 %v534_v32, %s3646_s10  ;;  %v574_v55 = vadd.f32 %v570_v11, %v556_v37  ;;  %v601_v46 = vrot.slane %v4186_v47, 2  ;;  %v603_v8 = vrot.slane %v596_v16, 2  ;;  %v612_v13 = vmul.f32 %v3843_v60, %v4025_v35 }
  0xbd   :  { %v465_v14 = vadd.f32 %v460_v45, %v449_v28  ;;  %v586_v10 = vsel %vm116_vm3, %v583_v48, %v585_v21  ;;  %v617_v7 = vrot.slane %v4196_v27, 2  ;;  %v4208_v44 = vmul.f32 %v3848_v61, %v4027_v34 }
  0xbe   :  { %v590_v41 = vadd.f32 %v586_v10, %v574_v55  ;;  %v604_v45 = vsel %vm151_vm4, %v601_v46, %v603_v8  ;;  %v630_v39 = vmul.f32 %v3848_v61, %v4039_v31  ;;  %v619_v17 = vrot.slane %v612_v13, 2 }
  0xbf   :  { %v483_v42 = vadd.f32 %v478_v40, %v465_v14  ;;  %v635_v25 = vrot.slane %v4208_v44, 3  ;;  %v4218_v49 = vmul.f32 %v3851_v62, %v4023_v36  ;;  %v646_v22 = vmul.f32 %v3851_v62, %v4025_v35 }
  0xc0   :  { %v608_v40 = vadd.f32 %v604_v45, %v590_v41  ;;  %v637_v43 = vrot.slane %v630_v39, 3  ;;  %v4224_v29 = vmul.f32 %v3854_v63, %v4027_v34  ;;  %v620_v15 = vsel %vm151_vm4, %v617_v7, %v619_v17 }
  0xc1   :  { %v499_v23 = vadd.f32 %v494_v20, %v483_v42  ;;  %v651_v24 = vrot.slane %v4218_v49, 3  ;;  %v653_v30 = vrot.slane %v646_v22, 3  ;;  %v664_v52 = vmul.f32 %v3854_v63, %v4039_v31 }
  0xc2   :  { %v624_v37 = vadd.f32 %v620_v15, %v608_v40  ;;  %v638_v20 = vsel %vm186_vm5, %v635_v25, %v637_v43  ;;  %v669_v54 = vrot.slane %v4224_v29, 4  ;;  %v4241_v56 = vmul.f32 %v3857_v0, %v4023_v36 }
  0xc3   :  { %v517_v53 = vadd.f32 %v512_v51, %v499_v23  ;;  %v654_v19 = vsel %vm186_vm5, %v651_v24, %v653_v30  ;;  %v671_v50 = vrot.slane %v664_v52, 4  ;;  %v680_v33 = vmul.f32 %v3857_v0, %v4025_v35 }
  0xc4   :  { %v642_v32 = vadd.f32 %v638_v20, %v624_v37  ;;  %v4247_v28 = vmul.f32 %v3862_v1, %v4027_v34  ;;  %v698_v16 = vmul.f32 %v3862_v1, %v4039_v31  ;;  %v685_v21 = vrot.slane %v4241_v56, 4 }
  0xc5   :  { %v533_v51 = vadd.f32 %v528_v12, %v517_v53  ;;  %v672_v11 = vsel %vm221_vm6, %v669_v54, %v671_v50  ;;  %v687_v14 = vrot.slane %v680_v33, 4  ;;  %v4257_v55 = vmul.f32 %v3865_v2, %v4023_v36 }
  0xc6   :  { %v658_v12 = vadd.f32 %v654_v19, %v642_v32  ;;  %v703_v8 = vrot.slane %v4247_v28, 5  ;;  %v705_v10 = vrot.slane %v698_v16, 5  ;;  %v714_v13 = vmul.f32 %v3865_v2, %v4025_v35 }
  0xc7   :  { %537 = vrot.lane.b32.xlu0 %v533_v51, %s3646_s10  ;;  %v688_v42 = vsel %vm221_vm6, %v685_v21, %v687_v14  ;;  %v719_v41 = vrot.slane %v4257_v55, 5  ;;  %v4269_v45 = vmul.f32 %v3868_v3, %v4027_v34  ;;  %v732_v39 = vmul.f32 %v3868_v3, %v4039_v31 }
  0xc8   :  { %v676_v17 = vadd.f32 %v672_v11, %v658_v12  ;;  %v706_v22 = vsel %vm256_vm7, %v703_v8, %v705_v10  ;;  %v721_v23 = vrot.slane %v714_v13, 5  ;;  %v4278_v40 = vmul.f32 %v3871_v4, %v4023_v36 }
  0xc9   :  { %v737_v43 = vrot.slane %v4269_v45, 6  ;;  %v739_v15 = vrot.slane %v732_v39, 6  ;;  %v748_v30 = vmul.f32 %v3871_v4, %v4025_v35  ;;  %v7264_v52 = vstv %s7260_s4  ;;  %s5163_s4 = sld [smem:[#allocation4 + $0xf]] }
  0xca   :  { %v548_v53 = vmul.f32 %v7264_v52, %v3971_v6  ;;  %v692_v37 = vadd.f32 %v688_v42, %v676_v17  ;;  %v722_v20 = vsel %vm256_vm7, %v719_v41, %v721_v23  ;;  %v753_v19 = vrot.slane %v4278_v40, 6 }
  0xcb   :  { %v7265_v50 = vstv %s7261_s5  ;;  %v740_v51 = vsel %vm291_vm8, %v737_v43, %v739_v15  ;;  %v755_v32 = vrot.slane %v748_v30, 6  ;;  %v560_v16 = vmul.f32 %v3834_v57, %v3971_v6  ;;  %s5167_s5 = sld [smem:[#allocation4 + $0x40]] }
  0xcc   :  { %v553_v33 = vmul.f32 %v7265_v50, %v3969_v5  ;;  %v576_v11 = vmul.f32 %v3837_v58, %v3969_v5  ;;  %v710_v14 = vadd.f32 %v706_v22, %v692_v37  ;;  %v594_v10 = vmul.f32 %v3840_v59, %v3971_v6 }
  0xcd   :  { %v610_v13 = vmul.f32 %v3843_v60, %v3969_v5  ;;  %v756_v42 = vsel %vm291_vm8, %v753_v19, %v755_v32  ;;  %v566_v45 = vrot.slane %v560_v16, 1  ;;  %v628_v17 = vmul.f32 %v3848_v61, %v3971_v6 }
  0xce   :  { %v555_v12 = vadd.f32 %v553_v33, %v548_v53  ;;  %v582_v39 = vrot.slane %v576_v11, 1  ;;  %v726_v23 = vadd.f32 %v722_v20, %v710_v14  ;;  %v600_v57 = vrot.slane %v594_v10, 2 }
  0xcf   :  { %v616_v40 = vrot.slane %v610_v13, 2  ;;  %v644_v58 = vmul.f32 %v3851_v62, %v3969_v5  ;;  %v568_v59 = vsel %vm116_vm3, %v566_v45, %v567_v18  ;;  %v634_v22 = vrot.slane %v628_v17, 3 }
  0xd0   :  { %v584_v60 = vsel %vm116_vm3, %v582_v39, %v583_v48  ;;  %v662_v15 = vmul.f32 %v3854_v63, %v3971_v6  ;;  %v744_v30 = vadd.f32 %v740_v51, %v726_v23  ;;  %v573_v61 = vadd.f32 %v568_v59, %v555_v12  ;;  %v7269_v12 = vld [vmem:[#allocation43_spill] sm:$0xff]  ;;  %v7270_v39 = vld [vmem:[#allocation44_spill] sm:$0xff] }
  0xd1   :  { %v602_v52 = vsel %vm151_vm4, %v600_v57, %v601_v46  ;;  %v618_v62 = vsel %vm151_vm4, %v616_v40, %v617_v7  ;;  %v636_v38 = vsel %vm186_vm5, %v634_v22, %v635_v25  ;;  %v650_v18 = vrot.slane %v644_v58, 3 }
  0xd2   :  { %v668_v26 = vrot.slane %v662_v15, 4  ;;  %v678_v48 = vmul.f32 %v3857_v0, %v3969_v5  ;;  %v760_v63 = vadd.f32 %v756_v42, %v744_v30  ;;  %v589_v53 = vadd.f32 %v584_v60, %v573_v61 }
  0xd3   :  { %v696_v47 = vmul.f32 %v3862_v1, %v3971_v6  ;;  %v712_v27 = vmul.f32 %v3865_v2, %v3969_v5  ;;  %v652_v46 = vsel %vm186_vm5, %v650_v18, %v651_v24  ;;  %v730_v0 = vmul.f32 %v3868_v3, %v3971_v6 }
  0xd4   :  { %v670_v7 = vsel %vm221_vm6, %v668_v26, %v669_v54  ;;  %v684_v44 = vrot.slane %v678_v48, 4  ;;  %765 = vrot.lane.b32.xlu1 %v760_v63, %s3647_s12  ;;  %v607_v25 = vadd.f32 %v602_v52, %v589_v53  ;;  %v746_v2 = vmul.f32 %v3871_v4, %v3969_v5  ;;  %v7271_v52 = vld [vmem:[#allocation45_spill] sm:$0xff]  ;;  %v7272_v48 = vld [vmem:[#allocation46_spill] sm:$0xff] }
  0xd5   :  { %v702_v1 = vrot.slane %v696_v47, 5  ;;  %v718_v37 = vrot.slane %v712_v27, 5  ;;  %v736_v29 = vrot.slane %v730_v0, 6  ;;  %v7266_v24 = vstv %s7205_s28 }
  0xd6   :  { %v686_v49 = vsel %vm221_vm6, %v684_v44, %v685_v21  ;;  %v775_v54 = vmul.f32 %v7266_v24, %v4027_v34  ;;  %v7267_v20 = vstv %s3735_s16  ;;  %v623_v50 = vadd.f32 %v618_v62, %v607_v25  ;;  %v7274_v24 = vld [vmem:[#allocation48_spill] sm:$0xff] }
  0xd7   :  { %v780_v3 = vmul.f32 %v7267_v20, %v4023_v36  ;;  %v704_v33 = vsel %vm256_vm7, %v702_v1, %v703_v8  ;;  %v720_v4 = vsel %vm256_vm7, %v718_v37, %v719_v41  ;;  %v752_v51 = vrot.slane %v746_v2, 6  ;;  %v7268_v8 = vld [vmem:[#allocation42_spill] sm:$0xff] }
  0xd8   :  { %v738_v56 = vsel %vm291_vm8, %v736_v29, %v737_v43  ;;  %v4359_v32 = vmul.f32 %v3878_v9, %v4027_v34  ;;  %v788_v16 = vmul.f32 %v3878_v9, %v4039_v31  ;;  %v641_v11 = vadd.f32 %v636_v38, %v623_v50 }
  0xd9   :  { %v782_v21 = vadd.f32 %v780_v3, %v775_v54  ;;  %v754_v28 = vsel %vm291_vm8, %v752_v51, %v753_v19  ;;  %v4366_v14 = vmul.f32 %v7268_v8, %v4023_v36  ;;  %v804_v55 = vmul.f32 %v7268_v8, %v4025_v35 }
  0xda   :  { %v793_v41 = vrot.slane %v4359_v32, 1  ;;  %v795_v43 = vrot.slane %v788_v16, 1  ;;  %v4373_v10 = vmul.f32 %v7269_v12, %v4027_v34  ;;  %v822_v13 = vmul.f32 %v7269_v12, %v4039_v31  ;;  %v7275_v16 = vld [vmem:[#allocation49_spill] sm:$0xff] }
  0xdb   :  { %v657_v42 = vadd.f32 %v652_v46, %v641_v11  ;;  %v809_v19 = vrot.slane %v4366_v14, 1  ;;  %v811_v45 = vrot.slane %v804_v55, 1  ;;  %v4380_v17 = vmul.f32 %v7270_v39, %v4023_v36 }
  0xdc   :  { %v796_v23 = vsel %vm116_vm3, %v793_v41, %v795_v43  ;;  %v827_v57 = vrot.slane %v4373_v10, 2  ;;  %v829_v40 = vrot.slane %v822_v13, 2  ;;  %v838_v58 = vmul.f32 %v7270_v39, %v4025_v35 }
  0xdd   :  { %v675_v59 = vadd.f32 %v670_v7, %v657_v42  ;;  %v800_v60 = vadd.f32 %v796_v23, %v782_v21  ;;  %v812_v22 = vsel %vm116_vm3, %v809_v19, %v811_v45  ;;  %v843_v15 = vrot.slane %v4380_v17, 2  ;;  %v7273_v7 = vld [vmem:[#allocation47_spill] sm:$0xff]  ;;  %v7276_v42 = vld [vmem:[#allocation50_spill] sm:$0xff] }
  0xde   :  { %v830_v30 = vsel %vm151_vm4, %v827_v57, %v829_v40  ;;  %v845_v61 = vrot.slane %v838_v58, 2  ;;  %v4397_v62 = vmul.f32 %v7271_v52, %v4027_v34  ;;  %v856_v38 = vmul.f32 %v7271_v52, %v4039_v31 }
  0xdf   :  { %v691_v18 = vadd.f32 %v686_v49, %v675_v59  ;;  %v816_v26 = vadd.f32 %v812_v22, %v800_v60  ;;  %v4403_v63 = vmul.f32 %v7272_v48, %v4023_v36  ;;  %v872_v53 = vmul.f32 %v7272_v48, %v4025_v35 }
  0xe0   :  { %v846_v47 = vsel %vm151_vm4, %v843_v15, %v845_v61  ;;  %v861_v27 = vrot.slane %v4397_v62, 3  ;;  %v863_v46 = vrot.slane %v856_v38, 3  ;;  %v4413_v44 = vmul.f32 %v7273_v7, %v4027_v34 }
  0xe1   :  { %v709_v0 = vadd.f32 %v704_v33, %v691_v18  ;;  %v834_v25 = vadd.f32 %v830_v30, %v816_v26  ;;  %v877_v1 = vrot.slane %v4403_v63, 3  ;;  %v879_v37 = vrot.slane %v872_v53, 3  ;;  %v7277_v18 = vld [vmem:[#allocation51_spill] sm:$0xff] }
  0xe2   :  { %v864_v2 = vsel %vm186_vm5, %v861_v27, %v863_v46  ;;  %v890_v49 = vmul.f32 %v7273_v7, %v4039_v31  ;;  %v895_v29 = vrot.slane %v4413_v44, 4  ;;  %v4424_v54 = vmul.f32 %v7274_v24, %v4023_v36 }
  0xe3   :  { %v725_v20 = vadd.f32 %v720_v4, %v709_v0  ;;  %v850_v3 = vadd.f32 %v846_v47, %v834_v25  ;;  %v880_v50 = vsel %vm186_vm5, %v877_v1, %v879_v37  ;;  %v906_v33 = vmul.f32 %v7274_v24, %v4025_v35  ;;  %v7278_v47 = vld [vmem:[#allocation52_spill] sm:$0xff] }
  0xe4   :  { %v897_v51 = vrot.slane %v890_v49, 4  ;;  %v911_v21 = vrot.slane %v4424_v54, 4  ;;  %v4434_v11 = vmul.f32 %v7275_v16, %v4027_v34  ;;  %v924_v55 = vmul.f32 %v7275_v16, %v4039_v31 }
  0xe5   :  { %v743_v43 = vadd.f32 %v738_v56, %v725_v20  ;;  %v868_v4 = vadd.f32 %v864_v2, %v850_v3  ;;  %v913_v13 = vrot.slane %v906_v33, 4  ;;  %v4440_v45 = vmul.f32 %v7276_v42, %v4023_v36 }
  0xe6   :  { %v898_v23 = vsel %vm221_vm6, %v895_v29, %v897_v51  ;;  %v929_v40 = vrot.slane %v4434_v11, 5  ;;  %v931_v58 = vrot.slane %v924_v55, 5  ;;  %v940_v59 = vmul.f32 %v7276_v42, %v4025_v35  ;;  %v7284_v11 = vld [vmem:[#allocation54_spill] sm:$0xff] }
  0xe7   :  { %v759_v60 = vadd.f32 %v754_v28, %v743_v43  ;;  %v884_v56 = vadd.f32 %v880_v50, %v868_v4  ;;  %v914_v22 = vsel %vm221_vm6, %v911_v21, %v913_v13  ;;  %v945_v30 = vrot.slane %v4440_v45, 5 }
  0xe8   :  { %v932_v61 = vsel %vm256_vm7, %v929_v40, %v931_v58  ;;  %v947_v38 = vrot.slane %v940_v59, 5  ;;  %v4457_v26 = vmul.f32 %v7277_v18, %v4027_v34  ;;  %v958_v28 = vmul.f32 %v7277_v18, %v4039_v31 }
  0xe9   :  { %763 = vrot.lane.b32.xlu0 %v759_v60, %s3647_s12  ;;  %v902_v53 = vadd.f32 %v898_v23, %v884_v56  ;;  %v4464_v46 = vmul.f32 %v7278_v47, %v4023_v36  ;;  %v974_v0 = vmul.f32 %v7278_v47, %v4025_v35  ;;  %v7279_v25 = vstv %s7205_s28  ;;  %s4776_s28 = sld [smem:[#allocation4 + $0x59]] }
  0xea   :  { %v774_v37 = vmul.f32 %v7279_v25, %v3971_v6  ;;  %v948_v2 = vsel %vm256_vm7, %v945_v30, %v947_v38  ;;  %v963_v49 = vrot.slane %v4457_v26, 6  ;;  %v965_v20 = vrot.slane %v958_v28, 6 }
  0xeb   :  { %v7280_v3 = vstv %s3735_s16  ;;  %v918_v33 = vadd.f32 %v914_v22, %v902_v53  ;;  %v979_v51 = vrot.slane %v4464_v46, 6  ;;  %v981_v55 = vrot.slane %v974_v0, 6  ;;  %s3648_s16 = smov 125  }
  0xec   :  { %v779_v50 = vmul.f32 %v7280_v3, %v3969_v5  ;;  %v786_v43 = vmul.f32 %v3878_v9, %v3971_v6  ;;  %v966_v4 = vsel %vm291_vm8, %v963_v49, %v965_v20  ;;  %v802_v23 = vmul.f32 %v7268_v8, %v3969_v5 }
  0xed   :  { %v820_v58 = vmul.f32 %v7269_v12, %v3971_v6  ;;  %v936_v59 = vadd.f32 %v932_v61, %v918_v33  ;;  %v982_v60 = vsel %vm291_vm8, %v979_v51, %v981_v55  ;;  %v836_v22 = vmul.f32 %v7270_v39, %v3969_v5 }
  0xee   :  { %v781_v13 = vadd.f32 %v779_v50, %v774_v37  ;;  %v792_v56 = vrot.slane %v786_v43, 1  ;;  %v808_v38 = vrot.slane %v802_v23, 1  ;;  %v854_v9 = vmul.f32 %v7271_v52, %v3971_v6  ;;  %v7283_v43 = vld [vmem:[#allocation53_spill] sm:$0xff] }
  0xef   :  { %v826_v26 = vrot.slane %v820_v58, 2  ;;  %v870_v28 = vmul.f32 %v7272_v48, %v3969_v5  ;;  %v952_v53 = vadd.f32 %v948_v2, %v936_v59  ;;  %v842_v12 = vrot.slane %v836_v22, 2  ;;  %v7285_v58 = vld [vmem:[#allocation55_spill] sm:$0xff] }
  0xf0   :  { %v794_v8 = vsel %vm116_vm3, %v792_v56, %v793_v41  ;;  %v888_v61 = vmul.f32 %v7273_v7, %v3971_v6  ;;  %v810_v39 = vsel %vm116_vm3, %v808_v38, %v809_v19  ;;  %v860_v0 = vrot.slane %v854_v9, 3 }
  0xf1   :  { %v799_v46 = vadd.f32 %v794_v8, %v781_v13  ;;  %v828_v52 = vsel %vm151_vm4, %v826_v26, %v827_v57  ;;  %v970_v48 = vadd.f32 %v966_v4, %v952_v53  ;;  %v844_v32 = vsel %vm151_vm4, %v842_v12, %v843_v15 }
  0xf2   :  { %v876_v41 = vrot.slane %v870_v28, 3  ;;  %v894_v25 = vrot.slane %v888_v61, 4  ;;  %v862_v14 = vsel %vm186_vm5, %v860_v0, %v861_v27  ;;  %v904_v10 = vmul.f32 %v7274_v24, %v3969_v5  ;;  %v7287_v61 = vld [vmem:[#allocation57_spill] sm:$0xff] }
  0xf3   :  { %v815_v37 = vadd.f32 %v810_v39, %v799_v46  ;;  %v922_v19 = vmul.f32 %v7275_v16, %v3971_v6  ;;  %v986_v57 = vadd.f32 %v982_v60, %v970_v48  ;;  %v938_v62 = vmul.f32 %v7276_v42, %v3969_v5 }
  0xf4   :  { %v878_v17 = vsel %vm186_vm5, %v876_v41, %v877_v1  ;;  %v896_v15 = vsel %vm221_vm6, %v894_v25, %v895_v29  ;;  %v910_v7 = vrot.slane %v904_v10, 4  ;;  %v956_v24 = vmul.f32 %v7277_v18, %v3971_v6 }
  0xf5   :  { %v833_v27 = vadd.f32 %v828_v52, %v815_v37  ;;  %v928_v2 = vrot.slane %v922_v19, 5  ;;  %991 = vrot.lane.b32.xlu1 %v986_v57, %s3648_s16  ;;  %v944_v16 = vrot.slane %v938_v62, 5  ;;  %v972_v63 = vmul.f32 %v7278_v47, %v3969_v5  ;;  %v7288_v19 = vld [vmem:[#allocation58_spill] sm:$0xff] }
  0xf6   :  { %v7281_v44 = vstv %s7217_s19  ;;  %v7282_v29 = vstv %s7218_s26  ;;  %v912_v3 = vsel %vm221_vm6, %v910_v7, %v911_v21  ;;  %v962_v50 = vrot.slane %v956_v24, 6 }
  0xf7   :  { %v1001_v1 = vmul.f32 %v7281_v44, %v4027_v34  ;;  %v1006_v20 = vmul.f32 %v7282_v29, %v4023_v36  ;;  %v849_v42 = vadd.f32 %v844_v32, %v833_v27  ;;  %v930_v18 = vsel %vm256_vm7, %v928_v2, %v929_v40  ;;  %v7289_v27 = vld [vmem:[#allocation59_spill] sm:$0xff]  ;;  %v7290_v44 = vld [vmem:[#allocation60_spill] sm:$0xff] }
  0xf8   :  { %v946_v47 = vsel %vm256_vm7, %v944_v16, %v945_v30  ;;  %v978_v33 = vrot.slane %v972_v63, 6  ;;  %v4544_v4 = vmul.f32 %v7283_v43, %v4027_v34  ;;  %v964_v54 = vsel %vm291_vm8, %v962_v50, %v963_v49 }
  0xf9   :  { %v1008_v55 = vadd.f32 %v1006_v20, %v1001_v1  ;;  %v867_v13 = vadd.f32 %v862_v14, %v849_v42  ;;  %v1014_v21 = vmul.f32 %v7283_v43, %v4039_v31  ;;  %v4551_v40 = vmul.f32 %v7284_v11, %v4023_v36 }
  0xfa   :  { %v980_v45 = vsel %vm291_vm8, %v978_v33, %v979_v51  ;;  %v1019_v30 = vrot.slane %v4544_v4, 1  ;;  %v1030_v23 = vmul.f32 %v7284_v11, %v4025_v35  ;;  %v4559_v59 = vmul.f32 %v7285_v58, %v4027_v34  ;;  %v7286_v51 = vld [vmem:[#allocation56_spill] sm:$0xff] }
  0xfb   :  { %v883_v60 = vadd.f32 %v878_v17, %v867_v13  ;;  %v1021_v49 = vrot.slane %v1014_v21, 1  ;;  %v1035_v56 = vrot.slane %v4551_v40, 1  ;;  %v1048_v22 = vmul.f32 %v7285_v58, %v4039_v31  ;;  %v7291_v21 = vld [vmem:[#allocation61_spill] sm:$0xff] }
  0xfc   :  { %v1037_v38 = vrot.slane %v1030_v23, 1  ;;  %v1053_v26 = vrot.slane %v4559_v59, 2  ;;  %v4567_v9 = vmul.f32 %v7286_v51, %v4023_v36  ;;  %v1064_v28 = vmul.f32 %v7286_v51, %v4025_v35 }
  0xfd   :  { %v901_v53 = vadd.f32 %v896_v15, %v883_v60  ;;  %v1022_v8 = vsel %vm116_vm3, %v1019_v30, %v1021_v49  ;;  %v1055_v12 = vrot.slane %v1048_v22, 2  ;;  %v4576_v46 = vmul.f32 %v7287_v61, %v4027_v34 }
  0xfe   :  { %v1026_v39 = vadd.f32 %v1022_v8, %v1008_v55  ;;  %v1038_v52 = vsel %vm116_vm3, %v1035_v56, %v1037_v38  ;;  %v1069_v0 = vrot.slane %v4567_v9, 2  ;;  %v1071_v48 = vrot.slane %v1064_v28, 2  ;;  %v7292_v38 = vld [vmem:[#allocation62_spill] sm:$0xff] }
  0xff   :  { %v917_v32 = vadd.f32 %v912_v3, %v901_v53  ;;  %v1056_v41 = vsel %vm151_vm4, %v1053_v26, %v1055_v12  ;;  %v1082_v25 = vmul.f32 %v7287_v61, %v4039_v31  ;;  %v1087_v37 = vrot.slane %v4576_v46, 3 }
 0x100   :  { %v1042_v14 = vadd.f32 %v1038_v52, %v1026_v39  ;;  %v1072_v10 = vsel %vm151_vm4, %v1069_v0, %v1071_v48  ;;  %v4593_v57 = vmul.f32 %v7288_v19, %v4023_v36  ;;  %v1098_v17 = vmul.f32 %v7288_v19, %v4025_v35  ;;  %v7293_v39 = vld [vmem:[#allocation63_spill] sm:$0xff] }
 0x101   :  { %v935_v15 = vadd.f32 %v930_v18, %v917_v32  ;;  %v1089_v62 = vrot.slane %v1082_v25, 3  ;;  %v4599_v7 = vmul.f32 %v7289_v27, %v4027_v34  ;;  %v1116_v2 = vmul.f32 %v7289_v27, %v4039_v31 }
 0x102   :  { %v1060_v24 = vadd.f32 %v1056_v41, %v1042_v14  ;;  %v1103_v16 = vrot.slane %v4593_v57, 3  ;;  %v1105_v63 = vrot.slane %v1098_v17, 3  ;;  %v4606_v1 = vmul.f32 %v7290_v44, %v4023_v36  ;;  %v7294_v17 = vld [vmem:[#allocation64_spill] sm:$0xff] }
 0x103   :  { %v951_v29 = vadd.f32 %v946_v47, %v935_v15  ;;  %v1090_v20 = vsel %vm186_vm5, %v1087_v37, %v1089_v62  ;;  %v1121_v42 = vrot.slane %v4599_v7, 4  ;;  %v1123_v3 = vrot.slane %v1116_v2, 4 }
 0x104   :  { %v1076_v18 = vadd.f32 %v1072_v10, %v1060_v24  ;;  %v1106_v50 = vsel %vm186_vm5, %v1103_v16, %v1105_v63  ;;  %v1132_v33 = vmul.f32 %v7290_v44, %v4025_v35  ;;  %v1137_v55 = vrot.slane %v4606_v1, 4 }
 0x105   :  { %v969_v13 = vadd.f32 %v964_v54, %v951_v29  ;;  %v1124_v47 = vsel %vm221_vm6, %v1121_v42, %v1123_v3  ;;  %v4623_v23 = vmul.f32 %v7291_v21, %v4027_v34  ;;  %v1150_v60 = vmul.f32 %v7291_v21, %v4039_v31 }
 0x106   :  { %v1094_v49 = vadd.f32 %v1090_v20, %v1076_v18  ;;  %v1139_v22 = vrot.slane %v1132_v33, 4  ;;  %v4629_v28 = vmul.f32 %v7292_v38, %v4023_v36  ;;  %v1166_v54 = vmul.f32 %v7292_v38, %v4025_v35 }
 0x107   :  { %v985_v53 = vadd.f32 %v980_v45, %v969_v13  ;;  %v1155_v8 = vrot.slane %v4623_v23, 5  ;;  %v1157_v12 = vrot.slane %v1150_v60, 5  ;;  %v4636_v52 = vmul.f32 %v7293_v39, %v4027_v34  ;;  %v7300_v23 = vld [vmem:[#allocation66_spill] sm:$0xff] }
 0x108   :  { %v1110_v48 = vadd.f32 %v1106_v50, %v1094_v49  ;;  %v1140_v32 = vsel %vm221_vm6, %v1137_v55, %v1139_v22  ;;  %v1171_v41 = vrot.slane %v4629_v28, 5  ;;  %v1173_v25 = vrot.slane %v1166_v54, 5 }
 0x109   :  { %989 = vrot.lane.b32.xlu0 %v985_v53, %s3648_s16  ;;  %v1158_v45 = vsel %vm256_vm7, %v1155_v8, %v1157_v12  ;;  %v1184_v14 = vmul.f32 %v7293_v39, %v4039_v31  ;;  %v1189_v10 = vrot.slane %v4636_v52, 6  ;;  %v4651_v15 = vmul.f32 %v7294_v17, %v4023_v36 }
 0x10a   :  { %v1128_v62 = vadd.f32 %v1124_v47, %v1110_v48  ;;  %v1174_v2 = vsel %vm256_vm7, %v1171_v41, %v1173_v25  ;;  %v1200_v24 = vmul.f32 %v7294_v17, %v4025_v35  ;;  %v7295_v63 = vstv %s7217_s19  ;;  %s4991_s19 = sld [smem:[#allocation4 + $0x53]] }
 0x10b   :  { %v1000_v29 = vmul.f32 %v7295_v63, %v3971_v6  ;;  %v1191_v20 = vrot.slane %v1184_v14, 6  ;;  %v1205_v3 = vrot.slane %v4651_v15, 6  ;;  %v7296_v18 = vstv %s7218_s26  ;;  %s5004_s26 = sld [smem:[#allocation4 + $0x29]] }
 0x10c   :  { %v1005_v50 = vmul.f32 %v7296_v18, %v3969_v5  ;;  %v1012_v33 = vmul.f32 %v7283_v43, %v3971_v6  ;;  %v1144_v13 = vadd.f32 %v1140_v32, %v1128_v62  ;;  %v1207_v60 = vrot.slane %v1200_v24, 6 }
 0x10d   :  { %v1028_v47 = vmul.f32 %v7284_v11, %v3969_v5  ;;  %v1046_v49 = vmul.f32 %v7285_v58, %v3971_v6  ;;  %v1192_v22 = vsel %vm291_vm8, %v1189_v10, %v1191_v20  ;;  %v1062_v53 = vmul.f32 %v7286_v51, %v3969_v5 }
 0x10e   :  { %v1007_v28 = vadd.f32 %v1005_v50, %v1000_v29  ;;  %v1018_v54 = vrot.slane %v1012_v33, 1  ;;  %v1162_v12 = vadd.f32 %v1158_v45, %v1144_v13  ;;  %v1208_v43 = vsel %vm291_vm8, %v1205_v3, %v1207_v60  ;;  %v7299_v60 = vld [vmem:[#allocation65_spill] sm:$0xff] }
 0x10f   :  { %v1034_v48 = vrot.slane %v1028_v47, 1  ;;  %v1052_v32 = vrot.slane %v1046_v49, 2  ;;  %v1068_v25 = vrot.slane %v1062_v53, 2  ;;  %v1080_v58 = vmul.f32 %v7287_v61, %v3971_v6 }
 0x110   :  { %v1020_v11 = vsel %vm116_vm3, %v1018_v54, %v1019_v30  ;;  %v1096_v14 = vmul.f32 %v7288_v19, %v3969_v5  ;;  %v1178_v15 = vadd.f32 %v1174_v2, %v1162_v12  ;;  %v1114_v61 = vmul.f32 %v7289_v27, %v3971_v6 }
 0x111   :  { %v1025_v62 = vadd.f32 %v1020_v11, %v1007_v28  ;;  %v1036_v51 = vsel %vm116_vm3, %v1034_v48, %v1035_v56  ;;  %v1054_v45 = vsel %vm151_vm4, %v1052_v32, %v1053_v26  ;;  %v1070_v4 = vsel %vm151_vm4, %v1068_v25, %v1069_v0  ;;  %v7301_v48 = vld [vmem:[#allocation67_spill] sm:$0xff] }
 0x112   :  { %v1086_v30 = vrot.slane %v1080_v58, 3  ;;  %v1102_v24 = vrot.slane %v1096_v14, 3  ;;  %v1196_v19 = vadd.f32 %v1192_v22, %v1178_v15  ;;  %v1130_v40 = vmul.f32 %v7290_v44, %v3969_v5  ;;  %v7303_v14 = vld [vmem:[#allocation69_spill] sm:$0xff] }
 0x113   :  { %v1041_v2 = vadd.f32 %v1036_v51, %v1025_v62  ;;  %v1148_v56 = vmul.f32 %v7291_v21, %v3971_v6  ;;  %v1120_v9 = vrot.slane %v1114_v61, 4  ;;  %v1164_v0 = vmul.f32 %v7292_v38, %v3969_v5 }
 0x114   :  { %v1088_v59 = vsel %vm186_vm5, %v1086_v30, %v1087_v37  ;;  %v1104_v26 = vsel %vm186_vm5, %v1102_v24, %v1103_v16  ;;  %v1212_v27 = vadd.f32 %v1208_v43, %v1196_v19  ;;  %v1136_v44 = vrot.slane %v1130_v40, 4 }
 0x115   :  { %v1059_v63 = vadd.f32 %v1054_v45, %v1041_v2  ;;  %v1154_v29 = vrot.slane %v1148_v56, 5  ;;  %v1122_v46 = vsel %vm221_vm6, %v1120_v9, %v1121_v42  ;;  %v1170_v21 = vrot.slane %v1164_v0, 5 }
 0x116   :  { %v1182_v37 = vmul.f32 %v7293_v39, %v3971_v6  ;;  %v1198_v57 = vmul.f32 %v7294_v17, %v3969_v5  ;;  %1217 = vrot.lane.b32.xlu1 %v1212_v27, %s3649_s13  ;;  %v1138_v38 = vsel %vm221_vm6, %v1136_v44, %v1137_v55  ;;  %v7297_v42 = vstv %s3821_s23 }
 0x117   :  { %v1075_v16 = vadd.f32 %v1070_v4, %v1059_v63  ;;  %v1156_v7 = vsel %vm256_vm7, %v1154_v29, %v1155_v8  ;;  %v1227_v20 = vmul.f32 %v7297_v42, %v4027_v34  ;;  %v1172_v39 = vsel %vm256_vm7, %v1170_v21, %v1171_v41 }
 0x118   :  { %v1188_v18 = vrot.slane %v1182_v37, 6  ;;  %v1204_v50 = vrot.slane %v1198_v57, 6  ;;  %v7298_v17 = vstv %s3831_s27  ;;  %v4728_v1 = vmul.f32 %v7299_v60, %v4027_v34 }
 0x119   :  { %v1232_v33 = vmul.f32 %v7298_v17, %v4023_v36  ;;  %v1093_v13 = vadd.f32 %v1088_v59, %v1075_v16  ;;  %v1240_v55 = vmul.f32 %v7299_v60, %v4039_v31  ;;  %v4734_v8 = vmul.f32 %v7300_v23, %v4023_v36  ;;  %v7304_v59 = vld [vmem:[#allocation70_spill] sm:$0xff] }
 0x11a   :  { %v1190_v41 = vsel %vm291_vm8, %v1188_v18, %v1189_v10  ;;  %v1206_v47 = vsel %vm291_vm8, %v1204_v50, %v1205_v3  ;;  %v1256_v22 = vmul.f32 %v7300_v23, %v4025_v35  ;;  %v1245_v54 = vrot.slane %v4728_v1, 1  ;;  %v7302_v3 = vld [vmem:[#allocation68_spill] sm:$0xff] }
 0x11b   :  { %v1234_v49 = vadd.f32 %v1232_v33, %v1227_v20  ;;  %v1109_v28 = vadd.f32 %v1104_v26, %v1093_v13  ;;  %v1247_v53 = vrot.slane %v1240_v55, 1  ;;  %v1261_v12 = vrot.slane %v4734_v8, 1 }
 0x11c   :  { %v1263_v43 = vrot.slane %v1256_v22, 1  ;;  %v4750_v52 = vmul.f32 %v7301_v48, %v4027_v34  ;;  %v1274_v10 = vmul.f32 %v7301_v48, %v4039_v31  ;;  %v4756_v32 = vmul.f32 %v7302_v3, %v4023_v36 }
 0x11d   :  { %v1127_v11 = vadd.f32 %v1122_v46, %v1109_v28  ;;  %v1248_v25 = vsel %vm116_vm3, %v1245_v54, %v1247_v53  ;;  %v1290_v58 = vmul.f32 %v7302_v3, %v4025_v35  ;;  %v4765_v15 = vmul.f32 %v7303_v14, %v4027_v34 }
 0x11e   :  { %v1252_v62 = vadd.f32 %v1248_v25, %v1234_v49  ;;  %v1264_v51 = vsel %vm116_vm3, %v1261_v12, %v1263_v43  ;;  %v1279_v45 = vrot.slane %v4750_v52, 2  ;;  %v1281_v4 = vrot.slane %v1274_v10, 2 }
 0x11f   :  { %v1143_v30 = vadd.f32 %v1138_v38, %v1127_v11  ;;  %v1295_v24 = vrot.slane %v4756_v32, 2  ;;  %v1297_v61 = vrot.slane %v1290_v58, 2  ;;  %v1308_v19 = vmul.f32 %v7303_v14, %v4039_v31 }
 0x120   :  { %v1268_v2 = vadd.f32 %v1264_v51, %v1252_v62  ;;  %v1282_v40 = vsel %vm151_vm4, %v1279_v45, %v1281_v4  ;;  %v1313_v56 = vrot.slane %v4765_v15, 3  ;;  %v4784_v26 = vmul.f32 %v7304_v59, %v4023_v36 }
 0x121   :  { %v1161_v9 = vadd.f32 %v1156_v7, %v1143_v30  ;;  %v1298_v0 = vsel %vm151_vm4, %v1295_v24, %v1297_v61  ;;  %v1315_v27 = vrot.slane %v1308_v19, 3  ;;  %v1324_v63 = vmul.f32 %v7304_v59, %v4025_v35 }
 0x122   :  { %v1286_v44 = vadd.f32 %v1282_v40, %v1268_v2  ;;  %v1329_v29 = vrot.slane %v4784_v26, 3  ;;  %v4795_v46 = vstv %s4736_s14  ;;  %v4798_v21 = vstv %s4744_s18  ;;  %s3651_s14 = smov 122   ;;  %s5203_s18 = sld [smem:[#allocation4 + $0x16]] }
 0x123   :  { %v1177_v37 = vadd.f32 %v1172_v39, %v1161_v9  ;;  %v1316_v57 = vsel %vm186_vm5, %v1313_v56, %v1315_v27  ;;  %v1331_v16 = vrot.slane %v1324_v63, 3  ;;  %v4805_v38 = vmul.f32 %v4795_v46, %v4027_v34 }
 0x124   :  { %v1302_v7 = vadd.f32 %v1298_v0, %v1286_v44  ;;  %v1342_v42 = vmul.f32 %v4795_v46, %v4039_v31  ;;  %v4813_v20 = vmul.f32 %v4798_v21, %v4023_v36  ;;  %v1358_v39 = vmul.f32 %v4798_v21, %v4025_v35 }
 0x125   :  { %v1195_v18 = vadd.f32 %v1190_v41, %v1177_v37  ;;  %v1332_v50 = vsel %vm186_vm5, %v1329_v29, %v1331_v16  ;;  %v1347_v17 = vrot.slane %v4805_v38, 4  ;;  %v4822_v33 = vstv %s4767_s0  ;;  %s5228_s0 = sld [smem:[#allocation4 + $0x47]] }
 0x126   :  { %v1320_v13 = vadd.f32 %v1316_v57, %v1302_v7  ;;  %v1349_v55 = vrot.slane %v1342_v42, 4  ;;  %v1363_v49 = vrot.slane %v4813_v20, 4  ;;  %v1365_v22 = vrot.slane %v1358_v39, 4 }
 0x127   :  { %v1211_v28 = vadd.f32 %v1206_v47, %v1195_v18  ;;  %v4827_v53 = vmul.f32 %v4822_v33, %v4027_v34  ;;  %v1376_v41 = vmul.f32 %v4822_v33, %v4039_v31  ;;  %v4832_v43 = vstv %s4776_s28  ;;  %s5239_s28 = sld [smem:[#allocation4 + $0x1d]] }
 0x128   :  { %v1336_v10 = vadd.f32 %v1332_v50, %v1320_v13  ;;  %v1350_v11 = vsel %vm221_vm6, %v1347_v17, %v1349_v55  ;;  %v1366_v47 = vsel %vm221_vm6, %v1363_v49, %v1365_v22  ;;  %v4842_v25 = vmul.f32 %v4832_v43, %v4023_v36 }
 0x129   :  { %1215 = vrot.lane.b32.xlu0 %v1211_v28, %s3649_s13  ;;  %v1381_v58 = vrot.slane %v4827_v53, 5  ;;  %v1383_v62 = vrot.slane %v1376_v41, 5  ;;  %v1392_v51 = vmul.f32 %v4832_v43, %v4025_v35  ;;  %v1407_v4 = vstv %s4791_s30  ;;  %s5246_s30 = sld [smem:[#allocation4 + $0x4e]] }
 0x12a   :  { %v1354_v30 = vadd.f32 %v1350_v11, %v1336_v10  ;;  %v1397_v61 = vrot.slane %v4842_v25, 5  ;;  %v4851_v19 = vmul.f32 %v1407_v4, %v4027_v34  ;;  %v1410_v2 = vmul.f32 %v1407_v4, %v4039_v31 }
 0x12b   :  { %v1384_v40 = vsel %vm256_vm7, %v1381_v58, %v1383_v62  ;;  %v1399_v9 = vrot.slane %v1392_v51, 5  ;;  %v1423_v0 = vstv %s4807_s6  ;;  %v7305_v27 = vstv %s3821_s23  ;;  %s4882_s23 = sld [smem:[#allocation4 + $0x6]] }
 0x12c   :  { %v1226_v63 = vmul.f32 %v7305_v27, %v3971_v6  ;;  %v1370_v44 = vadd.f32 %v1366_v47, %v1354_v30  ;;  %v1415_v37 = vrot.slane %v4851_v19, 6  ;;  %v1417_v57 = vrot.slane %v1410_v2, 6  ;;  %s5267_s6 = sld [smem:[#allocation4 + $0x24]] }
 0x12d   :  { %v4863_v16 = vmul.f32 %v1423_v0, %v4023_v36  ;;  %v1400_v7 = vsel %vm256_vm7, %v1397_v61, %v1399_v9  ;;  %v1426_v42 = vmul.f32 %v1423_v0, %v4025_v35  ;;  %v7306_v39 = vstv %s3831_s27  ;;  %s4888_s27 = sld [smem:[#allocation4 + $0x37]] }
 0x12e   :  { %v1231_v18 = vmul.f32 %v7306_v39, %v3969_v5  ;;  %v1238_v50 = vmul.f32 %v7299_v60, %v3971_v6  ;;  %v1388_v13 = vadd.f32 %v1384_v40, %v1370_v44  ;;  %v1418_v55 = vsel %vm291_vm8, %v1415_v37, %v1417_v57 }
 0x12f   :  { %v1431_v22 = vrot.slane %v4863_v16, 6  ;;  %v1254_v28 = vmul.f32 %v7300_v23, %v3969_v5  ;;  %v1433_v41 = vrot.slane %v1426_v42, 6  ;;  %v1272_v47 = vmul.f32 %v7301_v48, %v3971_v6 }
 0x130   :  { %v1233_v10 = vadd.f32 %v1231_v18, %v1226_v63  ;;  %v1244_v11 = vrot.slane %v1238_v50, 1  ;;  %v1404_v62 = vadd.f32 %v1400_v7, %v1388_v13  ;;  %v1288_v51 = vmul.f32 %v7302_v3, %v3969_v5 }
 0x131   :  { %v1260_v60 = vrot.slane %v1254_v28, 1  ;;  %v1306_v30 = vmul.f32 %v7303_v14, %v3971_v6  ;;  %v1434_v23 = vsel %vm291_vm8, %v1431_v22, %v1433_v41  ;;  %v1278_v40 = vrot.slane %v1272_v47, 2 }
 0x132   :  { %v1246_v2 = vsel %vm116_vm3, %v1244_v11, %v1245_v54  ;;  %v1322_v48 = vmul.f32 %v7304_v59, %v3969_v5  ;;  %v1422_v9 = vadd.f32 %v1418_v55, %v1404_v62  ;;  %v1294_v14 = vrot.slane %v1288_v51, 2 }
 0x133   :  { %v1251_v27 = vadd.f32 %v1246_v2, %v1233_v10  ;;  %v1262_v3 = vsel %vm116_vm3, %v1260_v60, %v1261_v12  ;;  %v1280_v1 = vsel %vm151_vm4, %v1278_v40, %v1279_v45  ;;  %v1312_v54 = vrot.slane %v1306_v30, 3 }
 0x134   :  { %v1328_v63 = vrot.slane %v1322_v48, 3  ;;  %v1340_v59 = vmul.f32 %v4795_v46, %v3971_v6  ;;  %v1438_v44 = vadd.f32 %v1434_v23, %v1422_v9  ;;  %v1296_v8 = vsel %vm151_vm4, %v1294_v14, %v1295_v24 }
 0x135   :  { %v1267_v57 = vadd.f32 %v1262_v3, %v1251_v27  ;;  %v1356_v12 = vmul.f32 %v4798_v21, %v3969_v5  ;;  %v1314_v52 = vsel %vm186_vm5, %v1312_v54, %v1313_v56  ;;  %v1374_v16 = vmul.f32 %v4822_v33, %v3971_v6 }
 0x136   :  { %v1330_v45 = vsel %vm186_vm5, %v1328_v63, %v1329_v29  ;;  %v1346_v46 = vrot.slane %v1340_v59, 4  ;;  %1443 = vrot.lane.b32.xlu1 %v1438_v44, %s3650_s1  ;;  %v1390_v15 = vmul.f32 %v4832_v43, %v3969_v5  ;;  %v1408_v56 = vmul.f32 %v1407_v4, %v3971_v6 }
 0x137   :  { %v1285_v32 = vadd.f32 %v1280_v1, %v1267_v57  ;;  %v1362_v24 = vrot.slane %v1356_v12, 4  ;;  %v1380_v29 = vrot.slane %v1374_v16, 5  ;;  %v1424_v21 = vmul.f32 %v1423_v0, %v3969_v5 }
 0x138   :  { %v1348_v26 = vsel %vm221_vm6, %v1346_v46, %v1347_v17  ;;  %v1451_v33 = vstv %s4882_s23  ;;  %v1396_v4 = vrot.slane %v1390_v15, 5  ;;  %v1414_v42 = vrot.slane %v1408_v56, 6  ;;  %s5285_s23 = sld [smem:[#allocation4 + $0x55]] }
 0x139   :  { %v1301_v7 = vadd.f32 %v1296_v8, %v1285_v32  ;;  %v1364_v43 = vsel %vm221_vm6, %v1362_v24, %v1363_v49  ;;  %v1382_v38 = vsel %vm256_vm7, %v1380_v29, %v1381_v58  ;;  %v1430_v17 = vrot.slane %v1424_v21, 6 }
 0x13a   :  { %v1453_v39 = vmul.f32 %v1451_v33, %v4027_v34  ;;  %v1456_v0 = vstv %s4888_s27  ;;  %v1398_v20 = vsel %vm256_vm7, %v1396_v4, %v1397_v61  ;;  %v1416_v49 = vsel %vm291_vm8, %v1414_v42, %v1415_v37  ;;  %s5300_s27 = sld [smem:[#allocation4 + $0x2b]] }
 0x13b   :  { %v1319_v18 = vadd.f32 %v1314_v52, %v1301_v7  ;;  %v1458_v53 = vmul.f32 %v1456_v0, %v4023_v36  ;;  %v1432_v58 = vsel %vm291_vm8, %v1430_v17, %v1431_v22  ;;  %v4959_v50 = vstv %s4896_s8  ;;  %s5316_s8 = sld [smem:[#allocation4 + $0x5c]] }
 0x13c   :  { %v4962_v13 = vstv %s4901_s9  ;;  %v4965_v55 = vstv %s4908_s20  ;;  %v4971_v19 = vmul.f32 %v4959_v50, %v4027_v34  ;;  %v1466_v37 = vmul.f32 %v4959_v50, %v4039_v31  ;;  %s5399_s9 = sld [smem:[#allocation4 + $0x2]] }
 0x13d   :  { %v1335_v25 = vadd.f32 %v1330_v45, %v1319_v18  ;;  %v1460_v61 = vadd.f32 %v1458_v53, %v1453_v39  ;;  %v4977_v22 = vmul.f32 %v4962_v13, %v4023_v36  ;;  %v1482_v28 = vmul.f32 %v4962_v13, %v4025_v35  ;;  %s5411_s20 = sld [smem:[#allocation4 + $0x33]] }
 0x13e   :  { %v4983_v41 = vmul.f32 %v4965_v55, %v4027_v34  ;;  %v1500_v10 = vmul.f32 %v4965_v55, %v4039_v31  ;;  %v1471_v47 = vrot.slane %v4971_v19, 1  ;;  %v1473_v62 = vrot.slane %v1466_v37, 1 }
 0x13f   :  { %v1353_v11 = vadd.f32 %v1348_v26, %v1335_v25  ;;  %v4989_v60 = vstv %s4927_s21  ;;  %v1487_v51 = vrot.slane %v4977_v22, 1  ;;  %v1489_v30 = vrot.slane %v1482_v28, 1  ;;  %s5419_s21 = sld [smem:[#allocation4 + $0x9]] }
 0x140   :  { %v1505_v23 = vrot.slane %v4983_v41, 2  ;;  %v1507_v2 = vrot.slane %v1500_v10, 2  ;;  %v1474_v48 = vsel %vm116_vm3, %v1471_v47, %v1473_v62  ;;  %v5000_v9 = vmul.f32 %v4989_v60, %v4023_v36 }
 0x141   :  { %v1369_v40 = vadd.f32 %v1364_v43, %v1353_v11  ;;  %v1516_v27 = vmul.f32 %v4989_v60, %v4025_v35  ;;  %v1478_v3 = vadd.f32 %v1474_v48, %v1460_v61  ;;  %v1490_v14 = vsel %vm116_vm3, %v1487_v51, %v1489_v30 }
 0x142   :  { %v1508_v1 = vsel %vm151_vm4, %v1505_v23, %v1507_v2  ;;  %v5013_v54 = vstv %s4944_s22  ;;  %v1521_v59 = vrot.slane %v5000_v9, 2  ;;  %v5025_v52 = vstv %s4955_s24  ;;  %s5423_s22 = sld [smem:[#allocation4 + $0x3a]] }
 0x143   :  { %v1387_v63 = vadd.f32 %v1382_v38, %v1369_v40  ;;  %v1523_v44 = vrot.slane %v1516_v27, 2  ;;  %v5020_v57 = vmul.f32 %v5013_v54, %v4027_v34  ;;  %v1494_v8 = vadd.f32 %v1490_v14, %v1478_v3  ;;  %s5429_s24 = sld [smem:[#allocation4 + $0x10]] }
 0x144   :  { %v1534_v12 = vmul.f32 %v5013_v54, %v4039_v31  ;;  %v5028_v45 = vstv %s4967_s25  ;;  %v5038_v24 = vmul.f32 %v5025_v52, %v4023_v36  ;;  %v1550_v26 = vmul.f32 %v5025_v52, %v4025_v35  ;;  %s5443_s25 = sld [smem:[#allocation4 + $0x41]] }
 0x145   :  { %v1403_v46 = vadd.f32 %v1398_v20, %v1387_v63  ;;  %v1524_v16 = vsel %vm151_vm4, %v1521_v59, %v1523_v44  ;;  %v1539_v32 = vrot.slane %v5020_v57, 3  ;;  %v1512_v15 = vadd.f32 %v1508_v1, %v1494_v8 }
 0x146   :  { %v1541_v56 = vrot.slane %v1534_v12, 3  ;;  %v5046_v29 = vmul.f32 %v5028_v45, %v4027_v34  ;;  %v1555_v7 = vrot.slane %v5038_v24, 3  ;;  %v1568_v43 = vmul.f32 %v5028_v45, %v4039_v31 }
 0x147   :  { %v1421_v21 = vadd.f32 %v1416_v49, %v1403_v46  ;;  %v5052_v4 = vstv %s4991_s19  ;;  %v1528_v42 = vadd.f32 %v1524_v16, %v1512_v15  ;;  %v1557_v17 = vrot.slane %v1550_v26, 3  ;;  %s5462_s19 = sld [smem:[#allocation4 + $0x17]] }
 0x148   :  { %v1542_v38 = vsel %vm186_vm5, %v1539_v32, %v1541_v56  ;;  %v1573_v39 = vrot.slane %v5046_v29, 4  ;;  %v1575_v20 = vrot.slane %v1568_v43, 4  ;;  %v5060_v49 = vmul.f32 %v5052_v4, %v4023_v36 }
 0x149   :  { %v1437_v18 = vadd.f32 %v1432_v58, %v1421_v21  ;;  %v1584_v53 = vmul.f32 %v5052_v4, %v4025_v35  ;;  %v1546_v25 = vadd.f32 %v1542_v38, %v1528_v42  ;;  %v1558_v61 = vsel %vm186_vm5, %v1555_v7, %v1557_v17 }
 0x14a   :  { %v5068_v37 = vstv %s5004_s26  ;;  %v5071_v28 = vstv %s5015_s29  ;;  %v1576_v58 = vsel %vm221_vm6, %v1573_v39, %v1575_v20  ;;  %v1589_v10 = vrot.slane %v5060_v49, 4  ;;  %s5473_s26 = sld [smem:[#allocation4 + $0x48]] }
 0x14b   :  { %1441 = vrot.lane.b32.xlu0 %v1437_v18, %s3650_s1  ;;  %v1591_v11 = vrot.slane %v1584_v53, 4  ;;  %v5080_v62 = vmul.f32 %v5068_v37, %v4027_v34  ;;  %v1562_v30 = vadd.f32 %v1558_v61, %v1546_v25  ;;  %v1602_v2 = vmul.f32 %v5068_v37, %v4039_v31  ;;  %s5485_s29 = sld [smem:[#allocation4 + $0x1e]] }
 0x14c   :  { %v5086_v40 = vmul.f32 %v5071_v28, %v4023_v36  ;;  %v1618_v48 = vmul.f32 %v5071_v28, %v4025_v35  ;;  %v1633_v14 = vstv %s5030_s3  ;;  %v5096_v1 = vstv %s5040_s11  ;;  %s5517_s3 = sld [smem:[#allocation4 + $0x4f]] }
 0x14d   :  { %v1592_v27 = vsel %vm221_vm6, %v1589_v10, %v1591_v11  ;;  %v1607_v3 = vrot.slane %v5080_v62, 5  ;;  %v1580_v63 = vadd.f32 %v1576_v58, %v1562_v30  ;;  %v1609_v44 = vrot.slane %v1602_v2, 5  ;;  %s5520_s11 = sld [smem:[#allocation4 + $0x25]] }
 0x14e   :  { %v1623_v8 = vrot.slane %v5086_v40, 5  ;;  %v1625_v12 = vrot.slane %v1618_v48, 5  ;;  %v5100_v46 = vmul.f32 %v1633_v14, %v4027_v34  ;;  %v1636_v16 = vmul.f32 %v1633_v14, %v4039_v31  ;;  %v5217_v40 = vld [vmem:[#allocation3 + $0x10] sm:$0x3f] }
 0x14f   :  { %v5105_v15 = vmul.f32 %v5096_v1, %v4023_v36  ;;  %v1652_v56 = vmul.f32 %v5096_v1, %v4025_v35  ;;  %v1596_v26 = vadd.f32 %v1592_v27, %v1580_v63  ;;  %v1610_v21 = vsel %vm256_vm7, %v1607_v3, %v1609_v44 }
 0x150   :  { %v1626_v43 = vsel %vm256_vm7, %v1623_v8, %v1625_v12  ;;  %v1452_v42 = vmul.f32 %v1451_v33, %v3971_v6  ;;  %v1641_v38 = vrot.slane %v5100_v46, 6  ;;  %v1643_v17 = vrot.slane %v1636_v16, 6 }
 0x151   :  { %v1657_v18 = vrot.slane %v5105_v15, 6  ;;  %v1659_v20 = vrot.slane %v1652_v56, 6  ;;  %v1614_v53 = vadd.f32 %v1610_v21, %v1596_v26  ;;  %v1457_v25 = vmul.f32 %v1456_v0, %v3969_v5 }
 0x152   :  { %v1464_v61 = vmul.f32 %v4959_v50, %v3971_v6  ;;  %v1480_v58 = vmul.f32 %v4962_v13, %v3969_v5  ;;  %v1644_v33 = vsel %vm291_vm8, %v1641_v38, %v1643_v17  ;;  %v1498_v30 = vmul.f32 %v4965_v55, %v3971_v6 }
 0x153   :  { %v1660_v11 = vsel %vm291_vm8, %v1657_v18, %v1659_v20  ;;  %v1514_v0 = vmul.f32 %v4989_v60, %v3969_v5  ;;  %v1630_v50 = vadd.f32 %v1626_v43, %v1614_v53  ;;  %v1459_v2 = vadd.f32 %v1457_v25, %v1452_v42  ;;  %v5186_v43 = vld [vmem:[#allocation3 + $0x8] sm:$0xff] }
 0x154   :  { %v1470_v48 = vrot.slane %v1464_v61, 1  ;;  %v1486_v13 = vrot.slane %v1480_v58, 1  ;;  %v1504_v27 = vrot.slane %v1498_v30, 2  ;;  %v1532_v44 = vmul.f32 %v5013_v54, %v3971_v6 }
 0x155   :  { %v1520_v63 = vrot.slane %v1514_v0, 2  ;;  %v1548_v12 = vmul.f32 %v5025_v52, %v3969_v5  ;;  %v1648_v55 = vadd.f32 %v1644_v33, %v1630_v50  ;;  %v1566_v56 = vmul.f32 %v5028_v45, %v3971_v6 }
 0x156   :  { %v1472_v60 = vsel %vm116_vm3, %v1470_v48, %v1471_v47  ;;  %v1488_v16 = vsel %vm116_vm3, %v1486_v13, %v1487_v51  ;;  %v1506_v52 = vsel %vm151_vm4, %v1504_v27, %v1505_v23  ;;  %v1538_v26 = vrot.slane %v1532_v44, 3 }
 0x157   :  { %v1477_v54 = vadd.f32 %v1472_v60, %v1459_v2  ;;  %v1522_v19 = vsel %vm151_vm4, %v1520_v63, %v1521_v59  ;;  %v1664_v22 = vadd.f32 %v1660_v11, %v1648_v55  ;;  %v1554_v47 = vrot.slane %v1548_v12, 3 }
 0x158   :  { %v1572_v51 = vrot.slane %v1566_v56, 4  ;;  %v1582_v45 = vmul.f32 %v5052_v4, %v3969_v5  ;;  %v1540_v41 = vsel %vm186_vm5, %v1538_v26, %v1539_v32  ;;  %v1600_v23 = vmul.f32 %v5068_v37, %v3971_v6  ;;  %v5184_v37 = vld [vmem:[#allocation2 + $0x8] sm:$0xff] }
 0x159   :  { %v1493_v21 = vadd.f32 %v1488_v16, %v1477_v54  ;;  %v1616_v9 = vmul.f32 %v5071_v28, %v3969_v5  ;;  %1669 = vrot.lane.b32.xlu1 %v1664_v22, %s3651_s14  ;;  %v1556_v59 = vsel %vm186_vm5, %v1554_v47, %v1555_v7  ;;  %v1634_v4 = vmul.f32 %v1633_v14, %v3971_v6  ;;  %v5190_v7 = vld [vmem:[#allocation2 + $0x10] sm:$0x3f] }
 0x15a   :  { %v1574_v57 = vsel %vm221_vm6, %v1572_v51, %v1573_v39  ;;  %v1588_v32 = vrot.slane %v1582_v45, 4  ;;  %v1606_v42 = vrot.slane %v1600_v23, 5  ;;  %v1650_v24 = vmul.f32 %v5096_v1, %v3969_v5 }
 0x15b   :  { %v1511_v28 = vadd.f32 %v1506_v52, %v1493_v21  ;;  %v1622_v17 = vrot.slane %v1616_v9, 5  ;;  %v1640_v39 = vrot.slane %v1634_v4, 6  ;;  %v1960_v14 = vstv %s5137_s7  ;;  %s5531_s7 = sld [smem:[#allocation4 + $0x56]] }
 0x15c   :  { %v1590_v29 = vsel %vm221_vm6, %v1588_v32, %v1589_v10  ;;  %v1965_v20 = vstv %s5139_s17  ;;  %v1608_v25 = vsel %vm256_vm7, %v1606_v42, %v1607_v3  ;;  %v1656_v61 = vrot.slane %v1650_v24, 6  ;;  %s5548_s17 = sld [smem:[#allocation4 + $0x2c]] }
 0x15d   :  { %v1527_v53 = vadd.f32 %v1522_v19, %v1511_v28  ;;  %v1624_v1 = vsel %vm256_vm7, %v1622_v17, %v1623_v8  ;;  %v1642_v49 = vsel %vm291_vm8, %v1640_v39, %v1641_v38  ;;  %v1962_v10 = vmul.f32 %v1960_v14, %v5184_v37 }
 0x15e   :  { %v1967_v62 = vmul.f32 %v1965_v20, %v5186_v43  ;;  %v5215_v3 = vstv %s5145_s15  ;;  %v1658_v8 = vsel %vm291_vm8, %v1656_v61, %v1657_v18  ;;  %v5231_v11 = vstv %s5155_s2  ;;  %s5555_s15 = sld [smem:[#allocation4 + $0x5d]] }
 0x15f   :  { %v1545_v58 = vadd.f32 %v1540_v41, %v1527_v53  ;;  %v5224_v46 = vmul.f32 %v5215_v3, %v5184_v37  ;;  %v1975_v38 = vmul.f32 %v5215_v3, %v5190_v7  ;;  %v5234_v30 = vstv %s5163_s4  ;;  %s5655_s2 = sld [smem:[#allocation4 + $0x34]] }
 0x160   :  { %v1969_v33 = vadd.f32 %v1967_v62, %v1962_v10  ;;  %v5237_v0 = vstv %s5167_s5  ;;  %v5244_v2 = vmul.f32 %v5231_v11, %v5186_v43  ;;  %v1991_v48 = vmul.f32 %v5231_v11, %v5217_v40  ;;  %s5669_s4 = sld [smem:[#allocation4 + $0xa]] }
 0x161   :  { %v1561_v15 = vadd.f32 %v1556_v59, %v1545_v58  ;;  %v1980_v18 = vrot.slane %v5224_v46, 1  ;;  %v1982_v50 = vrot.slane %v1975_v38, 1  ;;  %v5252_v13 = vmul.f32 %v5234_v30, %v5184_v37  ;;  %s5677_s5 = sld [smem:[#allocation4 + $0x3b]] }
 0x162   :  { %v2009_v27 = vmul.f32 %v5234_v30, %v5190_v7  ;;  %v5258_v63 = vmul.f32 %v5237_v0, %v5186_v43  ;;  %v1996_v55 = vrot.slane %v5244_v2, 1  ;;  %v2025_v60 = vmul.f32 %v5237_v0, %v5217_v40 }
 0x163   :  { %v1579_v44 = vadd.f32 %v1574_v57, %v1561_v15  ;;  %v1983_v12 = vsel %vm116_vm3, %v1980_v18, %v1982_v50  ;;  %v1998_v56 = vrot.slane %v1991_v48, 1  ;;  %v2014_v54 = vrot.slane %v5252_v13, 2 }
 0x164   :  { %v1987_v16 = vadd.f32 %v1983_v12, %v1969_v33  ;;  %v2016_v52 = vrot.slane %v2009_v27, 2  ;;  %v2030_v26 = vrot.slane %v5258_v63, 2  ;;  %v2032_v22 = vrot.slane %v2025_v60, 2 }
 0x165   :  { %v1595_v19 = vadd.f32 %v1590_v29, %v1579_v44  ;;  %v5271_v47 = vstv %s5203_s18  ;;  %v1999_v51 = vsel %vm116_vm3, %v1996_v55, %v1998_v56  ;;  %v5291_v57 = vstv %s5228_s0  ;;  %s5687_s18 = sld [smem:[#allocation4 + $0x11]] }
 0x166   :  { %v2017_v45 = vsel %vm151_vm4, %v2014_v54, %v2016_v52  ;;  %v5281_v21 = vmul.f32 %v5271_v47, %v5184_v37  ;;  %v2043_v41 = vmul.f32 %v5271_v47, %v5190_v7  ;;  %v2003_v9 = vadd.f32 %v1999_v51, %v1987_v16  ;;  %s5698_s0 = sld [smem:[#allocation4 + $0x42]] }
 0x167   :  { %v1613_v23 = vadd.f32 %v1608_v25, %v1595_v19  ;;  %v2033_v59 = vsel %vm151_vm4, %v2030_v26, %v2032_v22  ;;  %v5296_v28 = vmul.f32 %v5291_v57, %v5186_v43  ;;  %v2059_v42 = vmul.f32 %v5291_v57, %v5217_v40  ;;  %v5343_v19 = vld [vmem:[#allocation2] sm:$0xff] }
 0x168   :  { %v2048_v32 = vrot.slane %v5281_v21, 3  ;;  %v2050_v4 = vrot.slane %v2043_v41, 3  ;;  %v2021_v24 = vadd.f32 %v2017_v45, %v2003_v9  ;;  %v5303_v29 = vstv %s5239_s28  ;;  %s5700_s28 = sld [smem:[#allocation4 + $0x18]] }
 0x169   :  { %v1629_v17 = vadd.f32 %v1624_v1, %v1613_v23  ;;  %v5306_v39 = vstv %s5246_s30  ;;  %v2064_v25 = vrot.slane %v5296_v28, 3  ;;  %v2066_v61 = vrot.slane %v2059_v42, 3  ;;  %s5725_s30 = sld [smem:[#allocation4 + $0x49]] }
 0x16a   :  { %v2051_v53 = vsel %vm186_vm5, %v2048_v32, %v2050_v4  ;;  %v5314_v10 = vmul.f32 %v5303_v29, %v5184_v37  ;;  %v2037_v62 = vadd.f32 %v2033_v59, %v2021_v24  ;;  %v2077_v58 = vmul.f32 %v5303_v29, %v5190_v7  ;;  %v5362_v4 = vld [vmem:[#allocation3] sm:$0xff] }
 0x16b   :  { %v1647_v1 = vadd.f32 %v1642_v49, %v1629_v17  ;;  %v5322_v38 = vmul.f32 %v5306_v39, %v5186_v43  ;;  %v2067_v33 = vsel %vm186_vm5, %v2064_v25, %v2066_v61  ;;  %v2093_v50 = vmul.f32 %v5306_v39, %v5217_v40 }
 0x16c   :  { %v2082_v15 = vrot.slane %v5314_v10, 4  ;;  %v5331_v48 = vstv %s5267_s6  ;;  %v2055_v27 = vadd.f32 %v2051_v53, %v2037_v62  ;;  %v2084_v44 = vrot.slane %v2077_v58, 4  ;;  %s5745_s6 = sld [smem:[#allocation4 + $0x1f]] }
 0x16d   :  { %v1663_v49 = vadd.f32 %v1658_v8, %v1647_v1  ;;  %v2098_v12 = vrot.slane %v5322_v38, 4  ;;  %v2100_v60 = vrot.slane %v2093_v50, 4  ;;  %v5336_v16 = vmul.f32 %v5331_v48, %v5184_v37 }
 0x16e   :  { %v2111_v56 = vmul.f32 %v5331_v48, %v5190_v7  ;;  %v5341_v52 = vstv %s5285_s23  ;;  %v2071_v8 = vadd.f32 %v2067_v33, %v2055_v27  ;;  %v2085_v22 = vsel %vm221_vm6, %v2082_v15, %v2084_v44  ;;  %s5751_s23 = sld [smem:[#allocation4 + $0x50]] }
 0x16f   :  { %1667 = vrot.lane.b32.xlu0 %v1663_v49, %s3651_s14  ;;  %v5351_v51 = vmul.f32 %v5341_v52, %v5186_v43  ;;  %v2127_v45 = vmul.f32 %v5341_v52, %v5217_v40  ;;  %v2101_v41 = vsel %vm221_vm6, %v2098_v12, %v2100_v60  ;;  %v2116_v23 = vrot.slane %v5336_v16, 5 }
 0x170   :  { %v2118_v9 = vrot.slane %v2111_v56, 5  ;;  %v5360_v59 = vstv %s5300_s27  ;;  %v2089_v42 = vadd.f32 %v2085_v22, %v2071_v8  ;;  %v2158_v62 = vstv %s5316_s8  ;;  %s5773_s27 = sld [smem:[#allocation4 + $0x26]] }
 0x171   :  { %v2132_v17 = vrot.slane %v5351_v51, 5  ;;  %v2134_v24 = vrot.slane %v2127_v45, 5  ;;  %v5367_v53 = vmul.f32 %v5360_v59, %v5184_v37  ;;  %v2145_v1 = vmul.f32 %v5360_v59, %v5190_v7  ;;  %s5785_s8 = sld [smem:[#allocation4 + $0x2d]] }
 0x172   :  { %v2119_v61 = vsel %vm256_vm7, %v2116_v23, %v2118_v9  ;;  %v1961_v58 = vmul.f32 %v1960_v14, %v5343_v19  ;;  %v2105_v33 = vadd.f32 %v2101_v41, %v2089_v42  ;;  %v5383_v27 = vmul.f32 %v2158_v62, %v5186_v43 }
 0x173   :  { %v2135_v50 = vsel %vm256_vm7, %v2132_v17, %v2134_v24  ;;  %v2150_v49 = vrot.slane %v5367_v53, 6  ;;  %v2152_v44 = vrot.slane %v2145_v1, 6  ;;  %v2161_v60 = vmul.f32 %v2158_v62, %v5217_v40 }
 0x174   :  { %v1966_v56 = vmul.f32 %v1965_v20, %v5362_v4  ;;  %v1973_v8 = vmul.f32 %v5215_v3, %v5343_v19  ;;  %v2123_v14 = vadd.f32 %v2119_v61, %v2105_v33  ;;  %v2166_v22 = vrot.slane %v5383_v27, 6 }
 0x175   :  { %v1989_v45 = vmul.f32 %v5231_v11, %v5362_v4  ;;  %v2007_v41 = vmul.f32 %v5234_v30, %v5343_v19  ;;  %v2153_v9 = vsel %vm291_vm8, %v2150_v49, %v2152_v44  ;;  %v2168_v42 = vrot.slane %v2161_v60, 6 }
 0x176   :  { %v1968_v24 = vadd.f32 %v1966_v56, %v1961_v58  ;;  %v1979_v1 = vrot.slane %v1973_v8, 1  ;;  %v2139_v20 = vadd.f32 %v2135_v50, %v2123_v14  ;;  %v2023_v33 = vmul.f32 %v5237_v0, %v5362_v4 }
 0x177   :  { %v1995_v3 = vrot.slane %v1989_v45, 1  ;;  %v2013_v61 = vrot.slane %v2007_v41, 2  ;;  %v2169_v11 = vsel %vm291_vm8, %v2166_v22, %v2168_v42  ;;  %v2041_v27 = vmul.f32 %v5271_v47, %v5343_v19 }
 0x178   :  { %v1981_v30 = vsel %vm116_vm3, %v1979_v1, %v1980_v18  ;;  %v2057_v58 = vmul.f32 %v5291_v57, %v5362_v4  ;;  %v2157_v50 = vadd.f32 %v2153_v9, %v2139_v20  ;;  %v2029_v18 = vrot.slane %v2023_v33, 2 }
 0x179   :  { %v1986_v44 = vadd.f32 %v1981_v30, %v1968_v24  ;;  %v1997_v0 = vsel %vm116_vm3, %v1995_v3, %v1996_v55  ;;  %v2015_v46 = vsel %vm151_vm4, %v2013_v61, %v2014_v54  ;;  %v2047_v60 = vrot.slane %v2041_v27, 3 }
 0x17a   :  { %v2063_v47 = vrot.slane %v2057_v58, 3  ;;  %v2075_v57 = vmul.f32 %v5303_v29, %v5343_v19  ;;  %v2173_v56 = vadd.f32 %v2169_v11, %v2157_v50  ;;  %v2091_v2 = vmul.f32 %v5306_v39, %v5362_v4 }
 0x17b   :  { %v2002_v8 = vadd.f32 %v1997_v0, %v1986_v44  ;;  %v2109_v13 = vmul.f32 %v5331_v48, %v5343_v19  ;;  %v2031_v55 = vsel %vm151_vm4, %v2029_v18, %v2030_v26  ;;  %v2049_v54 = vsel %vm186_vm5, %v2047_v60, %v2048_v32 }
 0x17c   :  { %v2065_v29 = vsel %vm186_vm5, %v2063_v47, %v2064_v25  ;;  %v2081_v14 = vrot.slane %v2075_v57, 4  ;;  %2178 = vrot.lane.b32.xlu1 %v2173_v56, %s3646_s10  ;;  %v2097_v48 = vrot.slane %v2091_v2, 4  ;;  %v2125_v63 = vmul.f32 %v5341_v52, %v5362_v4 }
 0x17d   :  { %v2020_v39 = vadd.f32 %v2015_v46, %v2002_v8  ;;  %v2115_v45 = vrot.slane %v2109_v13, 5  ;;  %v2143_v21 = vmul.f32 %v5360_v59, %v5343_v19  ;;  %v2159_v32 = vmul.f32 %v2158_v62, %v5362_v4 }
 0x17e   :  { %v2083_v26 = vsel %vm221_vm6, %v2081_v14, %v2082_v15  ;;  %v2186_v28 = vstv %s5399_s9  ;;  %v2099_v41 = vsel %vm221_vm6, %v2097_v48, %v2098_v12  ;;  %v2131_v10 = vrot.slane %v2125_v63, 5  ;;  %s5795_s9 = sld [smem:[#allocation4 + $0x57]] }
 0x17f   :  { %v2036_v25 = vadd.f32 %v2031_v55, %v2020_v39  ;;  %v2117_v52 = vsel %vm256_vm7, %v2115_v45, %v2116_v23  ;;  %v2149_v9 = vrot.slane %v2143_v21, 6  ;;  %v2165_v42 = vrot.slane %v2159_v32, 6 }
 0x180   :  { %v2188_v15 = vmul.f32 %v2186_v28, %v5184_v37  ;;  %v2191_v59 = vstv %s5411_s20  ;;  %v2133_v38 = vsel %vm256_vm7, %v2131_v10, %v2132_v17  ;;  %v5471_v16 = vstv %s5419_s21  ;;  %s5799_s20 = sld [smem:[#allocation4 + $0x5e]] }
 0x181   :  { %v2054_v62 = vadd.f32 %v2049_v54, %v2036_v25  ;;  %v2193_v12 = vmul.f32 %v2191_v59, %v5186_v43  ;;  %v2151_v23 = vsel %vm291_vm8, %v2149_v9, %v2150_v49  ;;  %v2167_v24 = vsel %vm291_vm8, %v2165_v42, %v2166_v22  ;;  %s5904_s21 = sld [smem:[#allocation4 + $0x35]] }
 0x182   :  { %v5481_v1 = vmul.f32 %v5471_v16, %v5184_v37  ;;  %v2201_v51 = vmul.f32 %v5471_v16, %v5190_v7  ;;  %v5488_v3 = vstv %s5423_s22  ;;  %v5491_v61 = vstv %s5429_s24  ;;  %s5908_s22 = sld [smem:[#allocation4 + $0xb]] }
 0x183   :  { %v2070_v17 = vadd.f32 %v2065_v29, %v2054_v62  ;;  %v2195_v20 = vadd.f32 %v2193_v12, %v2188_v15  ;;  %v5496_v22 = vmul.f32 %v5488_v3, %v5186_v43  ;;  %v2217_v33 = vmul.f32 %v5488_v3, %v5217_v40  ;;  %s5915_s24 = sld [smem:[#allocation4 + $0x3c]] }
 0x184   :  { %v2206_v53 = vrot.slane %v5481_v1, 1  ;;  %v2208_v49 = vrot.slane %v2201_v51, 1  ;;  %v5502_v30 = vmul.f32 %v5491_v61, %v5184_v37  ;;  %v2235_v27 = vmul.f32 %v5491_v61, %v5190_v7 }
 0x185   :  { %v2088_v11 = vadd.f32 %v2083_v26, %v2070_v17  ;;  %v5507_v58 = vstv %s5443_s25  ;;  %v2222_v44 = vrot.slane %v5496_v22, 1  ;;  %v2224_v0 = vrot.slane %v2217_v33, 1  ;;  %s5923_s25 = sld [smem:[#allocation4 + $0x12]] }
 0x186   :  { %v2209_v50 = vsel %vm116_vm3, %v2206_v53, %v2208_v49  ;;  %v5515_v46 = vmul.f32 %v5507_v58, %v5186_v43  ;;  %v2240_v47 = vrot.slane %v5502_v30, 2  ;;  %v2242_v57 = vrot.slane %v2235_v27, 2 }
 0x187   :  { %v2104_v18 = vadd.f32 %v2099_v41, %v2088_v11  ;;  %v2213_v60 = vadd.f32 %v2209_v50, %v2195_v20  ;;  %v2225_v56 = vsel %vm116_vm3, %v2222_v44, %v2224_v0  ;;  %v2251_v8 = vmul.f32 %v5507_v58, %v5217_v40 }
 0x188   :  { %v2256_v2 = vrot.slane %v5515_v46, 2  ;;  %v5529_v13 = vstv %s5462_s19  ;;  %v2243_v29 = vsel %vm151_vm4, %v2240_v47, %v2242_v57  ;;  %v5543_v45 = vstv %s5473_s26  ;;  %s5946_s19 = sld [smem:[#allocation4 + $0x43]] }
 0x189   :  { %v2122_v55 = vadd.f32 %v2117_v52, %v2104_v18  ;;  %v2229_v54 = vadd.f32 %v2225_v56, %v2213_v60  ;;  %v5538_v14 = vmul.f32 %v5529_v13, %v5184_v37  ;;  %v2258_v39 = vrot.slane %v2251_v8, 2  ;;  %s5950_s26 = sld [smem:[#allocation4 + $0x19]] }
 0x18a   :  { %v2269_v48 = vmul.f32 %v5529_v13, %v5190_v7  ;;  %v5546_v63 = vstv %s5485_s29  ;;  %v5553_v25 = vmul.f32 %v5543_v45, %v5186_v43  ;;  %v2285_v10 = vmul.f32 %v5543_v45, %v5217_v40  ;;  %s5975_s29 = sld [smem:[#allocation4 + $0x4a]] }
 0x18b   :  { %v2138_v26 = vadd.f32 %v2133_v38, %v2122_v55  ;;  %v2247_v21 = vadd.f32 %v2243_v29, %v2229_v54  ;;  %v2274_v32 = vrot.slane %v5538_v14, 3  ;;  %v2259_v41 = vsel %vm151_vm4, %v2256_v2, %v2258_v39 }
 0x18c   :  { %v2276_v52 = vrot.slane %v2269_v48, 3  ;;  %v5564_v9 = vmul.f32 %v5546_v63, %v5184_v37  ;;  %v2290_v62 = vrot.slane %v5553_v25, 3  ;;  %v2303_v38 = vmul.f32 %v5546_v63, %v5190_v7 }
 0x18d   :  { %v2156_v42 = vadd.f32 %v2151_v23, %v2138_v26  ;;  %v2263_v15 = vadd.f32 %v2259_v41, %v2247_v21  ;;  %v2292_v51 = vrot.slane %v2285_v10, 3  ;;  %v5574_v20 = vstv %s5517_s3  ;;  %s5986_s3 = sld [smem:[#allocation4 + $0x20]] }
 0x18e   :  { %v2277_v12 = vsel %vm186_vm5, %v2274_v32, %v2276_v52  ;;  %v2308_v17 = vrot.slane %v5564_v9, 4  ;;  %v2310_v11 = vrot.slane %v2303_v38, 4  ;;  %v5578_v23 = vmul.f32 %v5574_v20, %v5186_v43 }
 0x18f   :  { %v2172_v49 = vadd.f32 %v2167_v24, %v2156_v42  ;;  %v2281_v33 = vadd.f32 %v2277_v12, %v2263_v15  ;;  %v2293_v27 = vsel %vm186_vm5, %v2290_v62, %v2292_v51  ;;  %v2319_v50 = vmul.f32 %v5574_v20, %v5217_v40 }
 0x190   :  { %v5586_v0 = vstv %s5520_s11  ;;  %v5589_v18 = vstv %s5531_s7  ;;  %v2311_v60 = vsel %vm221_vm6, %v2308_v17, %v2310_v11  ;;  %v2324_v57 = vrot.slane %v5578_v23, 4  ;;  %s6011_s11 = sld [smem:[#allocation4 + $0x51]] }
 0x191   :  { %2176 = vrot.lane.b32.xlu0 %v2172_v49, %s3646_s10  ;;  %v2297_v24 = vadd.f32 %v2293_v27, %v2281_v33  ;;  %v5598_v56 = vmul.f32 %v5586_v0, %v5184_v37  ;;  %v2326_v8 = vrot.slane %v2319_v50, 4  ;;  %v2337_v55 = vmul.f32 %v5586_v0, %v5190_v7  ;;  %s5650_s10 = sld [smem:[#allocation4 + $0x3]] }
 0x192   :  { %v5604_v54 = vmul.f32 %v5589_v18, %v5186_v43  ;;  %v2353_v29 = vmul.f32 %v5589_v18, %v5217_v40  ;;  %v2368_v26 = vstv %s5548_s17  ;;  %v5611_v21 = vstv %s5555_s15  ;;  %s6028_s7 = sld [smem:[#allocation4 + $0x27]] }
 0x193   :  { %v2315_v39 = vadd.f32 %v2311_v60, %v2297_v24  ;;  %v2342_v48 = vrot.slane %v5598_v56, 5  ;;  %v2327_v41 = vsel %vm221_vm6, %v2324_v57, %v2326_v8  ;;  %v2344_v52 = vrot.slane %v2337_v55, 5  ;;  %s6047_s17 = sld [smem:[#allocation4 + $0x2e]] }
 0x194   :  { %v2358_v10 = vrot.slane %v5604_v54, 5  ;;  %v2360_v42 = vrot.slane %v2353_v29, 5  ;;  %v5618_v38 = vmul.f32 %v2368_v26, %v5184_v37  ;;  %v2371_v12 = vmul.f32 %v2368_v26, %v5190_v7  ;;  %s6055_s15 = sld [smem:[#allocation4 + $0x58]] }
 0x195   :  { %v2331_v15 = vadd.f32 %v2327_v41, %v2315_v39  ;;  %v5623_v51 = vmul.f32 %v5611_v21, %v5186_v43  ;;  %v2345_v49 = vsel %vm256_vm7, %v2342_v48, %v2344_v52  ;;  %v2387_v11 = vmul.f32 %v5611_v21, %v5217_v40 }
 0x196   :  { %v2361_v33 = vsel %vm256_vm7, %v2358_v10, %v2360_v42  ;;  %v2187_v27 = vmul.f32 %v2186_v28, %v5343_v19  ;;  %v2376_v24 = vrot.slane %v5618_v38, 6  ;;  %v2378_v60 = vrot.slane %v2371_v12, 6 }
 0x197   :  { %v2349_v50 = vadd.f32 %v2345_v49, %v2331_v15  ;;  %v2392_v8 = vrot.slane %v5623_v51, 6  ;;  %v2394_v55 = vrot.slane %v2387_v11, 6  ;;  %v2192_v29 = vmul.f32 %v2191_v59, %v5362_v4 }
 0x198   :  { %v2199_v39 = vmul.f32 %v5471_v16, %v5343_v19  ;;  %v2215_v41 = vmul.f32 %v5488_v3, %v5362_v4  ;;  %v2379_v42 = vsel %vm291_vm8, %v2376_v24, %v2378_v60  ;;  %v2233_v28 = vmul.f32 %v5491_v61, %v5343_v19 }
 0x199   :  { %v2365_v52 = vadd.f32 %v2361_v33, %v2349_v50  ;;  %v2249_v15 = vmul.f32 %v5507_v58, %v5362_v4  ;;  %v2395_v59 = vsel %vm291_vm8, %v2392_v8, %v2394_v55  ;;  %v2194_v38 = vadd.f32 %v2192_v29, %v2187_v27 }
 0x19a   :  { %v2205_v16 = vrot.slane %v2199_v39, 1  ;;  %v2221_v12 = vrot.slane %v2215_v41, 1  ;;  %v2239_v49 = vrot.slane %v2233_v28, 2  ;;  %v2267_v61 = vmul.f32 %v5529_v13, %v5343_v19 }
 0x19b   :  { %v2383_v3 = vadd.f32 %v2379_v42, %v2365_v52  ;;  %v2255_v33 = vrot.slane %v2249_v15, 2  ;;  %v2283_v27 = vmul.f32 %v5543_v45, %v5362_v4  ;;  %v2301_v50 = vmul.f32 %v5546_v63, %v5343_v19 }
 0x19c   :  { %v2207_v58 = vsel %vm116_vm3, %v2205_v16, %v2206_v53  ;;  %v2223_v11 = vsel %vm116_vm3, %v2221_v12, %v2222_v44  ;;  %v2241_v1 = vsel %vm151_vm4, %v2239_v49, %v2240_v47  ;;  %v2273_v22 = vrot.slane %v2267_v61, 3 }
 0x19d   :  { %v2399_v60 = vadd.f32 %v2395_v59, %v2383_v3  ;;  %v2212_v55 = vadd.f32 %v2207_v58, %v2194_v38  ;;  %v2257_v53 = vsel %vm151_vm4, %v2255_v33, %v2256_v2  ;;  %v2289_v44 = vrot.slane %v2283_v27, 3 }
 0x19e   :  { %v2307_v13 = vrot.slane %v2301_v50, 4  ;;  %v2317_v45 = vmul.f32 %v5574_v20, %v5362_v4  ;;  %v2335_v30 = vmul.f32 %v5586_v0, %v5343_v19  ;;  %v2351_v46 = vmul.f32 %v5589_v18, %v5362_v4 }
 0x19f   :  { %2404 = vrot.lane.b32.xlu1 %v2399_v60, %s3647_s12  ;;  %v2228_v63 = vadd.f32 %v2223_v11, %v2212_v55  ;;  %v2369_v47 = vmul.f32 %v2368_v26, %v5343_v19  ;;  %v2275_v2 = vsel %vm186_vm5, %v2273_v22, %v2274_v32  ;;  %v2291_v20 = vsel %vm186_vm5, %v2289_v44, %v2290_v62 }
 0x1a0   :  { %v2309_v0 = vsel %vm221_vm6, %v2307_v13, %v2308_v17  ;;  %v2323_v29 = vrot.slane %v2317_v45, 4  ;;  %v2341_v26 = vrot.slane %v2335_v30, 5  ;;  %v2357_v39 = vrot.slane %v2351_v46, 5 }
 0x1a1   :  { %v2246_v18 = vadd.f32 %v2241_v1, %v2228_v63  ;;  %v2375_v14 = vrot.slane %v2369_v47, 6  ;;  %v2385_v25 = vmul.f32 %v5611_v21, %v5362_v4  ;;  %v2412_v9 = vstv %s5650_s10  ;;  %s6073_s10 = sld [smem:[#allocation4 + $0x5f]] }
 0x1a2   :  { %v2325_v32 = vsel %vm221_vm6, %v2323_v29, %v2324_v57  ;;  %v2417_v62 = vstv %s5655_s2  ;;  %v2343_v41 = vsel %vm256_vm7, %v2341_v26, %v2342_v48  ;;  %v2359_v52 = vsel %vm256_vm7, %v2357_v39, %v2358_v10  ;;  %s6166_s2 = sld [smem:[#allocation4 + $0x36]] }
 0x1a3   :  { %v2262_v17 = vadd.f32 %v2257_v53, %v2246_v18  ;;  %v2377_v42 = vsel %vm291_vm8, %v2375_v14, %v2376_v24  ;;  %v2391_v23 = vrot.slane %v2385_v25, 6  ;;  %v2414_v57 = vmul.f32 %v2412_v9, %v5184_v37 }
 0x1a4   :  { %v2419_v21 = vmul.f32 %v2417_v62, %v5186_v43  ;;  %v5723_v28 = vstv %s5669_s4  ;;  %v5734_v10 = vstv %s5677_s5  ;;  %v5749_v49 = vstv %s5687_s18  ;;  %s6170_s4 = sld [smem:[#allocation4 + $0xc]] }
 0x1a5   :  { %v2280_v56 = vadd.f32 %v2275_v2, %v2262_v17  ;;  %v5729_v54 = vmul.f32 %v5723_v28, %v5184_v37  ;;  %v2427_v48 = vmul.f32 %v5723_v28, %v5190_v7  ;;  %v2393_v24 = vsel %vm291_vm8, %v2391_v23, %v2392_v8  ;;  %s6179_s5 = sld [smem:[#allocation4 + $0x3d]] }
 0x1a6   :  { %v2421_v15 = vadd.f32 %v2419_v21, %v2414_v57  ;;  %v5741_v59 = vmul.f32 %v5734_v10, %v5186_v43  ;;  %v2443_v38 = vmul.f32 %v5734_v10, %v5217_v40  ;;  %v5756_v33 = vmul.f32 %v5749_v49, %v5184_v37  ;;  %s6190_s18 = sld [smem:[#allocation4 + $0x13]] }
 0x1a7   :  { %v2296_v16 = vadd.f32 %v2291_v20, %v2280_v56  ;;  %v2432_v12 = vrot.slane %v5729_v54, 1  ;;  %v2434_v3 = vrot.slane %v2427_v48, 1  ;;  %v2461_v61 = vmul.f32 %v5749_v49, %v5190_v7 }
 0x1a8   :  { %v2448_v51 = vrot.slane %v5741_v59, 1  ;;  %v2450_v8 = vrot.slane %v2443_v38, 1  ;;  %v5764_v27 = vstv %s5698_s0  ;;  %v5767_v50 = vstv %s5700_s28  ;;  %s6212_s0 = sld [smem:[#allocation4 + $0x44]] }
 0x1a9   :  { %v2314_v58 = vadd.f32 %v2309_v0, %v2296_v16  ;;  %v2435_v11 = vsel %vm116_vm3, %v2432_v12, %v2434_v3  ;;  %v2466_v1 = vrot.slane %v5756_v33, 2  ;;  %v2468_v53 = vrot.slane %v2461_v61, 2  ;;  %s6216_s28 = sld [smem:[#allocation4 + $0x1a]] }
 0x1aa   :  { %v2439_v60 = vadd.f32 %v2435_v11, %v2421_v15  ;;  %v2451_v55 = vsel %vm116_vm3, %v2448_v51, %v2450_v8  ;;  %v5777_v44 = vmul.f32 %v5764_v27, %v5186_v43  ;;  %v2477_v13 = vmul.f32 %v5764_v27, %v5217_v40 }
 0x1ab   :  { %v2330_v22 = vadd.f32 %v2325_v32, %v2314_v58  ;;  %v5783_v45 = vmul.f32 %v5767_v50, %v5184_v37  ;;  %v2469_v30 = vsel %vm151_vm4, %v2466_v1, %v2468_v53  ;;  %v2495_v46 = vmul.f32 %v5767_v50, %v5190_v7 }
 0x1ac   :  { %v2455_v63 = vadd.f32 %v2451_v55, %v2439_v60  ;;  %v5793_v47 = vstv %s5725_s30  ;;  %v2482_v20 = vrot.slane %v5777_v44, 2  ;;  %v2484_v0 = vrot.slane %v2477_v13, 2  ;;  %s6241_s30 = sld [smem:[#allocation4 + $0x4b]] }
 0x1ad   :  { %v2348_v2 = vadd.f32 %v2343_v41, %v2330_v22  ;;  %v2500_v29 = vrot.slane %v5783_v45, 3  ;;  %v2502_v26 = vrot.slane %v2495_v46, 3  ;;  %v5803_v39 = vmul.f32 %v5793_v47, %v5186_v43 }
 0x1ae   :  { %v2473_v18 = vadd.f32 %v2469_v30, %v2455_v63  ;;  %v2511_v14 = vmul.f32 %v5793_v47, %v5217_v40  ;;  %v2485_v25 = vsel %vm151_vm4, %v2482_v20, %v2484_v0  ;;  %v5811_v17 = vstv %s5745_s6  ;;  %s6252_s6 = sld [smem:[#allocation4 + $0x21]] }
 0x1af   :  { %v2364_v32 = vadd.f32 %v2359_v52, %v2348_v2  ;;  %v5814_v41 = vstv %s5751_s23  ;;  %v2503_v57 = vsel %vm186_vm5, %v2500_v29, %v2502_v26  ;;  %v2516_v21 = vrot.slane %v5803_v39, 3  ;;  %s6277_s23 = sld [smem:[#allocation4 + $0x52]] }
 0x1b0   :  { %v2489_v23 = vadd.f32 %v2485_v25, %v2473_v18  ;;  %v2518_v56 = vrot.slane %v2511_v14, 3  ;;  %v5822_v52 = vmul.f32 %v5811_v17, %v5184_v37  ;;  %v2529_v15 = vmul.f32 %v5811_v17, %v5190_v7 }
 0x1b1   :  { %v2382_v48 = vadd.f32 %v2377_v42, %v2364_v32  ;;  %v5828_v38 = vmul.f32 %v5814_v41, %v5186_v43  ;;  %v2545_v42 = vmul.f32 %v5814_v41, %v5217_v40  ;;  %v5836_v8 = vstv %s5773_s27  ;;  %s6292_s27 = sld [smem:[#allocation4 + $0x28]] }
 0x1b2   :  { %v2507_v16 = vadd.f32 %v2503_v57, %v2489_v23  ;;  %v2519_v3 = vsel %vm186_vm5, %v2516_v21, %v2518_v56  ;;  %v2534_v58 = vrot.slane %v5822_v52, 4  ;;  %v2536_v11 = vrot.slane %v2529_v15, 4 }
 0x1b3   :  { %v2398_v61 = vadd.f32 %v2393_v24, %v2382_v48  ;;  %v2550_v60 = vrot.slane %v5828_v38, 4  ;;  %v2552_v53 = vrot.slane %v2545_v42, 4  ;;  %v5842_v22 = vmul.f32 %v5836_v8, %v5184_v37 }
 0x1b4   :  { %v2523_v55 = vadd.f32 %v2519_v3, %v2507_v16  ;;  %v2563_v13 = vmul.f32 %v5836_v8, %v5190_v7  ;;  %v2537_v24 = vsel %vm221_vm6, %v2534_v58, %v2536_v11  ;;  %v2576_v63 = vstv %s5795_s9  ;;  %s6315_s9 = sld [smem:[#allocation4 + $0x59]] }
 0x1b5   :  { %2402 = vrot.lane.b32.xlu0 %v2398_v61, %s3647_s12  ;;  %v5852_v30 = vstv %s5785_s8  ;;  %v2610_v46 = vstv %s5799_s20  ;;  %v2553_v0 = vsel %vm221_vm6, %v2550_v60, %v2552_v53  ;;  %v2568_v18 = vrot.slane %v5842_v22, 5  ;;  %s5898_s12 = sld [smem:[#allocation4 + $0x4]] }
 0x1b6   :  { %v2541_v2 = vadd.f32 %v2537_v24, %v2523_v55  ;;  %v2570_v26 = vrot.slane %v2563_v13, 5  ;;  %v5860_v14 = vmul.f32 %v2576_v63, %v5186_v43  ;;  %v2579_v32 = vmul.f32 %v2576_v63, %v5217_v40  ;;  %s6307_s8 = sld [smem:[#allocation4 + $0x2f]] }
 0x1b7   :  { %v5865_v25 = vmul.f32 %v5852_v30, %v5184_v37  ;;  %v2597_v23 = vmul.f32 %v5852_v30, %v5190_v7  ;;  %v5873_v48 = vmul.f32 %v2610_v46, %v5186_v43  ;;  %v2613_v15 = vmul.f32 %v2610_v46, %v5217_v40  ;;  %s6331_s20 = sld [smem:[#allocation4 + $0x60]] }
 0x1b8   :  { %v2557_v57 = vadd.f32 %v2553_v0, %v2541_v2  ;;  %v2571_v56 = vsel %vm256_vm7, %v2568_v18, %v2570_v26  ;;  %v2584_v16 = vrot.slane %v5860_v14, 5  ;;  %v2586_v3 = vrot.slane %v2579_v32, 5 }
 0x1b9   :  { %v2602_v42 = vrot.slane %v5865_v25, 6  ;;  %v2604_v61 = vrot.slane %v2597_v23, 6  ;;  %v2618_v55 = vrot.slane %v5873_v48, 6  ;;  %v2620_v53 = vrot.slane %v2613_v15, 6 }
 0x1ba   :  { %v2575_v11 = vadd.f32 %v2571_v56, %v2557_v57  ;;  %v2413_v13 = vmul.f32 %v2412_v9, %v5343_v19  ;;  %v2587_v24 = vsel %vm256_vm7, %v2584_v16, %v2586_v3  ;;  %v2418_v0 = vmul.f32 %v2417_v62, %v5362_v4 }
 0x1bb   :  { %v2605_v2 = vsel %vm291_vm8, %v2602_v42, %v2604_v61  ;;  %v2425_v26 = vmul.f32 %v5723_v28, %v5343_v19  ;;  %v2621_v23 = vsel %vm291_vm8, %v2618_v55, %v2620_v53  ;;  %v2441_v9 = vmul.f32 %v5734_v10, %v5362_v4 }
 0x1bc   :  { %v2591_v32 = vadd.f32 %v2587_v24, %v2575_v11  ;;  %v2459_v57 = vmul.f32 %v5749_v49, %v5343_v19  ;;  %v2420_v56 = vadd.f32 %v2418_v0, %v2413_v13  ;;  %v2475_v15 = vmul.f32 %v5764_v27, %v5362_v4 }
 0x1bd   :  { %v2431_v48 = vrot.slane %v2425_v26, 1  ;;  %v2493_v62 = vmul.f32 %v5767_v50, %v5343_v19  ;;  %v2447_v3 = vrot.slane %v2441_v9, 1  ;;  %v2509_v10 = vmul.f32 %v5793_v47, %v5362_v4 }
 0x1be   :  { %v2609_v28 = vadd.f32 %v2605_v2, %v2591_v32  ;;  %v2465_v61 = vrot.slane %v2459_v57, 2  ;;  %v2481_v11 = vrot.slane %v2475_v15, 2  ;;  %v2527_v27 = vmul.f32 %v5811_v17, %v5343_v19 }
 0x1bf   :  { %v2433_v49 = vsel %vm116_vm3, %v2431_v48, %v2432_v12  ;;  %v2499_v53 = vrot.slane %v2493_v62, 3  ;;  %v2449_v24 = vsel %vm116_vm3, %v2447_v3, %v2448_v51  ;;  %v2515_v17 = vrot.slane %v2509_v10, 3 }
 0x1c0   :  { %v2625_v50 = vadd.f32 %v2621_v23, %v2609_v28  ;;  %v2438_v13 = vadd.f32 %v2433_v49, %v2420_v56  ;;  %v2467_v47 = vsel %vm151_vm4, %v2465_v61, %v2466_v1  ;;  %v2483_v54 = vsel %vm151_vm4, %v2481_v11, %v2482_v20 }
 0x1c1   :  { %v2501_v12 = vsel %vm186_vm5, %v2499_v53, %v2500_v29  ;;  %v2533_v2 = vrot.slane %v2527_v27, 4  ;;  %v2543_v51 = vmul.f32 %v5814_v41, %v5362_v4  ;;  %v2561_v33 = vmul.f32 %v5836_v8, %v5343_v19  ;;  %v6017_v27 = vld [vmem:[#allocation3 + $0x8] sm:$0xff] }
 0x1c2   :  { %2630 = vrot.lane.b32.xlu1 %v2625_v50, %s3648_s16  ;;  %v2454_v59 = vadd.f32 %v2449_v24, %v2438_v13  ;;  %v2577_v1 = vmul.f32 %v2576_v63, %v5362_v4  ;;  %v2517_v44 = vsel %vm186_vm5, %v2515_v17, %v2516_v21  ;;  %v2595_v20 = vmul.f32 %v5852_v30, %v5343_v19 }
 0x1c3   :  { %v2535_v45 = vsel %vm221_vm6, %v2533_v2, %v2534_v58  ;;  %v2611_v29 = vmul.f32 %v2610_v46, %v5362_v4  ;;  %v2549_v8 = vrot.slane %v2543_v51, 4  ;;  %v2567_v63 = vrot.slane %v2561_v33, 5  ;;  %v6043_v51 = vld [vmem:[#allocation2 + $0x10] sm:$0x3f] }
 0x1c4   :  { %v2472_v41 = vadd.f32 %v2467_v47, %v2454_v59  ;;  %v2583_v0 = vrot.slane %v2577_v1, 5  ;;  %v2601_v39 = vrot.slane %v2595_v20, 6  ;;  %v2638_v52 = vstv %s5898_s12  ;;  %s6417_s12 = sld [smem:[#allocation4 + $0x37]] }
 0x1c5   :  { %v2617_v21 = vrot.slane %v2611_v29, 6  ;;  %v2643_v58 = vstv %s5904_s21  ;;  %v2551_v46 = vsel %vm221_vm6, %v2549_v8, %v2550_v60  ;;  %v2569_v26 = vsel %vm256_vm7, %v2567_v63, %v2568_v18  ;;  %s6421_s21 = sld [smem:[#allocation4 + $0xd]] }
 0x1c6   :  { %v2488_v30 = vadd.f32 %v2483_v54, %v2472_v41  ;;  %v2585_v32 = vsel %vm256_vm7, %v2583_v0, %v2584_v16  ;;  %v5964_v23 = vsel %vm291_vm8, %v2601_v39, %v2602_v42  ;;  %v2640_v38 = vmul.f32 %v2638_v52, %v5184_v37 }
 0x1c7   :  { %v5967_v9 = vsel %vm291_vm8, %v2617_v21, %v2618_v55  ;;  %v2645_v60 = vmul.f32 %v2643_v58, %v5186_v43  ;;  %v5978_v18 = vstv %s5908_s22  ;;  %v5981_v14 = vstv %s5915_s24  ;;  %v6065_v21 = vld [vmem:[#allocation3 + $0x10] sm:$0x3f]  ;;  %s6428_s22 = sld [smem:[#allocation4 + $0x3e]] }
 0x1c8   :  { %v2506_v22 = vadd.f32 %v2501_v12, %v2488_v30  ;;  %v5984_v25 = vstv %s5923_s25  ;;  %v5990_v42 = vmul.f32 %v5978_v18, %v5184_v37  ;;  %v2653_v55 = vmul.f32 %v5978_v18, %v5190_v7  ;;  %s6439_s24 = sld [smem:[#allocation4 + $0x14]] }
 0x1c9   :  { %v2647_v16 = vadd.f32 %v2645_v60, %v2640_v38  ;;  %v5996_v57 = vmul.f32 %v5981_v14, %v5186_v43  ;;  %v2669_v48 = vmul.f32 %v5981_v14, %v5217_v40  ;;  %v6002_v15 = vmul.f32 %v5984_v25, %v5184_v37  ;;  %s6458_s25 = sld [smem:[#allocation4 + $0x45]] }
 0x1ca   :  { %v2522_v56 = vadd.f32 %v2517_v44, %v2506_v22  ;;  %v2687_v62 = vmul.f32 %v5984_v25, %v5190_v7  ;;  %v2658_v28 = vrot.slane %v5990_v42, 1  ;;  %v2660_v3 = vrot.slane %v2653_v55, 1 }
 0x1cb   :  { %v2674_v61 = vrot.slane %v5996_v57, 1  ;;  %v6009_v10 = vstv %s5946_s19  ;;  %v2676_v49 = vrot.slane %v2669_v48, 1  ;;  %v2692_v11 = vrot.slane %v6002_v15, 2  ;;  %s6462_s19 = sld [smem:[#allocation4 + $0x1b]] }
 0x1cc   :  { %v2540_v43 = vadd.f32 %v2535_v45, %v2522_v56  ;;  %v2694_v53 = vrot.slane %v2687_v62, 2  ;;  %v2661_v37 = vsel %vm116_vm3, %v2658_v28, %v2660_v3  ;;  %v6021_v7 = vmul.f32 %v6017_v27, %v6009_v10 }
 0x1cd   :  { %v2703_v50 = vmul.f32 %v6009_v10, %v5217_v40  ;;  %v6026_v13 = vstv %s5950_s26  ;;  %v2665_v47 = vadd.f32 %v2661_v37, %v2647_v16  ;;  %v2677_v54 = vsel %vm116_vm3, %v2674_v61, %v2676_v49  ;;  %v6037_v40 = vld [vmem:[#allocation2 + $0x8] sm:$0xff]  ;;  %s6485_s26 = sld [smem:[#allocation4 + $0x4c]] }
 0x1ce   :  { %v2556_v24 = vadd.f32 %v2551_v46, %v2540_v43  ;;  %v2695_v12 = vsel %vm151_vm4, %v2692_v11, %v2694_v53  ;;  %v2708_v17 = vrot.slane %v6021_v7, 2  ;;  %v6041_v59 = vmul.f32 %v6037_v40, %v6026_v13 }
 0x1cf   :  { %v2710_v2 = vrot.slane %v2703_v50, 2  ;;  %v2721_v33 = vmul.f32 %v6043_v51, %v6026_v13  ;;  %v2681_v44 = vadd.f32 %v2677_v54, %v2665_v47  ;;  %v6050_v45 = vstv %s5975_s29  ;;  %s6496_s29 = sld [smem:[#allocation4 + $0x22]] }
 0x1d0   :  { %v2574_v1 = vadd.f32 %v2569_v26, %v2556_v24  ;;  %v6053_v20 = vstv %s5986_s3  ;;  %v2726_v41 = vrot.slane %v6041_v59, 3  ;;  %v6063_v63 = vmul.f32 %v6017_v27, %v6050_v45  ;;  %s6521_s3 = sld [smem:[#allocation4 + $0x53]] }
 0x1d1   :  { %v2711_v29 = vsel %vm151_vm4, %v2708_v17, %v2710_v2  ;;  %v2728_v8 = vrot.slane %v2721_v33, 3  ;;  %v2699_v39 = vadd.f32 %v2695_v12, %v2681_v44  ;;  %v2737_v30 = vmul.f32 %v6065_v21, %v6050_v45 }
 0x1d2   :  { %v2590_v0 = vadd.f32 %v2585_v32, %v2574_v1  ;;  %v6071_v46 = vmul.f32 %v6037_v40, %v6053_v20  ;;  %v2742_v38 = vrot.slane %v6063_v63, 3  ;;  %v2755_v32 = vmul.f32 %v6043_v51, %v6053_v20 }
 0x1d3   :  { %v2729_v26 = vsel %vm186_vm5, %v2726_v41, %v2728_v8  ;;  %v6082_v60 = vstv %s6011_s11  ;;  %v2715_v16 = vadd.f32 %v2711_v29, %v2699_v39  ;;  %v2744_v55 = vrot.slane %v2737_v30, 3  ;;  %s6536_s11 = sld [smem:[#allocation4 + $0x29]] }
 0x1d4   :  { %v2608_v22 = vadd.f32 %v5964_v23, %v2590_v0  ;;  %v2760_v56 = vrot.slane %v6071_v46, 4  ;;  %v2762_v48 = vrot.slane %v2755_v32, 4  ;;  %v6088_v62 = vmul.f32 %v6017_v27, %v6082_v60 }
 0x1d5   :  { %v2771_v3 = vmul.f32 %v6065_v21, %v6082_v60  ;;  %v6093_v43 = vstv %s6028_s7  ;;  %v2733_v53 = vadd.f32 %v2729_v26, %v2715_v16  ;;  %v2745_v23 = vsel %vm186_vm5, %v2742_v38, %v2744_v55  ;;  %s6551_s7 = sld [smem:[#allocation4 + $0x30]] }
 0x1d6   :  { %v2624_v49 = vadd.f32 %v5967_v9, %v2608_v22  ;;  %v6101_v37 = vmul.f32 %v6037_v40, %v6093_v43  ;;  %v2763_v50 = vsel %vm221_vm6, %v2760_v56, %v2762_v48  ;;  %v2776_v24 = vrot.slane %v6088_v62, 4 }
 0x1d7   :  { %v2778_v47 = vrot.slane %v2771_v3, 4  ;;  %v2789_v9 = vmul.f32 %v6043_v51, %v6093_v43  ;;  %v2749_v54 = vadd.f32 %v2745_v23, %v2733_v53  ;;  %v2802_v2 = vstv %s6055_s15  ;;  %s6575_s15 = sld [smem:[#allocation4 + $0x61]] }
 0x1d8   :  { %2628 = vrot.lane.b32.xlu0 %v2624_v49, %s3648_s16  ;;  %v2794_v12 = vrot.slane %v6101_v37, 5  ;;  %v6113_v33 = vstv %s6047_s17  ;;  %v6119_v29 = vmul.f32 %v6017_v27, %v2802_v2  ;;  %v2805_v8 = vmul.f32 %v6065_v21, %v2802_v2  ;;  %s6159_s16 = sld [smem:[#allocation4 + $0x5]] }
 0x1d9   :  { %v2779_v1 = vsel %vm221_vm6, %v2776_v24, %v2778_v47  ;;  %v2796_v44 = vrot.slane %v2789_v9, 5  ;;  %v2767_v0 = vadd.f32 %v2763_v50, %v2749_v54  ;;  %v6124_v39 = vmul.f32 %v6037_v40, %v6113_v33  ;;  %s6559_s17 = sld [smem:[#allocation4 + $0x5a]] }
 0x1da   :  { %v2823_v30 = vmul.f32 %v6043_v51, %v6113_v33  ;;  %v2836_v26 = vstv %s6073_s10  ;;  %v2810_v22 = vrot.slane %v6119_v29, 5  ;;  %v2812_v16 = vrot.slane %v2805_v8, 5  ;;  %s3348_s10 = sld [smem:[#allocation4 + $0x7]] }
 0x1db   :  { %v2797_v32 = vsel %vm256_vm7, %v2794_v12, %v2796_v44  ;;  %v6134_v55 = vmul.f32 %v6017_v27, %v2836_v26  ;;  %v2783_v48 = vadd.f32 %v2779_v1, %v2767_v0  ;;  %v2828_v3 = vrot.slane %v6124_v39, 6 }
 0x1dc   :  { %v2830_v49 = vrot.slane %v2823_v30, 6  ;;  %v2839_v53 = vmul.f32 %v6065_v21, %v2836_v26  ;;  %v2813_v23 = vsel %vm256_vm7, %v2810_v22, %v2812_v16  ;;  %v2639_v47 = vmul.f32 %v2638_v52, %v5343_v19 }
 0x1dd   :  { %v2844_v50 = vrot.slane %v6134_v55, 6  ;;  %v2644_v9 = vmul.f32 %v2643_v58, %v5362_v4  ;;  %v2801_v54 = vadd.f32 %v2797_v32, %v2783_v48  ;;  %v2651_v8 = vmul.f32 %v5978_v18, %v5343_v19 }
 0x1de   :  { %v2831_v1 = vsel %vm291_vm8, %v2828_v3, %v2830_v49  ;;  %v2846_v44 = vrot.slane %v2839_v53, 6  ;;  %v2667_v30 = vmul.f32 %v5981_v14, %v5362_v4  ;;  %v2685_v16 = vmul.f32 %v5984_v25, %v5343_v19 }
 0x1df   :  { %v2646_v0 = vadd.f32 %v2644_v9, %v2639_v47  ;;  %v2701_v52 = vmul.f32 %v6009_v10, %v5362_v4  ;;  %v2817_v58 = vadd.f32 %v2813_v23, %v2801_v54  ;;  %v2657_v48 = vrot.slane %v2651_v8, 1  ;;  %v6175_v9 = vld [vmem:[#allocation2] sm:$0xff] }
 0x1e0   :  { %v2847_v32 = vsel %vm291_vm8, %v2844_v50, %v2846_v44  ;;  %v2719_v18 = vmul.f32 %v6026_v13, %v5343_v19  ;;  %v2673_v14 = vrot.slane %v2667_v30, 1  ;;  %v2691_v49 = vrot.slane %v2685_v16, 2  ;;  %v6195_v44 = vld [vmem:[#allocation3] sm:$0xff] }
 0x1e1   :  { %v2707_v53 = vrot.slane %v2701_v52, 2  ;;  %v2735_v25 = vmul.f32 %v6050_v45, %v5362_v4  ;;  %v2835_v10 = vadd.f32 %v2831_v1, %v2817_v58  ;;  %v2659_v23 = vsel %vm116_vm3, %v2657_v48, %v2658_v28 }
 0x1e2   :  { %v2725_v47 = vrot.slane %v2719_v18, 3  ;;  %v2753_v19 = vmul.f32 %v6175_v9, %v6053_v20  ;;  %v2664_v13 = vadd.f32 %v2659_v23, %v2646_v0  ;;  %v2675_v4 = vsel %vm116_vm3, %v2673_v14, %v2674_v61 }
 0x1e3   :  { %v2693_v45 = vsel %vm151_vm4, %v2691_v49, %v2692_v11  ;;  %v2709_v42 = vsel %vm151_vm4, %v2707_v53, %v2708_v17  ;;  %v2851_v28 = vadd.f32 %v2847_v32, %v2835_v10  ;;  %v2741_v54 = vrot.slane %v2735_v25, 3 }
 0x1e4   :  { %v2727_v20 = vsel %vm186_vm5, %v2725_v47, %v2726_v41  ;;  %v2759_v1 = vrot.slane %v2753_v19, 4  ;;  %v2680_v57 = vadd.f32 %v2675_v4, %v2664_v13  ;;  %v2769_v15 = vmul.f32 %v6195_v44, %v6082_v60 }
 0x1e5   :  { %v2787_v61 = vmul.f32 %v6175_v9, %v6093_v43  ;;  %v2803_v11 = vmul.f32 %v6195_v44, %v2802_v2  ;;  %2856 = vrot.lane.b32.xlu1 %v2851_v28, %s3649_s13  ;;  %v2743_v7 = vsel %vm186_vm5, %v2741_v54, %v2742_v38  ;;  %v2821_v59 = vmul.f32 %v6175_v9, %v6113_v33 }
 0x1e6   :  { %v2761_v17 = vsel %vm221_vm6, %v2759_v1, %v2760_v56  ;;  %v2837_v41 = vmul.f32 %v6195_v44, %v2836_v26  ;;  %v2698_v60 = vadd.f32 %v2693_v45, %v2680_v57  ;;  %v2775_v43 = vrot.slane %v2769_v15, 4 }
 0x1e7   :  { %v2793_v2 = vrot.slane %v2787_v61, 5  ;;  %v2809_v8 = vrot.slane %v2803_v11, 5  ;;  %v2827_v63 = vrot.slane %v2821_v59, 6  ;;  %v2864_v46 = vstv %s6159_s16  ;;  %s3349_s16 = sld [smem:[#allocation4 + $0x38]] }
 0x1e8   :  { %v2843_v38 = vrot.slane %v2837_v41, 6  ;;  %v2869_v56 = vstv %s6166_s2  ;;  %v2714_v33 = vadd.f32 %v2709_v42, %v2698_v60  ;;  %v2777_v26 = vsel %vm221_vm6, %v2775_v43, %v2776_v24  ;;  %s3351_s2 = sld [smem:[#allocation4 + $0x3f]] }
 0x1e9   :  { %v2795_v0 = vsel %vm256_vm7, %v2793_v2, %v2794_v12  ;;  %v2811_v30 = vsel %vm256_vm7, %v2809_v8, %v2810_v22  ;;  %v2829_v16 = vsel %vm291_vm8, %v2827_v63, %v2828_v3  ;;  %v2866_v62 = vmul.f32 %v6037_v40, %v2864_v46 }
 0x1ea   :  { %v6233_v52 = vsel %vm291_vm8, %v2843_v38, %v2844_v50  ;;  %v2871_v37 = vmul.f32 %v6017_v27, %v2869_v56  ;;  %v2732_v24 = vadd.f32 %v2727_v20, %v2714_v33  ;;  %v6244_v12 = vstv %s6170_s4  ;;  %s3347_s4 = sld [smem:[#allocation4 + $0x31]] }
 0x1eb   :  { %v6247_v29 = vstv %s6179_s5  ;;  %v6250_v39 = vstv %s6190_s18  ;;  %v6256_v55 = vmul.f32 %v6037_v40, %v6244_v12  ;;  %v2879_v3 = vmul.f32 %v6043_v51, %v6244_v12  ;;  %s3350_s5 = sld [smem:[#allocation4 + $0xe]] }
 0x1ec   :  { %v2873_v22 = vadd.f32 %v2871_v37, %v2866_v62  ;;  %v6262_v50 = vmul.f32 %v6017_v27, %v6247_v29  ;;  %v2748_v58 = vadd.f32 %v2743_v7, %v2732_v24  ;;  %v2895_v32 = vmul.f32 %v6065_v21, %v6247_v29  ;;  %s3352_s18 = sld [smem:[#allocation4 + $0x15]] }
 0x1ed   :  { %v6268_v48 = vmul.f32 %v6037_v40, %v6250_v39  ;;  %v2913_v18 = vmul.f32 %v6043_v51, %v6250_v39  ;;  %v2884_v14 = vrot.slane %v6256_v55, 1  ;;  %v2886_v49 = vrot.slane %v2879_v3, 1 }
 0x1ee   :  { %v2900_v53 = vrot.slane %v6262_v50, 1  ;;  %v6275_v25 = vstv %s6212_s0  ;;  %v2766_v10 = vadd.f32 %v2761_v17, %v2748_v58  ;;  %v2902_v23 = vrot.slane %v2895_v32, 1  ;;  %s6706_s0 = sld [smem:[#allocation4 + $0x46]] }
 0x1ef   :  { %v2918_v47 = vrot.slane %v6268_v48, 2  ;;  %v2920_v19 = vrot.slane %v2913_v18, 2  ;;  %v2887_v13 = vsel %vm116_vm3, %v2884_v14, %v2886_v49  ;;  %v6285_v4 = vmul.f32 %v6017_v27, %v6275_v25 }
 0x1f0   :  { %v2929_v45 = vmul.f32 %v6065_v21, %v6275_v25  ;;  %v6290_v42 = vstv %s6216_s28  ;;  %v2782_v28 = vadd.f32 %v2777_v26, %v2766_v10  ;;  %v2891_v20 = vadd.f32 %v2887_v13, %v2873_v22  ;;  %s6718_s28 = sld [smem:[#allocation4 + $0x4d]] }
 0x1f1   :  { %v2903_v54 = vsel %vm116_vm3, %v2900_v53, %v2902_v23  ;;  %v2921_v1 = vsel %vm151_vm4, %v2918_v47, %v2920_v19  ;;  %v2934_v57 = vrot.slane %v6285_v4, 2  ;;  %v6303_v61 = vmul.f32 %v6037_v40, %v6290_v42 }
 0x1f2   :  { %v2936_v15 = vrot.slane %v2929_v45, 2  ;;  %v2947_v11 = vmul.f32 %v6043_v51, %v6290_v42  ;;  %v2800_v7 = vadd.f32 %v2795_v0, %v2782_v28  ;;  %v2907_v17 = vadd.f32 %v2903_v54, %v2891_v20 }
 0x1f3   :  { %v6310_v59 = vstv %s6241_s30  ;;  %v6313_v41 = vstv %s6252_s6  ;;  %v2952_v43 = vrot.slane %v6303_v61, 3  ;;  %v6340_v37 = vstv %s6277_s23  ;;  %s6728_s30 = sld [smem:[#allocation4 + $0x1c]] }
 0x1f4   :  { %v2937_v60 = vsel %vm151_vm4, %v2934_v57, %v2936_v15  ;;  %v2954_v2 = vrot.slane %v2947_v11, 3  ;;  %v6323_v8 = vmul.f32 %v6017_v27, %v6310_v59  ;;  %v2816_v63 = vadd.f32 %v2811_v30, %v2800_v7  ;;  %s6756_s6 = sld [smem:[#allocation4 + $0x23]] }
 0x1f5   :  { %v2925_v38 = vadd.f32 %v2921_v1, %v2907_v17  ;;  %v2963_v33 = vmul.f32 %v6065_v21, %v6310_v59  ;;  %v6329_v26 = vmul.f32 %v6037_v40, %v6313_v41  ;;  %v2981_v30 = vmul.f32 %v6043_v51, %v6313_v41  ;;  %s6761_s23 = sld [smem:[#allocation4 + $0x54]] }
 0x1f6   :  { %v2955_v0 = vsel %vm186_vm5, %v2952_v43, %v2954_v2  ;;  %v2968_v62 = vrot.slane %v6323_v8, 3  ;;  %v2834_v24 = vadd.f32 %v2829_v16, %v2816_v63  ;;  %v6345_v18 = vmul.f32 %v6017_v27, %v6340_v37 }
 0x1f7   :  { %v2941_v22 = vadd.f32 %v2937_v60, %v2925_v38  ;;  %v2970_v3 = vrot.slane %v2963_v33, 3  ;;  %v2986_v58 = vrot.slane %v6329_v26, 4  ;;  %v2988_v32 = vrot.slane %v2981_v30, 4 }
 0x1f8   :  { %v2997_v49 = vmul.f32 %v6065_v21, %v6340_v37  ;;  %v6350_v10 = vstv %s6292_s27  ;;  %v2850_v23 = vadd.f32 %v6233_v52, %v2834_v24  ;;  %v3002_v28 = vrot.slane %v6345_v18, 4  ;;  %s3358_s27 = sld [smem:[#allocation4 + $0x2a]] }
 0x1f9   :  { %v2959_v19 = vadd.f32 %v2955_v0, %v2941_v22  ;;  %v2971_v16 = vsel %vm186_vm5, %v2968_v62, %v2970_v3  ;;  %v6358_v13 = vmul.f32 %v6037_v40, %v6350_v10  ;;  %v2989_v45 = vsel %vm221_vm6, %v2986_v58, %v2988_v32 }
 0x1fa   :  { %v3004_v20 = vrot.slane %v2997_v49, 4  ;;  %v3015_v52 = vmul.f32 %v6043_v51, %v6350_v10  ;;  %2854 = vrot.lane.b32.xlu0 %v2850_v23, %s3649_s13  ;;  %v3028_v15 = vstv %s6315_s9  ;;  %v3046_v11 = vstv %s6307_s8  ;;  %s6412_s13 = sld [smem:[#allocation4 + $0x6]] }
 0x1fb   :  { %v2975_v54 = vadd.f32 %v2971_v16, %v2959_v19  ;;  %v3020_v1 = vrot.slane %v6358_v13, 5  ;;  %v6374_v60 = vmul.f32 %v6017_v27, %v3028_v15  ;;  %v3031_v2 = vmul.f32 %v6065_v21, %v3028_v15  ;;  %s3359_s8 = sld [smem:[#allocation4 + $0x5b]] }
 0x1fc   :  { %v3005_v7 = vsel %vm221_vm6, %v3002_v28, %v3004_v20  ;;  %v3022_v17 = vrot.slane %v3015_v52, 5  ;;  %v6378_v38 = vmul.f32 %v6037_v40, %v3046_v11  ;;  %v3049_v33 = vmul.f32 %v6043_v51, %v3046_v11 }
 0x1fd   :  { %v2993_v63 = vadd.f32 %v2989_v45, %v2975_v54  ;;  %v3062_v0 = vstv %s6331_s20  ;;  %v3036_v24 = vrot.slane %v6374_v60, 5  ;;  %v3038_v22 = vrot.slane %v3031_v2, 5 }
 0x1fe   :  { %v3023_v30 = vsel %vm256_vm7, %v3020_v1, %v3022_v17  ;;  %v6387_v3 = vmul.f32 %v6017_v27, %v3062_v0  ;;  %v3054_v49 = vrot.slane %v6378_v38, 6  ;;  %v3056_v23 = vrot.slane %v3049_v33, 6 }
 0x1ff   :  { %v3009_v32 = vadd.f32 %v3005_v7, %v2993_v63  ;;  %v3065_v19 = vmul.f32 %v6065_v21, %v3062_v0  ;;  %v3039_v16 = vsel %vm256_vm7, %v3036_v24, %v3038_v22  ;;  %v2865_v20 = vmul.f32 %v6175_v9, %v2864_v46 }
 0x200   :  { %v3070_v45 = vrot.slane %v6387_v3, 6  ;;  %v2870_v52 = vmul.f32 %v6195_v44, %v2869_v56  ;;  %v3057_v7 = vsel %vm291_vm8, %v3054_v49, %v3056_v23  ;;  %v2877_v2 = vmul.f32 %v6175_v9, %v6244_v12 }
 0x201   :  { %v3027_v54 = vadd.f32 %v3023_v30, %v3009_v32  ;;  %v3072_v17 = vrot.slane %v3065_v19, 6  ;;  %v2893_v33 = vmul.f32 %v6195_v44, %v6247_v29  ;;  %v2911_v22 = vmul.f32 %v6175_v9, %v6250_v39 }
 0x202   :  { %v2872_v63 = vadd.f32 %v2870_v52, %v2865_v20  ;;  %v2927_v46 = vmul.f32 %v6195_v44, %v6275_v25  ;;  %v2883_v3 = vrot.slane %v2877_v2, 1  ;;  %v2945_v32 = vmul.f32 %v6175_v9, %v6290_v42 }
 0x203   :  { %v3043_v56 = vadd.f32 %v3039_v16, %v3027_v54  ;;  %v3073_v30 = vsel %vm291_vm8, %v3070_v45, %v3072_v17  ;;  %v2899_v12 = vrot.slane %v2893_v33, 1  ;;  %v2917_v23 = vrot.slane %v2911_v22, 2 }
 0x204   :  { %v2933_v29 = vrot.slane %v2927_v46, 2  ;;  %v2961_v39 = vmul.f32 %v6195_v44, %v6310_v59  ;;  %v2885_v19 = vsel %vm116_vm3, %v2883_v3, %v2884_v14  ;;  %v2951_v16 = vrot.slane %v2945_v32, 3 }
 0x205   :  { %v3061_v25 = vadd.f32 %v3057_v7, %v3043_v56  ;;  %v2979_v20 = vmul.f32 %v6175_v9, %v6313_v41  ;;  %v2890_v42 = vadd.f32 %v2885_v19, %v2872_v63  ;;  %v2901_v52 = vsel %vm116_vm3, %v2899_v12, %v2900_v53 }
 0x206   :  { %v2919_v59 = vsel %vm151_vm4, %v2917_v23, %v2918_v47  ;;  %v2935_v55 = vsel %vm151_vm4, %v2933_v29, %v2934_v57  ;;  %v2953_v41 = vsel %vm186_vm5, %v2951_v16, %v2952_v43  ;;  %v2967_v54 = vrot.slane %v2961_v39, 3 }
 0x207   :  { %v3077_v14 = vadd.f32 %v3073_v30, %v3061_v25  ;;  %v2985_v7 = vrot.slane %v2979_v20, 4  ;;  %v2906_v50 = vadd.f32 %v2901_v52, %v2890_v42  ;;  %v2995_v48 = vmul.f32 %v6195_v44, %v6340_v37 }
 0x208   :  { %v3013_v53 = vmul.f32 %v6175_v9, %v6350_v10  ;;  %v3029_v47 = vmul.f32 %v6195_v44, %v3028_v15  ;;  %v2969_v4 = vsel %vm186_vm5, %v2967_v54, %v2968_v62  ;;  %v3047_v61 = vmul.f32 %v6175_v9, %v3046_v11 }
 0x209   :  { %3082 = vrot.lane.b32.xlu1 %v3077_v14, %s3650_s1  ;;  %v2987_v57 = vsel %vm221_vm6, %v2985_v7, %v2986_v58  ;;  %v3063_v43 = vmul.f32 %v6195_v44, %v3062_v0  ;;  %v2924_v37 = vadd.f32 %v2919_v59, %v2906_v50  ;;  %v3001_v10 = vrot.slane %v2995_v48, 4 }
 0x20a   :  { %v3019_v15 = vrot.slane %v3013_v53, 5  ;;  %v3035_v17 = vrot.slane %v3029_v47, 5  ;;  %v3053_v8 = vrot.slane %v3047_v61, 6  ;;  %v3090_v26 = vstv %s6412_s13 }
 0x20b   :  { %v3069_v62 = vrot.slane %v3063_v43, 6  ;;  %v3095_v2 = vstv %s6417_s12  ;;  %v2940_v58 = vadd.f32 %v2935_v55, %v2924_v37  ;;  %v3003_v11 = vsel %vm221_vm6, %v3001_v10, %v3002_v28 }
 0x20c   :  { %v3021_v0 = vsel %vm256_vm7, %v3019_v15, %v3020_v1  ;;  %v3037_v63 = vsel %vm256_vm7, %v3035_v17, %v3036_v24  ;;  %v3055_v33 = vsel %vm291_vm8, %v3053_v8, %v3054_v49  ;;  %v3092_v18 = vmul.f32 %v6037_v40, %v3090_v26 }
 0x20d   :  { %v6477_v22 = vsel %vm291_vm8, %v3069_v62, %v3070_v45  ;;  %v3097_v28 = vmul.f32 %v6017_v27, %v3095_v2  ;;  %v2958_v13 = vadd.f32 %v2953_v41, %v2940_v58  ;;  %v6488_v1 = vstv %s6421_s21 }
 0x20e   :  { %v6491_v60 = vstv %s6428_s22  ;;  %v6494_v38 = vstv %s6439_s24  ;;  %v6500_v49 = vmul.f32 %v6037_v40, %v6488_v1  ;;  %v3105_v45 = vmul.f32 %v6043_v51, %v6488_v1 }
 0x20f   :  { %v3099_v24 = vadd.f32 %v3097_v28, %v3092_v18  ;;  %v6506_v46 = vmul.f32 %v6017_v27, %v6491_v60  ;;  %v2974_v56 = vadd.f32 %v2969_v4, %v2958_v13  ;;  %v3121_v30 = vmul.f32 %v6065_v21, %v6491_v60 }
 0x210   :  { %v6512_v3 = vmul.f32 %v6037_v40, %v6494_v38  ;;  %v3139_v32 = vmul.f32 %v6043_v51, %v6494_v38  ;;  %v3110_v12 = vrot.slane %v6500_v49, 1  ;;  %v3112_v23 = vrot.slane %v3105_v45, 1 }
 0x211   :  { %v3126_v29 = vrot.slane %v6506_v46, 1  ;;  %v6519_v39 = vstv %s6458_s25  ;;  %v2992_v25 = vadd.f32 %v2987_v57, %v2974_v56  ;;  %v3128_v19 = vrot.slane %v3121_v30, 1 }
 0x212   :  { %v3144_v16 = vrot.slane %v6512_v3, 2  ;;  %v3146_v20 = vrot.slane %v3139_v32, 2  ;;  %v3113_v42 = vsel %vm116_vm3, %v3110_v12, %v3112_v23  ;;  %v6529_v52 = vmul.f32 %v6017_v27, %v6519_v39 }
 0x213   :  { %v3155_v59 = vmul.f32 %v6065_v21, %v6519_v39  ;;  %v6534_v55 = vstv %s6462_s19  ;;  %v3008_v14 = vadd.f32 %v3003_v11, %v2992_v25  ;;  %v3117_v41 = vadd.f32 %v3113_v42, %v3099_v24 }
 0x214   :  { %v3129_v54 = vsel %vm116_vm3, %v3126_v29, %v3128_v19  ;;  %v3147_v7 = vsel %vm151_vm4, %v3144_v16, %v3146_v20  ;;  %v3160_v50 = vrot.slane %v6529_v52, 2  ;;  %v6547_v53 = vmul.f32 %v6037_v40, %v6534_v55 }
 0x215   :  { %v3162_v48 = vrot.slane %v3155_v59, 2  ;;  %v3173_v47 = vmul.f32 %v6043_v51, %v6534_v55  ;;  %v3026_v4 = vadd.f32 %v3021_v0, %v3008_v14  ;;  %v3133_v57 = vadd.f32 %v3129_v54, %v3117_v41 }
 0x216   :  { %v6554_v61 = vstv %s6485_s26  ;;  %v6557_v43 = vstv %s6496_s29  ;;  %v3178_v10 = vrot.slane %v6547_v53, 3  ;;  %v6584_v28 = vstv %s6521_s3 }
 0x217   :  { %v3163_v37 = vsel %vm151_vm4, %v3160_v50, %v3162_v48  ;;  %v3180_v15 = vrot.slane %v3173_v47, 3  ;;  %v6567_v17 = vmul.f32 %v6017_v27, %v6554_v61  ;;  %v3042_v8 = vadd.f32 %v3037_v63, %v3026_v4 }
 0x218   :  { %v3151_v62 = vadd.f32 %v3147_v7, %v3133_v57  ;;  %v3189_v58 = vmul.f32 %v6065_v21, %v6554_v61  ;;  %v6573_v11 = vmul.f32 %v6037_v40, %v6557_v43  ;;  %v3207_v63 = vmul.f32 %v6043_v51, %v6557_v43 }
 0x219   :  { %v3181_v0 = vsel %vm186_vm5, %v3178_v10, %v3180_v15  ;;  %v3194_v18 = vrot.slane %v6567_v17, 3  ;;  %v3060_v13 = vadd.f32 %v3055_v33, %v3042_v8  ;;  %v6589_v32 = vmul.f32 %v6017_v27, %v6584_v28 }
 0x21a   :  { %v3167_v24 = vadd.f32 %v3163_v37, %v3151_v62  ;;  %v3196_v45 = vrot.slane %v3189_v58, 3  ;;  %v3212_v56 = vrot.slane %v6573_v11, 4  ;;  %v3214_v30 = vrot.slane %v3207_v63, 4 }
 0x21b   :  { %v3223_v23 = vmul.f32 %v6065_v21, %v6584_v28  ;;  %v6594_v25 = vstv %s6536_s11  ;;  %v3076_v19 = vadd.f32 %v6477_v22, %v3060_v13  ;;  %v3228_v14 = vrot.slane %v6589_v32, 4 }
 0x21c   :  { %v3185_v20 = vadd.f32 %v3181_v0, %v3167_v24  ;;  %v3197_v33 = vsel %vm186_vm5, %v3194_v18, %v3196_v45  ;;  %v6602_v42 = vmul.f32 %v6037_v40, %v6594_v25  ;;  %v3215_v59 = vsel %vm221_vm6, %v3212_v56, %v3214_v30 }
 0x21d   :  { %v3230_v41 = vrot.slane %v3223_v23, 4  ;;  %v3241_v22 = vmul.f32 %v6043_v51, %v6594_v25  ;;  %3080 = vrot.lane.b32.xlu0 %v3076_v19, %s3650_s1  ;;  %v3254_v48 = vstv %s6559_s17  ;;  %v6614_v47 = vstv %s6551_s7  ;;  %s6687_s1 = sld [smem:[#allocation4]] }
 0x21e   :  { %v3201_v54 = vadd.f32 %v3197_v33, %v3185_v20  ;;  %v3246_v7 = vrot.slane %v6602_v42, 5  ;;  %v6620_v37 = vmul.f32 %v6017_v27, %v3254_v48  ;;  %v3257_v15 = vmul.f32 %v6065_v21, %v3254_v48 }
 0x21f   :  { %v3231_v4 = vsel %vm221_vm6, %v3228_v14, %v3230_v41  ;;  %v3248_v57 = vrot.slane %v3241_v22, 5  ;;  %v6625_v62 = vmul.f32 %v6037_v40, %v6614_v47  ;;  %v3275_v58 = vmul.f32 %v6043_v51, %v6614_v47 }
 0x220   :  { %v3219_v8 = vadd.f32 %v3215_v59, %v3201_v54  ;;  %v3288_v0 = vstv %s6575_s15  ;;  %v3262_v63 = vrot.slane %v6620_v37, 5  ;;  %v3264_v13 = vrot.slane %v3257_v15, 5 }
 0x221   :  { %v6632_v24 = vmul.f32 %v6017_v27, %v3288_v0  ;;  %v3249_v30 = vsel %vm256_vm7, %v3246_v7, %v3248_v57  ;;  %v3280_v23 = vrot.slane %v6625_v62, 6  ;;  %v3291_v40 = vmul.f32 %v6065_v21, %v3288_v0 }
 0x222   :  { %v3235_v45 = vadd.f32 %v3231_v4, %v3219_v8  ;;  %v3265_v51 = vsel %vm256_vm7, %v3262_v63, %v3264_v13  ;;  %v3282_v19 = vrot.slane %v3275_v58, 6  ;;  %v3091_v20 = vmul.f32 %v6175_v9, %v3090_v26 }
 0x223   :  { %v3096_v27 = vmul.f32 %v6195_v44, %v3095_v2  ;;  %v3296_v59 = vrot.slane %v6632_v24, 6  ;;  %v3298_v41 = vrot.slane %v3291_v40, 6  ;;  %v3103_v22 = vmul.f32 %v6175_v9, %v6488_v1 }
 0x224   :  { %v3253_v33 = vadd.f32 %v3249_v30, %v3235_v45  ;;  %v3119_v21 = vmul.f32 %v6195_v44, %v6491_v60  ;;  %v3137_v4 = vmul.f32 %v6175_v9, %v6494_v38  ;;  %v3153_v26 = vmul.f32 %v6195_v44, %v6519_v39 }
 0x225   :  { %v3098_v54 = vadd.f32 %v3096_v27, %v3091_v20  ;;  %v3109_v15 = vrot.slane %v3103_v22, 1  ;;  %v3171_v2 = vmul.f32 %v6175_v9, %v6534_v55  ;;  %v3283_v8 = vsel %vm291_vm8, %v3280_v23, %v3282_v19 }
 0x226   :  { %v3269_v57 = vadd.f32 %v3265_v51, %v3253_v33  ;;  %v3125_v1 = vrot.slane %v3119_v21, 1  ;;  %v3143_v58 = vrot.slane %v3137_v4, 2  ;;  %v3159_v38 = vrot.slane %v3153_v26, 2 }
 0x227   :  { %v3111_v60 = vsel %vm116_vm3, %v3109_v15, %v3110_v12  ;;  %v3187_v39 = vmul.f32 %v6195_v44, %v6554_v61  ;;  %v3299_v45 = vsel %vm291_vm8, %v3296_v59, %v3298_v41  ;;  %v3177_v51 = vrot.slane %v3171_v2, 3 }
 0x228   :  { %v3287_v13 = vadd.f32 %v3283_v8, %v3269_v57  ;;  %v3116_v55 = vadd.f32 %v3111_v60, %v3098_v54  ;;  %v3127_v30 = vsel %vm116_vm3, %v3125_v1, %v3126_v29  ;;  %v3145_v49 = vsel %vm151_vm4, %v3143_v58, %v3144_v16 }
 0x229   :  { %v3205_v12 = vmul.f32 %v6175_v9, %v6557_v43  ;;  %v3161_v61 = vsel %vm151_vm4, %v3159_v38, %v3160_v50  ;;  %v3193_v20 = vrot.slane %v3187_v39, 3  ;;  %v3221_v46 = vmul.f32 %v6195_v44, %v6584_v28 }
 0x22a   :  { %v3303_v40 = vadd.f32 %v3299_v45, %v3287_v13  ;;  %v3132_v19 = vadd.f32 %v3127_v30, %v3116_v55  ;;  %v3179_v3 = vsel %vm186_vm5, %v3177_v51, %v3178_v10  ;;  %v3239_v50 = vmul.f32 %v6175_v9, %v6594_v25 }
 0x22b   :  { %v3211_v16 = vrot.slane %v3205_v12, 4  ;;  %v3195_v52 = vsel %vm186_vm5, %v3193_v20, %v3194_v18  ;;  %v3227_v27 = vrot.slane %v3221_v46, 4  ;;  %v3255_v28 = vmul.f32 %v6195_v44, %v3254_v48 }
 0x22c   :  { %3308 = vrot.lane.b32.xlu1 %v3303_v40, %s3651_s14  ;;  %v3150_v29 = vadd.f32 %v3145_v49, %v3132_v19  ;;  %v3273_v17 = vmul.f32 %v6175_v9, %v6614_v47  ;;  %v3289_v18 = vmul.f32 %v6195_v44, %v3288_v0  ;;  %v3245_v48 = vrot.slane %v3239_v50, 5 }
 0x22d   :  { %v3213_v53 = vsel %vm221_vm6, %v3211_v16, %v3212_v56  ;;  %v3229_v25 = vsel %vm221_vm6, %v3227_v27, %v3228_v14  ;;  %v3261_v41 = vrot.slane %v3255_v28, 5  ;;  %v6704_v21 = vstv %s3348_s10 }
 0x22e   :  { %v3166_v43 = vadd.f32 %v3161_v61, %v3150_v29  ;;  %v3279_v54 = vrot.slane %v3273_v17, 6  ;;  %v3295_v56 = vrot.slane %v3289_v18, 6  ;;  %v3247_v9 = vsel %vm256_vm7, %v3245_v48, %v3246_v7 }
 0x22f   :  { %v3263_v44 = vsel %vm256_vm7, %v3261_v41, %v3262_v63  ;;  %v112_v32 = vmul.f32 %v6704_v21, %v4039_v31  ;;  %v6716_v14 = vstv %s3349_s16  ;;  %v6726_v7 = vstv %s3351_s2  ;;  %v6812_v41 = vpop.permute.xlu1 %539 }
 0x230   :  { %v3184_v33 = vadd.f32 %v3179_v3, %v3166_v43  ;;  %v6722_v0 = vmul.f32 %v6716_v14, %v4023_v36  ;;  %v129_v42 = vmul.f32 %v6716_v14, %v4025_v35  ;;  %v6731_v37 = vstv %s6687_s1 }
 0x231   :  { %v6735_v63 = vmul.f32 %v6726_v7, %v4023_v36  ;;  %v164_v4 = vmul.f32 %v6726_v7, %v4025_v35  ;;  %v3281_v57 = vsel %vm291_vm8, %v3279_v54, %v3280_v23  ;;  %v6742_v15 = vstv %s3347_s4 }
 0x232   :  { %v3200_v10 = vadd.f32 %v3195_v52, %v3184_v33  ;;  %v6744_v2 = vstv %s3350_s5  ;;  %v3297_v8 = vsel %vm291_vm8, %v3295_v56, %v3296_v59  ;;  %v104_v1 = vmul.f32 %v6742_v15, %v4023_v36 }
 0x233   :  { %v120_v58 = vrot.slane %v112_v32, 1  ;;  %v147_v13 = vmul.f32 %v6744_v2, %v4039_v31  ;;  %v134_v62 = vrot.slane %v6722_v0, 1  ;;  %v136_v23 = vrot.slane %v129_v42, 1 }
 0x234   :  { %v3218_v22 = vadd.f32 %v3213_v53, %v3200_v10  ;;  %v6754_v38 = vstv %s3352_s18  ;;  %v169_v24 = vrot.slane %v6735_v63, 2  ;;  %v171_v59 = vrot.slane %v164_v4, 2 }
 0x235   :  { %v182_v39 = vmul.f32 %v6754_v38, %v4039_v31  ;;  %v99_v45 = vmul.f32 %v6731_v37, %v4027_v34  ;;  %v6766_v30 = vstv %s6706_s0  ;;  %v6770_v40 = vmul.f32 %v6704_v21, %v4027_v34 }
 0x236   :  { %v3234_v11 = vadd.f32 %v3229_v25, %v3218_v22  ;;  %v6774_v49 = vmul.f32 %v6744_v2, %v4027_v34  ;;  %v6778_v51 = vmul.f32 %v6766_v30, %v4023_v36  ;;  %v199_v12 = vmul.f32 %v6766_v30, %v4025_v35 }
 0x237   :  { %v6783_v19 = vstv %s6718_s28  ;;  %v106_v61 = vadd.f32 %v104_v1, %v99_v45  ;;  %v6787_v20 = vstv %s6728_s30  ;;  %v118_v3 = vrot.slane %v6770_v40, 1 }
 0x238   :  { %v3252_v47 = vadd.f32 %v3247_v9, %v3234_v11  ;;  %v6791_v46 = vmul.f32 %v6783_v19, %v4023_v36  ;;  %v234_v29 = vmul.f32 %v6783_v19, %v4025_v35  ;;  %v217_v16 = vmul.f32 %v6787_v20, %v4039_v31 }
 0x239   :  { %v155_v43 = vrot.slane %v147_v13, 2  ;;  %v121_v52 = vsel %vm116_vm3, %v118_v3, %v120_v58  ;;  %v153_v27 = vrot.slane %v6774_v49, 2  ;;  %v6802_v50 = vmul.f32 %v6754_v38, %v4027_v34 }
 0x23a   :  { %v3268_v26 = vadd.f32 %v3263_v44, %v3252_v47  ;;  %v137_v28 = vsel %vm116_vm3, %v134_v62, %v136_v23  ;;  %v204_v33 = vrot.slane %v6778_v51, 3  ;;  %v206_v53 = vrot.slane %v199_v12, 3 }
 0x23b   :  { %v125_v10 = vadd.f32 %v121_v52, %v106_v61  ;;  %v172_v17 = vsel %vm151_vm4, %v169_v24, %v171_v59  ;;  %v190_v18 = vrot.slane %v182_v39, 3  ;;  %v239_v25 = vrot.slane %v6791_v46, 4  ;;  %v6862_v61 = vpop.permute.xlu1 %765 }
 0x23c   :  { %v3286_v60 = vadd.f32 %v3281_v57, %v3268_v26  ;;  %v241_v48 = vrot.slane %v234_v29, 4  ;;  %v225_v22 = vrot.slane %v217_v16, 4  ;;  %v6815_v11 = vstv %s6756_s6 }
 0x23d   :  { %v6818_v54 = vstv %s6761_s23  ;;  %v141_v56 = vadd.f32 %v137_v28, %v125_v10  ;;  %v252_v9 = vmul.f32 %v6815_v11, %v4039_v31  ;;  %v156_v44 = vsel %vm151_vm4, %v153_v27, %v155_v43 }
 0x23e   :  { %v3302_v55 = vadd.f32 %v3297_v8, %v3286_v60  ;;  %v188_v32 = vrot.slane %v6802_v50, 3  ;;  %v6828_v47 = vmul.f32 %v6787_v20, %v4027_v34  ;;  %v207_v42 = vsel %vm186_vm5, %v204_v33, %v206_v53 }
 0x23f   :  { %v6835_v4 = vmul.f32 %v6818_v54, %v4023_v36  ;;  %v269_v26 = vmul.f32 %v6818_v54, %v4025_v35  ;;  %v160_v57 = vadd.f32 %v156_v44, %v141_v56  ;;  %v242_v8 = vsel %vm221_vm6, %v239_v25, %v241_v48 }
 0x240   :  { %3306 = vrot.lane.b32.xlu0 %v3302_v55, %s3651_s14  ;;  %v6842_v1 = vstv %s3358_s27  ;;  %v103_v58 = vmul.f32 %v6742_v15, %v3969_v5  ;;  %v98_v13 = vmul.f32 %v6731_v37, %v3971_v6  ;;  %v6848_v60 = vstv %s3359_s8  ;;  %s3652_s14 = smov [#allocation9]  }
 0x241   :  { %v176_v23 = vadd.f32 %v172_v17, %v160_v57  ;;  %v127_v59 = vmul.f32 %v6716_v14, %v3969_v5  ;;  %v110_v39 = vmul.f32 %v6704_v21, %v3971_v6  ;;  %v260_v45 = vrot.slane %v252_v9, 5  ;;  %s3334_s9 = sshll.u32 %s3652_s14, 4  ;;  %s3335_s9 = int_to_ptr.vmem [resolvable:$true] %s3334_s9 }
 0x242   :  { %v191_v55 = vsel %vm186_vm5, %v188_v32, %v190_v18  ;;  %v223_v40 = vrot.slane %v6828_v47, 4  ;;  %v6860_v12 = vmul.f32 %v6815_v11, %v4027_v34  ;;  %v274_v29 = vrot.slane %v6835_v4, 5  ;;  %v6971_v4 = vld [vmem:[#allocation2 + $0x8] sm:$0xff]  ;;  %s3614_s20 = scalar_lea.vmem %s3335_s9, 512  ;;  %p3619_p6 = scmp.lt.s32.totalorder %s3335_s9, %s3335_s9 }
 0x243   :  { %v195_v16 = vadd.f32 %v191_v55, %v176_v23  ;;  %v117_v43 = vrot.slane %v110_v39, 1  ;;  %v145_v52 = vmul.f32 %v6744_v2, %v3971_v6  ;;  %v287_v28 = vmul.f32 %v6842_v1, %v4039_v31  ;;  %p3615_p5 = scmp.ne.s32.totalorder %s3335_s9, %s3614_s20  ;;  %p3620_p7 = scmp.lt.s32.totalorder %s3614_s20, %s3614_s20 }
 0x244   :  { %v6871_v53 = vmul.f32 %v6848_v60, %v4023_v36  ;;  %v304_v10 = vmul.f32 %v6848_v60, %v4025_v35  ;;  %v105_v17 = vadd.f32 %v103_v58, %v98_v13  ;;  %v133_v48 = vrot.slane %v127_v59, 1  ;;  %v6889_v58 = vpop.permute.xlu0 %537 }
 0x245   :  { %v211_v18 = vadd.f32 %v207_v42, %v195_v16  ;;  %v162_v56 = vmul.f32 %v6726_v7, %v3969_v5  ;;  %v119_v9 = vsel %vm116_vm3, %v117_v43, %v118_v3  ;;  %v226_v44 = vsel %vm221_vm6, %v223_v40, %v225_v22  ;;  %p3621_p8 = por %p3620_p7, %p3619_p6 }
 0x246   :  { %v258_v31 = vrot.slane %v6860_v12, 5  ;;  %v6884_v36 = vmul.f32 %v6842_v1, %v4027_v34  ;;  %v124_v57 = vadd.f32 %v119_v9, %v105_v17  ;;  %v135_v42 = vsel %vm116_vm3, %v133_v48, %v134_v62  ;;  %v6895_v34 = vpop.permute.xlu1 %991 }
 0x247   :  { %v230_v35 = vadd.f32 %v226_v44, %v211_v18  ;;  %v152_v13 = vrot.slane %v145_v52, 2  ;;  %v180_v3 = vmul.f32 %v6754_v38, %v3971_v6  ;;  %v276_v23 = vrot.slane %v269_v26, 5  ;;  %p3622_p9 = pnand %p3621_p8, %p3615_p5 }
 0x248   :  { %v295_v22 = vrot.slane %v287_v28, 6  ;;  %v197_v59 = vmul.f32 %v6766_v30, %v3969_v5  ;;  %v140_v39 = vadd.f32 %v135_v42, %v124_v57  ;;  %v309_v55 = vrot.slane %v6871_v53, 6  ;;  %v6922_v44 = vpop.permute.xlu0 %763 }
 0x249   :  { %v246_v16 = vadd.f32 %v242_v8, %v230_v35  ;;  %v168_v0 = vrot.slane %v162_v56, 2  ;;  %v154_v62 = vsel %vm151_vm4, %v152_v13, %v153_v27  ;;  %v311_v43 = vrot.slane %v304_v10, 6 }
 0x24a   :  { %v261_v26 = vsel %vm256_vm7, %v258_v31, %v260_v45  ;;  %v293_v52 = vrot.slane %v6884_v36, 6  ;;  %v159_v28 = vadd.f32 %v154_v62, %v140_v39  ;;  %v187_v48 = vrot.slane %v180_v3, 3  ;;  %v1218_v13 = vpop.permute.xlu1 %1217  ;;  %v6937_v39 = vld [vmem:[#allocation2 + $0x10] sm:$0x3f] }
 0x24b   :  { %v265_v17 = vadd.f32 %v261_v26, %v246_v16  ;;  %v170_v18 = vsel %vm151_vm4, %v168_v0, %v169_v24  ;;  %v215_v8 = vmul.f32 %v6787_v20, %v3971_v6  ;;  %v277_v49 = vsel %vm256_vm7, %v274_v29, %v276_v23 }
 0x24c   :  { %v203_v27 = vrot.slane %v197_v59, 3  ;;  %v232_v45 = vmul.f32 %v6783_v19, %v3969_v5  ;;  %v175_v10 = vadd.f32 %v170_v18, %v159_v28  ;;  %v267_v9 = vmul.f32 %v6818_v54, %v3969_v5  ;;  %v6944_v28 = vld [vmem:[#allocation3 + $0x8] sm:$0xff] }
 0x24d   :  { %v281_v56 = vadd.f32 %v277_v49, %v265_v17  ;;  %v302_v63 = vmul.f32 %v6848_v60, %v3969_v5  ;;  %v189_v24 = vsel %vm186_vm5, %v187_v48, %v188_v32  ;;  %v296_v57 = vsel %vm291_vm8, %v293_v52, %v295_v22 }
 0x24e   :  { %v194_v35 = vadd.f32 %v189_v24, %v175_v10  ;;  %v250_v42 = vmul.f32 %v6815_v11, %v3971_v6  ;;  %v312_v3 = vsel %vm291_vm8, %v309_v55, %v311_v43  ;;  %v205_v50 = vsel %vm186_vm5, %v203_v27, %v204_v33 }
 0x24f   :  { %v300_v5 = vadd.f32 %v296_v57, %v281_v56  ;;  %v222_v32 = vrot.slane %v215_v8, 4  ;;  %v238_v23 = vrot.slane %v232_v45, 4  ;;  %v285_v22 = vmul.f32 %v6842_v1, %v3971_v6  ;;  %v6950_v6 = vld [vmem:[#allocation3 + $0x10] sm:$0x3f]  ;;  %v6961_v8 = vpop.permute.xlu0 %989 }
 0x250   :  { %v210_v59 = vadd.f32 %v205_v50, %v194_v35  ;;  %v1757_v16 = vmul.f32 %v6937_v39, %v6704_v21  ;;  %v273_v62 = vrot.slane %v267_v9, 5  ;;  %v308_v26 = vrot.slane %v302_v63, 6 }
 0x251   :  { %v316_v0 = vadd.f32 %v312_v3, %v300_v5  ;;  %v224_v51 = vsel %vm221_vm6, %v222_v32, %v223_v40  ;;  %v257_v33 = vrot.slane %v250_v42, 5  ;;  %v6948_v17 = vmul.f32 %v6944_v28, %v6716_v14 }
 0x252   :  { %v229_v43 = vadd.f32 %v224_v51, %v210_v59  ;;  %v1773_v18 = vmul.f32 %v6950_v6, %v6716_v14  ;;  %v240_v47 = vsel %vm221_vm6, %v238_v23, %v239_v25  ;;  %v275_v40 = vsel %vm256_vm7, %v273_v62, %v274_v29 }
 0x253   :  { %v544_v48 = vadd.f32 %v6812_v41, %v316_v0  ;;  %v1749_v49 = vmul.f32 %v6944_v28, %v6742_v15  ;;  %v259_v45 = vsel %vm256_vm7, %v257_v33, %v258_v31  ;;  %v292_v10 = vrot.slane %v285_v22, 6  ;;  %v1444_v41 = vpop.permute.xlu1 %1443  ;;  %v1216_v23 = vpop.permute.xlu0 %1215 }
 0x254   :  { %v245_v27 = vadd.f32 %v240_v47, %v229_v43  ;;  %v1764_v56 = vrot.slane %v1757_v16, 1  ;;  %v1791_v25 = vmul.f32 %v6937_v39, %v6744_v2  ;;  %v1744_v29 = vmul.f32 %v6971_v4, %v6731_v37 }
 0x255   :  { %v770_v46 = vadd.f32 %v6862_v61, %v544_v48  ;;  %v1756_v9 = vmul.f32 %v6971_v4, %v6704_v21  ;;  %v1778_v12 = vrot.slane %v6948_v17, 1  ;;  %v1780_v31 = vrot.slane %v1773_v18, 1  ;;  %v7012_v17 = vld [vmem:[#allocation2] sm:$0xff] }
 0x256   :  { %v264_v63 = vadd.f32 %v259_v45, %v245_v27  ;;  %v6980_v24 = vmul.f32 %v6944_v28, %v6726_v7  ;;  %v6985_v57 = vmul.f32 %v6950_v6, %v6726_v7  ;;  %v6989_v35 = vmul.f32 %v6937_v39, %v6754_v38 }
 0x257   :  { %v996_v61 = vadd.f32 %v6895_v34, %v770_v46  ;;  %v1762_v42 = vrot.slane %v1756_v9, 1  ;;  %v310_v3 = vsel %vm291_vm8, %v308_v26, %v309_v55  ;;  %v1751_v50 = vadd.f32 %v1749_v49, %v1744_v29  ;;  %v1670_v0 = vpop.permute.xlu1 %1669  ;;  %v7022_v49 = vld [vmem:[#allocation3] sm:$0xff] }
 0x258   :  { %v280_v5 = vadd.f32 %v275_v40, %v264_v63  ;;  %v294_v32 = vsel %vm291_vm8, %v292_v10, %v293_v52  ;;  %v1798_v59 = vrot.slane %v1791_v25, 2  ;;  %v1781_v62 = vsel %vm116_vm3, %v1778_v12, %v1780_v31 }
 0x259   :  { %v1222_v34 = vadd.f32 %v1218_v13, %v996_v61  ;;  %v1765_v22 = vsel %vm116_vm3, %v1762_v42, %v1764_v56  ;;  %v1812_v51 = vrot.slane %v6980_v24, 2  ;;  %v1790_v53 = vmul.f32 %v6971_v4, %v6744_v2  ;;  %v1442_v56 = vpop.permute.xlu0 %1441 }
 0x25a   :  { %v299_v16 = vadd.f32 %v294_v32, %v280_v5  ;;  %v1814_v26 = vrot.slane %v6985_v57, 2  ;;  %v1832_v36 = vrot.slane %v6989_v35, 3  ;;  %v7006_v52 = vmul.f32 %v6944_v28, %v6766_v30 }
 0x25b   :  { %v1448_v55 = vadd.f32 %v1444_v41, %v1222_v34  ;;  %v7010_v43 = vmul.f32 %v6950_v6, %v6766_v30  ;;  %v1769_v33 = vadd.f32 %v1765_v22, %v1751_v50  ;;  %v1743_v18 = vmul.f32 %v7012_v17, %v6731_v37 }
 0x25c   :  { %v315_v13 = vadd.f32 %v310_v3, %v299_v16  ;;  %v7018_v47 = vmul.f32 %v6944_v28, %v6783_v19  ;;  %v1824_v40 = vmul.f32 %v6971_v4, %v6754_v38  ;;  %v1748_v27 = vmul.f32 %v7022_v49, %v6742_v15 }
 0x25d   :  { %v1674_v48 = vadd.f32 %v1670_v0, %v1448_v55  ;;  %v1796_v10 = vrot.slane %v1790_v53, 2  ;;  %v1755_v41 = vmul.f32 %v7012_v17, %v6704_v21  ;;  %v1771_v37 = vmul.f32 %v7022_v49, %v6716_v14 }
 0x25e   :  { %v543_v45 = vadd.f32 %v6889_v58, %v315_v13  ;;  %v7033_v25 = vmul.f32 %v6971_v4, %v6787_v20  ;;  %v1750_v29 = vadd.f32 %v1748_v27, %v1743_v18  ;;  %v1789_v9 = vmul.f32 %v7012_v17, %v6744_v2 }
 0x25f   :  { %v3445_v46 = vmul.f32 -1.442695, %v1674_v48  ;;  %v1785_v58 = vadd.f32 %v1781_v62, %v1769_v33  ;;  %v1761_v63 = vrot.slane %v1755_v41, 1  ;;  %v1777_v31 = vrot.slane %v1771_v37, 1 }
 0x260   :  { %v769_v15 = vadd.f32 %v6922_v44, %v543_v45  ;;  %v1795_v21 = vrot.slane %v1789_v9, 2  ;;  %v1805_v14 = vmul.f32 %v7022_v49, %v6726_v7  ;;  %v1823_v24 = vmul.f32 %v7012_v17, %v6754_v38 }
 0x261   :  { %3558 = vpow2.f32 %v3445_v46  ;;  %v1799_v57 = vsel %vm151_vm4, %v1796_v10, %v1798_v59  ;;  %v1763_v35 = vsel %vm116_vm3, %v1761_v63, %v1762_v42  ;;  %v1779_v2 = vsel %vm116_vm3, %v1777_v31, %v1778_v12 }
 0x262   :  { %v995_v61 = vadd.f32 %v6961_v8, %v769_v15  ;;  %v1830_v44 = vrot.slane %v1824_v40, 3  ;;  %v1768_v3 = vadd.f32 %v1763_v35, %v1750_v29  ;;  %v1797_v5 = vsel %vm151_vm4, %v1795_v21, %v1796_v10  ;;  %v1668_v8 = vpop.permute.xlu0 %1667 }
 0x263   :  { %v1811_v50 = vrot.slane %v1805_v14, 2  ;;  %v1829_v34 = vrot.slane %v1823_v24, 3  ;;  %v1839_v7 = vmul.f32 %v7022_v49, %v6766_v30  ;;  %v1857_v38 = vmul.f32 %v7012_v17, %v6787_v20 }
 0x264   :  { %v1221_v32 = vadd.f32 %v1216_v23, %v995_v61  ;;  %v1846_v59 = vrot.slane %v7006_v52, 3  ;;  %v1803_v22 = vadd.f32 %v1799_v57, %v1785_v58  ;;  %v1784_v42 = vadd.f32 %v1779_v2, %v1768_v3 }
 0x265   :  { %v1873_v12 = vmul.f32 %v7022_v49, %v6783_v19  ;;  %v1815_v0 = vsel %vm151_vm4, %v1812_v51, %v1814_v26  ;;  %v1813_v23 = vsel %vm151_vm4, %v1811_v50, %v1812_v51  ;;  %v1845_v62 = vrot.slane %v1839_v7, 3 }
 0x266   :  { %v1447_v16 = vadd.f32 %v1442_v56, %v1221_v32  ;;  %v1880_v53 = vrot.slane %v7018_v47, 4  ;;  %v7059_v30 = vmul.f32 %v6944_v28, %v6818_v54  ;;  %v7063_v55 = vmul.f32 %v6971_v4, %v6815_v11 }
 0x267   :  { %v1802_v52 = vadd.f32 %v1797_v5, %v1784_v42  ;;  %v1864_v33 = vrot.slane %v7033_v25, 4  ;;  %v1831_v18 = vsel %vm186_vm5, %v1829_v34, %v1830_v44  ;;  %v1863_v26 = vrot.slane %v1857_v38, 4 }
 0x268   :  { %v1673_v13 = vadd.f32 %v1668_v8, %v1447_v16  ;;  %v1819_v48 = vadd.f32 %v1815_v0, %v1803_v22  ;;  %v1833_v51 = vsel %vm186_vm5, %v1830_v44, %v1832_v36  ;;  %v1879_v47 = vrot.slane %v1873_v12, 4  ;;  %v2179_v16 = vpop.permute.xlu1 %2178 }
 0x269   :  { %v1818_v40 = vadd.f32 %v1813_v23, %v1802_v52  ;;  %v1847_v45 = vsel %vm186_vm5, %v1845_v62, %v1846_v59  ;;  %v1891_v10 = vmul.f32 %v7012_v17, %v6815_v11  ;;  %v1907_v41 = vmul.f32 %v7022_v49, %v6818_v54 }
 0x26a   :  { %v3444_v27 = vmul.f32 -1.442695, %v1673_v13  ;;  %v1848_v37 = vrot.slane %v7010_v43, 3  ;;  %v1859_v56 = vmul.f32 %v6937_v39, %v6787_v20  ;;  %v1875_v36 = vmul.f32 %v6950_v6, %v6783_v19 }
 0x26b   :  { %v1836_v46 = vadd.f32 %v1831_v18, %v1818_v40  ;;  %v1914_v25 = vrot.slane %v7059_v30, 5  ;;  %v1865_v29 = vsel %vm221_vm6, %v1863_v26, %v1864_v33  ;;  %v1837_v9 = vadd.f32 %v1833_v51, %v1819_v48 }
 0x26c   :  { %3560 = vpow2.f32 %v3444_v27  ;;  %v1898_v15 = vrot.slane %v7063_v55, 5  ;;  %v1926_v58 = vmul.f32 %v6971_v4, %v6842_v1  ;;  %v1881_v31 = vsel %vm221_vm6, %v1879_v47, %v1880_v53  ;;  %v2405_v18 = vpop.permute.xlu1 %2404 }
 0x26d   :  { %v1852_v63 = vadd.f32 %v1847_v45, %v1836_v46  ;;  %v1897_v20 = vrot.slane %v1891_v10, 5  ;;  %v1913_v21 = vrot.slane %v1907_v41, 5  ;;  %v1925_v14 = vmul.f32 %v7012_v17, %v6842_v1 }
 0x26e   :  { %v3559_v43 = vpop.eup %3558  ;;  %v1849_v24 = vsel %vm186_vm5, %v1846_v59, %v1848_v37  ;;  %v1866_v61 = vrot.slane %v1859_v56, 4  ;;  %v1942_v35 = vmul.f32 %v6944_v28, %v6848_v60  ;;  %v1941_v4 = vmul.f32 %v7022_v49, %v6848_v60 }
 0x26f   :  { %v1682_v19 = vadd.f32 1.0, %v3559_v43  ;;  %v1870_v57 = vadd.f32 %v1865_v29, %v1852_v63  ;;  %v1932_v2 = vrot.slane %v1926_v58, 6  ;;  %v1853_v3 = vadd.f32 %v1849_v24, %v1837_v9 }
 0x270   :  { %v1899_v5 = vsel %vm256_vm7, %v1897_v20, %v1898_v15  ;;  %v1915_v50 = vsel %vm256_vm7, %v1913_v21, %v1914_v25  ;;  %v1931_v17 = vrot.slane %v1925_v14, 6  ;;  %v1882_v32 = vrot.slane %v1875_v36, 4  ;;  %v2631_v27 = vpop.permute.xlu1 %2630  ;;  %v2177_v36 = vpop.permute.xlu0 %2176 }
 0x271   :  { %3562 = vrcp.f32 %v1682_v19  ;;  %v1886_v44 = vadd.f32 %v1881_v31, %v1870_v57  ;;  %v1867_v34 = vsel %vm221_vm6, %v1864_v33, %v1866_v61  ;;  %v1948_v38 = vrot.slane %v1942_v35, 6 }
 0x272   :  { %v1947_v8 = vrot.slane %v1941_v4, 6  ;;  %v1893_v28 = vmul.f32 %v6937_v39, %v6815_v11  ;;  %v1871_v49 = vadd.f32 %v1867_v34, %v1853_v3  ;;  %v1933_v22 = vsel %vm291_vm8, %v1931_v17, %v1932_v2 }
 0x273   :  { %v1904_v7 = vadd.f32 %v1899_v5, %v1886_v44  ;;  %v1883_v42 = vsel %vm221_vm6, %v1880_v53, %v1882_v32  ;;  %v1909_v12 = vmul.f32 %v6950_v6, %v6818_v54  ;;  %v1927_v11 = vmul.f32 %v6937_v39, %v6842_v1 }
 0x274   :  { %v1949_v23 = vsel %vm291_vm8, %v1947_v8, %v1948_v38  ;;  %v1900_v30 = vrot.slane %v1893_v28, 5  ;;  %v1887_v13 = vadd.f32 %v1883_v42, %v1871_v49  ;;  %v1943_v40 = vmul.f32 %v6950_v6, %v6848_v60  ;;  %v2857_v37 = vpop.permute.xlu1 %2856 }
 0x275   :  { %v1920_v59 = vadd.f32 %v1915_v50, %v1904_v7  ;;  %v1916_v33 = vrot.slane %v1909_v12, 5  ;;  %v1934_v51 = vrot.slane %v1927_v11, 6 }
 0x276   :  { %v1901_v53 = vsel %vm256_vm7, %v1898_v15, %v1900_v30  ;;  %v1950_v45 = vrot.slane %v1943_v40, 6  ;;  %v2403_v15 = vpop.permute.xlu0 %2402 }
 0x277   :  { %v1938_v0 = vadd.f32 %v1933_v22, %v1920_v59  ;;  %v1905_v54 = vadd.f32 %v1901_v53, %v1887_v13  ;;  %v1917_v48 = vsel %vm256_vm7, %v1914_v25, %v1916_v33  ;;  %v1935_v10 = vsel %vm291_vm8, %v1932_v2, %v1934_v51 }
 0x278   :  { %v1951_v39 = vsel %vm291_vm8, %v1948_v38, %v1950_v45 }
 0x279   :  { %v3561_v62 = vpop.eup %3560  ;;  %v1954_v55 = vadd.f32 %v1949_v23, %v1938_v0  ;;  %v1921_v47 = vadd.f32 %v1917_v48, %v1905_v54 }
 0x27a   :  { %v1681_v52 = vadd.f32 1.0, %v3561_v62  ;;  %v2629_v43 = vpop.permute.xlu0 %2628 }
 0x27b   :  { %v1939_v41 = vadd.f32 %v1935_v10, %v1921_v47  ;;  %v3083_v29 = vpop.permute.xlu1 %3082  ;;  %v2182_v21 = vadd.f32 %v2177_v36, %v1954_v55 }
 0x27c   :  { %3564 = vrcp.f32 %v1681_v52 }
 0x27d   :  { %v1955_v56 = vadd.f32 %v1951_v39, %v1939_v41  ;;  %v2408_v14 = vadd.f32 %v2403_v15, %v2182_v21 }
 0x27e   :  { %v3563_v26 = vpop.eup %3562  ;;  %v2855_v20 = vpop.permute.xlu0 %2854 }
 0x27f   :  { %1689 = vst.msk [vmem:[#allocation9 + $0x8] sm:$0xff] %vm1687_vm9, %v3563_v26  ;;  %v2183_v46 = vadd.f32 %v2179_v16, %v1955_v56  ;;  %v2634_v24 = vadd.f32 %v2629_v43, %v2408_v14 }
 0x281   :  { %v2409_v25 = vadd.f32 %v2405_v18, %v2183_v46  ;;  %v2860_v57 = vadd.f32 %v2855_v20, %v2634_v24 }
 0x283   :  { %v2635_v9 = vadd.f32 %v2631_v27, %v2409_v25 }
 0x285   :  { %v2861_v60 = vadd.f32 %v2857_v37, %v2635_v9 }
 0x287   :  { %v3087_v6 = vadd.f32 %v3083_v29, %v2861_v60 }
 0x289   :  { %v3565_v1 = vpop.eup %3564 }
 0x28a   :  { %1688 = vst.msk [vmem:[#allocation9] sm:$0xff] %vm1687_vm9, %v3565_v1 }
 0x28f   :  { %v3081_v19 = vpop.permute.xlu0 %3080 }
 0x290   :  { %v3086_v4 = vadd.f32 %v3081_v19, %v2860_v57 }
 0x29e   :  { %v3309_v58 = vpop.permute.xlu1 %3308 }
 0x29f   :  { %v3313_v63 = vadd.f32 %v3309_v58, %v3087_v6 }
 0x2a1   :  { %v3544_v31 = vmul.f32 -1.442695, %v3313_v63 }
 0x2a3   :  { %3566 = vpow2.f32 %v3544_v31 }
 0x2b0   :  { %v3567_v61 = vpop.eup %3566 }
 0x2b1   :  { %v3321_v35 = vadd.f32 1.0, %v3567_v61 }
 0x2b2   :  { %v3307_v2 = vpop.permute.xlu0 %3306 }
 0x2b3   :  { %3568 = vrcp.f32 %v3321_v35  ;;  %v3312_v44 = vadd.f32 %v3307_v2, %v3086_v4 }
 0x2b5   :  { %v3543_v3 = vmul.f32 -1.442695, %v3312_v44 }
 0x2b7   :  { %3570 = vpow2.f32 %v3543_v3 }
 0x2c0   :  { %v3569_v5 = vpop.eup %3568 }
 0x2c1   :  { %3328 = vst.msk [vmem:[#allocation9 + $0x18] sm:$0xff] %vm1687_vm9, %v3569_v5 }
 0x2c4   :  { %v3571_v50 = vpop.eup %3570 }
 0x2c5   :  { %v3320_v17 = vadd.f32 1.0, %v3571_v50 }
 0x2c7   :  { %3572 = vrcp.f32 %v3320_v17 }
 0x2d4   :  { %v3573_v32 = vpop.eup %3572 }
 0x2d5   :  { %3327 = vst.msk [vmem:[#allocation9 + $0x10] sm:$0xff] %vm1687_vm9, %v3573_v32 }
 0x2d6   :  { %3625 = shalt.err (!%p3622_p9)
}
 0x2d7   :  { %s7307_s13 = smov 8   ;;  %s7308_s12 = smov 128  }
 0x2d8   :  { %s7309_s24 = sld [smem:[#allocation71_spill]] }
 0x2de   :  { %3340 = dma.vmem_to_hbm [thread:$0]  %s3335_s9, 512, %s7309_s24, [#allocation6], %s7308_s12, %s7308_s12, %s7307_s13  }
 0x2df   :  { %3638 = dma.done.wait [#allocation6], 512  }
 0x2e0   :  { %3639 = vsyncadd [#allocation6], 4294966784 }
 0x2e1   :  { %3344 = vsyncpa [#allocation5], 1 }
 0x2e2   :  { %3345 = vsyncpa [#allocation6], 1 }
 0x2e3   :  { %3346 = vsyncpa [#allocation7], 1 }

</bundles_post_ra>
